<compile_context>
chip_gen: v7x
topology: tpu7x:2x2x1
jax: 0.10.0
libtpu: 0.0.40
codegen_flags: <defaults>
</compile_context>

<pallas_src>
import jax
import jax.numpy as jnp
from jax import lax
from jax.experimental import pallas as pl
from jax.experimental.pallas import tpu as pltpu


def _sfc_kernel(uT_ref, iT_ref, fqb_ref, uid_ref, iid_ref, fid_ref, o_ref):
    # uT_ref  : (E, U)   f32  VMEM  user table, transposed, resident
    # iT_ref  : (E, I)   f32  VMEM  item table, transposed, resident
    # fqb_ref : (F, 1)   f32  VMEM  flattened freq table + global bias, resident
    # uid_ref : (1, TB)  i32  VMEM  user index per row (batch on lanes)
    # iid_ref : (1, TB)  i32  VMEM  item index per row
    # fid_ref : (1, TB)  i32  VMEM  flat freq-table index per row
    # o_ref   : (1, TB)  f32  VMEM  predicted rating (lane-dense)
    E, U = uT_ref.shape
    _, I = iT_ref.shape
    F = fqb_ref.shape[0]
    TB = o_ref.shape[1]

    uid = uid_ref[...]                                   # (1, TB)
    iid = iid_ref[...]
    fid = fid_ref[...]

    # One-hot gather: onehot[u, b] = (u == uid[b]).  Exact 0/1 values.
    onehot_u = (lax.broadcasted_iota(jnp.int32, (U, TB), 0) == uid).astype(jnp.float32)
    onehot_i = (lax.broadcasted_iota(jnp.int32, (I, TB), 0) == iid).astype(jnp.float32)
    onehot_f = (lax.broadcasted_iota(jnp.int32, (F, TB), 0) == fid).astype(jnp.float32)

    # MXU gather: (E, U) @ (U, TB) -> (E, TB) == user_emb[user[b]] on lanes.
    # HIGHEST precision keeps the f32 table values exact through the MXU.
    u = jnp.dot(uT_ref[...], onehot_u,
                preferred_element_type=jnp.float32,
                precision=lax.Precision.HIGHEST)          # (E, TB)
    it = jnp.dot(iT_ref[...], onehot_i,
                 preferred_element_type=jnp.float32,
                 precision=lax.Precision.HIGHEST)         # (E, TB)

    # Tiny freq(+bias) gather: exact VPU multiply + sublane reduce.
    fb = jnp.sum(fqb_ref[...] * onehot_f, axis=0, keepdims=True)   # (1, TB)

    # Dot-reduce over the embedding dim (sublanes) + add freq/bias term.
    o_ref[...] = jnp.sum(u * it, axis=0, keepdims=True) + fb


def sfc_forward(params, user, item, freq, idx_emb, zero, *, tb=2048):
    """JAX/Pallas equivalent of SFCModel.forward. Returns shape (B,) float32.

    tb: batch tile (lane-dense; multiple of 128).  2048-8192 is a good range
    on v5e/v6e/v7x for large batches; pick the largest tb that still leaves
    at least 2 grid steps so "parallel" can shard across v7x's 2 TensorCores.
    """
    emb_bias = params["bias"]   # (1, 1)
    emb_user = params["user"]   # (U, E)
    emb_item = params["item"]   # (I, E)
    emb_freq = params["freq"]   # (NF, NB)

    B = user.shape[0]
    U, E = emb_user.shape
    I = emb_item.shape[0]
    NF, NB = emb_freq.shape
    F = NF * NB

    assert tb % 128 == 0, "batch tile must be a multiple of 128 (lane width)"
    n_tiles = pl.cdiv(B, tb)
    Bp = n_tiles * tb
    pad = Bp - B

    # VMEM-resident table budget (fused-gather variant).  Keep well under the
    # scoped VMEM limit; see TODO(synk) at top for the large-vocab fallback.
    table_bytes = 4 * (E * U + E * I + F)
    assert table_bytes <= 8 * 1024 * 1024, (
        "embedding tables too large for the VMEM-resident fused-gather path")

    user = user.astype(jnp.int32)
    item = item.astype(jnp.int32)
    freq = freq.astype(jnp.int32)
    idx_emb = idx_emb.astype(jnp.int32)
    # Pad the (cheap) index vectors so the lane-dense rows are tile-aligned.
    # Index 0 is always valid; padded lanes compute harmless values that are
    # sliced off below (no in-kernel scatter/accumulation, so no masking needed).
    if pad:
        pad_i32 = jnp.zeros((pad,), jnp.int32)
        user = jnp.concatenate([user, pad_i32])
        item = jnp.concatenate([item, pad_i32])
        freq = jnp.concatenate([freq, pad_i32])
        idx_emb = jnp.concatenate([idx_emb, pad_i32])

    # Lane-dense (1, Bp) index rows.
    uid = user.reshape(1, Bp)
    iid = item.reshape(1, Bp)
    fid = (idx_emb * NB + freq).reshape(1, Bp)            # flat freq-table index

    # Tables, transposed so the in-kernel one-hot matmul yields (E, TB) directly.
    uT = emb_user.T.astype(jnp.float32)                   # (E, U)
    iT = emb_item.T.astype(jnp.float32)                   # (E, I)
    # Global bias folded into the flattened freq table (bias table has a single
    # row, so any valid `zero` selects the same scalar).
    fqb = (emb_freq.reshape(F, 1) + emb_bias[0, 0]).astype(jnp.float32)   # (F, 1)

    out = pl.pallas_call(
        _sfc_kernel,
        out_shape=jax.ShapeDtypeStruct((1, Bp), jnp.float32),
        grid_spec=pltpu.PrefetchScalarGridSpec(
            num_scalar_prefetch=0,
            grid=(n_tiles,),
            in_specs=[
                # Resident tables: constant block index -> DMA'd once, reused.
                pl.BlockSpec((E, U), lambda i: (0, 0)),
                pl.BlockSpec((E, I), lambda i: (0, 0)),
                pl.BlockSpec((F, 1), lambda i: (0, 0)),
                # Per-tile lane-dense index rows.
                pl.BlockSpec((1, tb), lambda i: (0, i)),
                pl.BlockSpec((1, tb), lambda i: (0, i)),
                pl.BlockSpec((1, tb), lambda i: (0, i)),
            ],
            out_specs=pl.BlockSpec((1, tb), lambda i: (0, i)),
        ),
        compiler_params=pltpu.CompilerParams(
            dimension_semantics=("parallel",)),   # shards tiles across v7x TCs
    )(uT, iT, fqb, uid, iid, fid)
    return out[0, :B]


def init_params(key, num_users, num_items, frequency_num_bins,
                frequency_num_embeddings, embedding_size):
    """Deterministic parameter init matching SFCModel.__init__ semantics."""
    k_bias, k_user, k_item = jax.random.split(key, 3)
    return {
        # torch.nn.init.normal_(..., mean=0.0, std=0.1)
        "bias": 0.1 * jax.random.normal(k_bias, (1, 1), jnp.float32),
        "user": 0.1 * jax.random.normal(k_user, (num_users, embedding_size),
                                        jnp.float32),
        "item": 0.1 * jax.random.normal(k_item, (num_items, embedding_size),
                                        jnp.float32),
        # torch.nn.init.zeros_ on every frequency embedding (dim 1), stacked
        # into a single (num_embeddings, num_bins) table.
        "freq": jnp.zeros((frequency_num_embeddings, frequency_num_bins),
                          jnp.float32),
    }


def ref_forward(params, user, item, freq, idx_emb, zero):
    """Pure-JAX reference mirroring the PyTorch forward."""
    u = params["user"][user]                       # (B, E)
    it = params["item"][item]                      # (B, E)
    bias = params["bias"][zero, 0]                 # (B,)
    f = params["freq"][idx_emb, freq]              # (B,)
    return bias + jnp.sum(u * it, axis=-1) + f     # (B,)


if __name__ == "__main__":
    num_users = 64
    num_items = 96
    frequency_num_bins = 16
    frequency_num_embeddings = 4
    embedding_size = 32
    batch = 1000          # not a tile multiple -> exercises the padding path
    tb = 512              # multiple of 128; 2 grid steps keep both v7x TCs busy

    key = jax.random.PRNGKey(0)
    (k_params, k_user, k_item, k_freq, k_idx,
     k_freq_tbl) = jax.random.split(key, 6)

    params = init_params(k_params, num_users, num_items, frequency_num_bins,
                         frequency_num_embeddings, embedding_size)
    # Use non-zero frequency tables in the test so the freq-gather path is
    # actually verified (the module init zeros them).
    params = dict(params,
                  freq=0.1 * jax.random.normal(
                      k_freq_tbl,
                      (frequency_num_embeddings, frequency_num_bins),
                      jnp.float32))

    user = jax.random.randint(k_user, (batch,), 0, num_users, jnp.int32)
    item = jax.random.randint(k_item, (batch,), 0, num_items, jnp.int32)
    freq = jax.random.randint(k_freq, (batch,), 0, frequency_num_bins, jnp.int32)
    idx_emb = jax.random.randint(k_idx, (batch,), 0, frequency_num_embeddings,
                                 jnp.int32)
    zero = jnp.zeros((batch,), jnp.int32)

    pred = sfc_forward(params, user, item, freq, idx_emb, zero, tb=tb)
    pred = jax.block_until_ready(pred)

    expected = ref_forward(params, user, item, freq, idx_emb, zero)
    assert pred.shape == (batch,)
    assert jnp.allclose(pred, expected, atol=1e-5, rtol=1e-5), (pred, expected)

    print("KERNEL_OK")
</pallas_src>

<mosaic_0001>
module attributes {stable_mosaic.version = 11 : i64} {
  func.func @_sfc_kernel(%arg0: i32, %arg1: memref<32x64xf32, #tpu.memory_space<vmem>>, %arg2: memref<32x96xf32, #tpu.memory_space<vmem>>, %arg3: memref<64x1xf32, #tpu.memory_space<vmem>>, %arg4: memref<1x512xi32, #tpu.memory_space<vmem>>, %arg5: memref<1x512xi32, #tpu.memory_space<vmem>>, %arg6: memref<1x512xi32, #tpu.memory_space<vmem>>, %arg7: memref<1x512xf32, #tpu.memory_space<vmem>>) attributes {dimension_semantics = [#tpu.dimension_semantics<parallel>], iteration_bounds = array<i64: 2>, scalar_prefetch = 0 : i64, scratch_operands = 0 : i64, tpu.core_type = #tpu.core_type<tc>, window_params = [{pipeline_mode = #tpu.pipeline_mode<synchronous>, transform_indices = @transform_0, window_bounds = array<i64: 32, 64>}, {pipeline_mode = #tpu.pipeline_mode<synchronous>, transform_indices = @transform_1, window_bounds = array<i64: 32, 96>}, {pipeline_mode = #tpu.pipeline_mode<synchronous>, transform_indices = @transform_2, window_bounds = array<i64: 64, 1>}, {transform_indices = @transform_3, window_bounds = array<i64: 1, 512>}, {transform_indices = @transform_4, window_bounds = array<i64: 1, 512>}, {transform_indices = @transform_5, window_bounds = array<i64: 1, 512>}, {transform_indices = @transform_6, window_bounds = array<i64: 1, 512>}]} {
    %c0 = arith.constant 0 : index
    %c0_0 = arith.constant 0 : index
    %0 = vector.load %arg4[%c0, %c0_0] : memref<1x512xi32, #tpu.memory_space<vmem>>, vector<1x512xi32>
    %c0_1 = arith.constant 0 : index
    %c0_2 = arith.constant 0 : index
    %1 = vector.load %arg5[%c0_1, %c0_2] : memref<1x512xi32, #tpu.memory_space<vmem>>, vector<1x512xi32>
    %c0_3 = arith.constant 0 : index
    %c0_4 = arith.constant 0 : index
    %2 = vector.load %arg6[%c0_3, %c0_4] : memref<1x512xi32, #tpu.memory_space<vmem>>, vector<1x512xi32>
    %3 = tpu.iota {dimensions = array<i32: 0>} : vector<64x512xi32>
    %4 = vector.broadcast %0 : vector<1x512xi32> to vector<64x512xi32>
    %5 = arith.cmpi eq, %3, %4 : vector<64x512xi32>
    %6 = arith.extui %5 : vector<64x512xi1> to vector<64x512xi32>
    %7 = arith.sitofp %6 : vector<64x512xi32> to vector<64x512xf32>
    %8 = tpu.iota {dimensions = array<i32: 0>} : vector<96x512xi32>
    %9 = vector.broadcast %1 : vector<1x512xi32> to vector<96x512xi32>
    %10 = arith.cmpi eq, %8, %9 : vector<96x512xi32>
    %11 = arith.extui %10 : vector<96x512xi1> to vector<96x512xi32>
    %12 = arith.sitofp %11 : vector<96x512xi32> to vector<96x512xf32>
    %13 = tpu.iota {dimensions = array<i32: 0>} : vector<64x512xi32>
    %14 = vector.broadcast %2 : vector<1x512xi32> to vector<64x512xi32>
    %15 = arith.cmpi eq, %13, %14 : vector<64x512xi32>
    %16 = arith.extui %15 : vector<64x512xi1> to vector<64x512xi32>
    %17 = arith.sitofp %16 : vector<64x512xi32> to vector<64x512xf32>
    %c0_5 = arith.constant 0 : index
    %c0_6 = arith.constant 0 : index
    %18 = vector.load %arg1[%c0_5, %c0_6] : memref<32x64xf32, #tpu.memory_space<vmem>>, vector<32x64xf32>
    %cst = arith.constant dense<0.000000e+00> : vector<32x512xf32>
    %19 = tpu.matmul %18, %7, %cst {dimension_numbers = #tpu.dot_dimension_numbers<[1], [0], [0], [1], [0, 0, 1, 1], [], []>, precision = #tpu.contract_precision<fp32>} : vector<32x64xf32>, vector<64x512xf32>, vector<32x512xf32> -> vector<32x512xf32>
    %c0_7 = arith.constant 0 : index
    %c0_8 = arith.constant 0 : index
    %20 = vector.load %arg2[%c0_7, %c0_8] : memref<32x96xf32, #tpu.memory_space<vmem>>, vector<32x96xf32>
    %cst_9 = arith.constant dense<0.000000e+00> : vector<32x512xf32>
    %21 = tpu.matmul %20, %12, %cst_9 {dimension_numbers = #tpu.dot_dimension_numbers<[1], [0], [0], [1], [0, 0, 1, 1], [], []>, precision = #tpu.contract_precision<fp32>} : vector<32x96xf32>, vector<96x512xf32>, vector<32x512xf32> -> vector<32x512xf32>
    %c0_10 = arith.constant 0 : index
    %c0_11 = arith.constant 0 : index
    %22 = vector.load %arg3[%c0_10, %c0_11] : memref<64x1xf32, #tpu.memory_space<vmem>>, vector<64x1xf32>
    %23 = vector.broadcast %22 : vector<64x1xf32> to vector<64x512xf32>
    %24 = arith.mulf %23, %17 : vector<64x512xf32>
    %cst_12 = arith.constant dense<0.000000e+00> : vector<512xf32>
    %25 = vector.multi_reduction <add>, %24, %cst_12 [0] : vector<64x512xf32> to vector<512xf32>
    %26 = vector.shape_cast %25 : vector<512xf32> to vector<1x512xf32>
    %27 = arith.mulf %19, %21 : vector<32x512xf32>
    %cst_13 = arith.constant dense<0.000000e+00> : vector<512xf32>
    %28 = vector.multi_reduction <add>, %27, %cst_13 [0] : vector<32x512xf32> to vector<512xf32>
    %29 = vector.shape_cast %28 : vector<512xf32> to vector<1x512xf32>
    %30 = arith.addf %29, %26 : vector<1x512xf32>
    %c0_14 = arith.constant 0 : index
    %c0_15 = arith.constant 0 : index
    %31 = vector.load %arg7[%c0_14, %c0_15] : memref<1x512xf32, #tpu.memory_space<vmem>>, vector<1x512xf32>
    tpu.vector_store %arg7[%c0_14, %c0_15], %30 {strides = array<i32>} : memref<1x512xf32, #tpu.memory_space<vmem>>, vector<1x512xf32>,
    return
  }
  func.func @transform_0(%arg0: i32) -> (i32, i32) {
    %c0_i32 = arith.constant 0 : i32
    %c0_i32_0 = arith.constant 0 : i32
    %c0_i32_1 = arith.constant 0 : i32
    return %c0_i32, %c0_i32_0 : i32, i32
  }
  func.func @transform_1(%arg0: i32) -> (i32, i32) {
    %c0_i32 = arith.constant 0 : i32
    %c0_i32_0 = arith.constant 0 : i32
    %c0_i32_1 = arith.constant 0 : i32
    return %c0_i32, %c0_i32_0 : i32, i32
  }
  func.func @transform_2(%arg0: i32) -> (i32, i32) {
    %c0_i32 = arith.constant 0 : i32
    %c0_i32_0 = arith.constant 0 : i32
    %c0_i32_1 = arith.constant 0 : i32
    return %c0_i32, %c0_i32_0 : i32, i32
  }
  func.func @transform_3(%arg0: i32) -> (i32, i32) {
    %c0_i32 = arith.constant 0 : i32
    %c0_i32_0 = arith.constant 0 : i32
    return %c0_i32, %arg0 : i32, i32
  }
  func.func @transform_4(%arg0: i32) -> (i32, i32) {
    %c0_i32 = arith.constant 0 : i32
    %c0_i32_0 = arith.constant 0 : i32
    return %c0_i32, %arg0 : i32, i32
  }
  func.func @transform_5(%arg0: i32) -> (i32, i32) {
    %c0_i32 = arith.constant 0 : i32
    %c0_i32_0 = arith.constant 0 : i32
    return %c0_i32, %arg0 : i32, i32
  }
  func.func @transform_6(%arg0: i32) -> (i32, i32) {
    %c0_i32 = arith.constant 0 : i32
    %c0_i32_0 = arith.constant 0 : i32
    return %c0_i32, %arg0 : i32, i32
  }
}

</mosaic_0001>

<bundles_post_ra>
// kernel: tpu_custom_call.1
= control target key start
LH: loop header
LB: loop body
LE: loop exit
PB: predicated region body
PF: predicated region fallthrough
CT: control target
= control target key end

     0   :  { %11 = vsyncpa [#allocation3], 0  ;;  %s8421_s0 = inlined_call_operand.vmem [shape: f32[32,64], index: 0, kind: input, shape index: {}]   ;;  %s8422_s1 = inlined_call_operand.vmem [shape: f32[32,96], index: 1, kind: input, shape index: {}]   ;;  %s8423_s2 = inlined_call_operand.vmem [shape: f32[64,1], index: 2, kind: input, shape index: {}]   ;;  %s8424_s3 = inlined_call_operand.vmem [shape: s32[1,1024], index: 3, kind: input, shape index: {}]   ;;  %s8425_s4 = inlined_call_operand.vmem [shape: s32[1,1024], index: 4, kind: input, shape index: {}]   ;;  %s8426_s5 = inlined_call_operand.hbm [shape: s32[1,1024], index: 5, kind: input, shape index: {}]   ;;  %s8427_s6 = inlined_call_operand.hbm [shape: f32[1,1024], index: 6, kind: output, shape index: {}]  }
   0x1   :  { %13 = vsyncpa [#allocation3 + $0x1], 0 }
   0x2   :  { %14 = vsyncpa [#allocation4], 0 }
   0x3   :  { %16 = vsyncpa [#allocation4 + $0x1], 0  ;;  %s5652_s21 = smov 0   ;;  %s5654_s22 = smov 0  }
   0x4   :  { %s5656_s23 = smov 0   ;;  %s5658_s24 = smov 0  }
   0x5 LB: > { %s5673_s25 = sadd.s32 4294967295, %s5609_s24   ;;  %s4451_s26 = sadd.s32 4294967294, %s5609_s24   ;;  %s5609_s24 = sphi %s5658_s24, %s9367_s24   ;;  %s5605_s23 = sphi %s5656_s23, %s9366_s23   ;;  %s5601_s22 = sphi %s5654_s22, %s9365_s22   ;;  %s5597_s21 = sphi %s5652_s21, %s9364_s21  }
   0x6   : > { %s5677_s27 = sadd.s32 1, %s5609_s24   ;;  %s144_s28 = sadd.s32 1, %s5605_s23 }
   0x7   : > { %s141_s29 = ssub.s32 %s5609_s24, %s5677_s27  ;;  %p151_p0 = scmp.ne.s32.totalorder %s5605_s23, %s5601_s22 }
   0x8   : > { %p142_p1 = scmp.eq.s32.totalorder %s141_s29, 0  ;;  %p152_p2 = scmp.eq.s32.totalorder %s5609_s24, 0 }
   0x9   : > { %p157_p3 = scmp.ne.s32.totalorder %s5601_s22, %s5597_s21  ;;  %p158_p4 = scmp.eq.s32.totalorder %s5673_s25, 0 }
   0xa   : > { %s5689_s30 = scalar_select %p142_p1, %s5605_s23, %s144_s28  }
   0xb   : > { %p5691_p5 = por %p152_p2, %p151_p0  ;;  %p5695_p6 = por %p158_p4, %p157_p3 }
   0xc   : > { %p181_p7 = scmp.eq.s32.totalorder %s5673_s25, 1  ;;  %p187_p8 = scmp.eq.s32.totalorder %s4451_s26, 1 }
   0xd   : > { %p5473_p10 = scmp.lt.s32.totalorder %s5609_s24, 2  ;;  %s232_s11 = sand.u32 1, %s5605_s23  }
   0xe   : > { %p5702_p11 = por %p181_p7, %p151_p0  ;;  %p5706_p12 = por %p187_p8, %p157_p3 }
   0xf   : > { %s4819_s12 = sshll.u32 %s5609_s24, 6  ;;  %s4454_s13 = sshll.u32 %s232_s11, 2 }
  0x10   : > { %s8757_s9 = scalar_select %p5702_p11, 1, 0 }
  0x11   : > { %s8758_s10 = scalar_select %p5706_p12, 1, 0 }
  0x12   : > { %s5715_s16 = scalar_lea.hbm %s8426_s5, %s4819_s12  ;;  %s236_s17 = scalar_lea.vmem [#allocation2], %s4454_s13 }
  0x13   : > { %s244_s18 = sshll.u32 %s236_s17, 4  ;;  %p5719_p13 = pnand %p5473_p10, %p5691_p5  ;;  %s5723_s18 = int_to_ptr.vmem [resolvable:$true] %s244_s18 }
  0x14   : > { %s233_s20 = scalar_lea.sflag [#allocation3], %s232_s11  ;;  %s5513_s26 = scalar_lea.hbm %s5715_s16, 64 }
  0x15   : > { %p5514_p2 = scmp.ne.s32.totalorder %s5715_s16, %s5513_s26  ;;  %p5515_p3 = pneg %p5719_p13 }
  0x16   : > { %s5518_s7 = scalar_lea.hbm %s8426_s5, 128  ;;  %p5519_p5 = scmp.lt.u32.totalorder %s5715_s16, %s8426_s5 }
  0x17   : > { %p5516_p4 = pnand %p5515_p3, %p5514_p2  ;;  %p5520_p8 = scmp.lt.u32.totalorder %s5518_s7, %s5513_s26 }
  0x18   : > { %p5522_p9 = scmp.lt.u32.totalorder %s5513_s26, %s5715_s16 }
  0x19   : > { %p5517_p7 = pneg %p5516_p4  ;;  %p5521_p10 = por %p5520_p8, %p5519_p5 }
  0x1b   : > { %p5523_p0 = por %p5522_p9, %p5521_p10 }
  0x1d   : > { %p5524_p1 = pnand %p5523_p0, %p5517_p7 }
  0x1f   : > { %5527 = shalt.err (!%p5524_p1)
}
  0x20   : > { %s5528_s11 = scalar_lea.vmem %s5723_s18, 64  ;;  %s5611_s14 = smov [#allocation2]  }
  0x21   : > { %p5529_p2 = scmp.ne.s32.totalorder %s5723_s18, %s5528_s11  ;;  %s5533_s15 = sshll.u32 %s5611_s14, 4  ;;  %s5534_s15 = int_to_ptr.vmem [resolvable:$false] %s5533_s15 }
  0x22   : > { %s5535_s17 = scalar_lea.vmem %s5534_s15, 128  ;;  %p5536_p11 = scmp.lt.s32.totalorder %s5723_s18, %s5534_s15 }
  0x23   : > { %p5531_p4 = pnand %p5529_p2, %p5515_p3  ;;  %p5537_p5 = scmp.lt.s32.totalorder %s5535_s17, %s5528_s11 }
  0x25   : > { %p5532_p12 = pneg %p5531_p4  ;;  %p5538_p8 = por %p5537_p5, %p5536_p11 }
  0x27   : > { %p5539_p9 = pnand %p5538_p8, %p5532_p12 }
  0x29   : > { %5542 = shalt.err (!%p5539_p9)
}
  0x2a   : > { %5468 = dma.hbm_to_vmem [thread:$0]  (!%p5719_p13), %s5715_s16, 64, %s5723_s18, %s233_s20  }
  0x2b   : > { %p8760_p0 = scmp.lt.s32.totalorder %s5609_s24, 3  ;;  %p8761_p1 = scmp.ge.s32.totalorder %s5609_s24, 1 }
  0x2d   : > { %p250_p3 = pnand %p8761_p1, %p8760_p0 }
  0x2f   : > { %253 = sbr.rel (%p250_p3) target bundleno = 655 (0x28f), region = 44 }
  0x36   : > { %s5757_s26 = sand.u32 1, %s5601_s22  }
  0x37   : > { %s4458_s28 = sshll.u32 %s5757_s26, 2  ;;  %s256_s29 = scalar_lea.sflag [#allocation3], %s5757_s26 }
  0x38   : > { %s5763_s19 = scalar_lea.vmem [#allocation2], %s4458_s28 }
  0x39   : > { %5588 = dma.done.wait (%p5695_p6), %s256_s29, 64  }
  0x3a   : > { %5590 = vsyncadd (%p5695_p6), %s256_s29, 4294967232  ;;  %s4460_s16 = sshll.u32 %s5673_s25, 2  ;;  %v8429_v0 = vlaneseq  ;;  %v8458_v1 = vmov 0.0   ;;  %v8774_v21 = vmov 0  ;;  %v8444_v24 = vmov 1.0|1.0  }
  0x3b   : > { %p297_p11 = scmp.lt.s32.totalorder %s4460_s16, 7  ;;  %805 = vmatprep.mubr.f32.mxu0 %v8458_v1  ;;  %1599 = vmatprep.mubr.f32.mxu1 %v8458_v1  ;;  %v8777_v27 = vmov 0  ;;  %v8780_v32 = vmov 0  ;;  %v8783_v37 = vmov 0  ;;  %v8786_v44 = vmov 0  ;;  %s4349_s14 = scalar_lea.sflag [#allocation4], %s5757_s26 }
  0x3c   : > { %v5773_v2 = vshrl.u32 %v8429_v0, 7  ;;  %v8789_v49 = vmov 0  ;;  %v8801_v0 = vmov 0  ;;  %v8810_v59 = vmov 0  ;;  %p9361_p12 = scmp.ne.s32.totalorder %s8757_s9, 0 }
  0x3d   : > { %s9369_s16 = smov (!%p297_p11, %s4460_s16), 7 }
  0x3e   : > { %8762 = vst [vmem:[#allocation8_spill] sm:$0xff] %v5773_v2  ;;  %v5778_v3 = vsub.s32 1, %v5773_v2  ;;  %v5781_v4 = vsub.s32 3, %v5773_v2  ;;  %s299_s20 = scalar_lea.vmem %s8424_s3, %s9369_s16  ;;  %v5788_v5 = vsub.s32 0, %v5773_v2  ;;  %v5791_v6 = vsub.s32 2, %v5773_v2 }
  0x3f   : > { %v5794_v7 = vadd.s32 8, %v5773_v2  ;;  %v308_v8 = vld [vmem:[%s299_s20] sm:$0xf]  ;;  %v5797_v9 = vadd.s32 16, %v5773_v2  ;;  %v5800_v10 = vadd.s32 24, %v5773_v2  ;;  %v5809_v13 = vadd.s32 32, %v5773_v2  ;;  %s304_s20 = scalar_lea.vmem %s8425_s4, %s9369_s16 }
  0x40   : > { %8763 = vst [vmem:[#allocation9_spill] sm:$0xff] %v5778_v3  ;;  %8764 = vst [vmem:[#allocation10_spill] sm:$0xff] %v5781_v4  ;;  %v5803_v11 = vrot.slane %v308_v8, %v5778_v3  ;;  %v5806_v12 = vrot.slane %v308_v8, %v5781_v4  ;;  %v5812_v14 = vadd.s32 40, %v5773_v2  ;;  %v5815_v15 = vrot.slane %v308_v8, %v5788_v5  ;;  %s295_s16 = scalar_lea.vmem [#allocation5], %s4458_s28  ;;  %s5616_s28 = smov [#allocation5]  }
  0x41   : > { %8765 = vst [vmem:[#allocation11_spill] sm:$0xff] %v5788_v5  ;;  %8766 = vst [vmem:[#allocation12_spill] sm:$0xff] %v5791_v6  ;;  %v5818_v16 = vrot.slane %v308_v8, %v5791_v6  ;;  %v5821_v17 = vadd.s32 48, %v5773_v2  ;;  %v5824_v18 = vadd.s32 56, %v5773_v2  ;;  %v8792_v8 = vmov 0  ;;  %s4363_s7 = sshll.u32 %s295_s16, 4  ;;  %s8379_s7 = int_to_ptr.vmem [resolvable:$true] %s4363_s7 }
  0x42   : > { %8767 = vst [vmem:[#allocation13_spill] sm:$0xff] %v5794_v7  ;;  %8768 = vst [vmem:[#allocation14_spill] sm:$0xff] %v5797_v9  ;;  %vm337_vm0 = vcmp.eq.s32.totalorder %v5773_v2, %v5803_v11  ;;  %vm341_vm1 = vcmp.eq.s32.totalorder %v5794_v7, %v5803_v11  ;;  %vm339_vm2 = vcmp.eq.s32.totalorder %v5773_v2, %v5806_v12  ;;  %s5547_s15 = sshll.u32 %s5616_s28, 4  ;;  %s5548_s15 = int_to_ptr.vmem [resolvable:$false] %s5547_s15 }
  0x43   : > { %8769 = vst [vmem:[#allocation15_spill] sm:$0xff] %v5800_v10  ;;  %8770 = vst [vmem:[#allocation16_spill] sm:$0xff] %v5809_v13  ;;  %vm343_vm3 = vcmp.eq.s32.totalorder %v5794_v7, %v5806_v12  ;;  %v4463_v19 = vsel %vm337_vm0, 1.0, %v8458_v1  ;;  %v4467_v20 = vsel %vm341_vm1, 1.0, %v8458_v1  ;;  %v4465_v22 = vsel %vm339_vm2, 1.0, %v8458_v1  ;;  %s5549_s17 = scalar_lea.vmem %s5548_s15, 128  ;;  %p5550_p10 = scmp.lt.s32.totalorder %s8379_s7, %s5548_s15 }
  0x44   : > { %8771 = vst [vmem:[#allocation17_spill] sm:$0xff] %v5812_v14  ;;  %8772 = vst [vmem:[#allocation18_spill] sm:$0xff] %v5821_v17  ;;  %v4469_v23 = vsel %vm343_vm3, 1.0, %v8458_v1  ;;  %v5845_v25 = vsub.f32 %v4463_v19, %v4463_v19  ;;  %v5847_v26 = vsub.f32 %v4467_v20, %v4467_v20  ;;  %v5853_v28 = vsub.f32 %v4465_v22, %v4465_v22 }
  0x45   : > { %8773 = vst [vmem:[#allocation19_spill] sm:$0xff] %v5824_v18  ;;  %vm5836_vm4 = vmpackc.low %vm341_vm1, %vm337_vm0  ;;  %v5855_v29 = vsub.f32 %v4469_v23, %v4469_v23  ;;  %vm336_vm6 = vcmp.eq.s32.totalorder %v5773_v2, %v5815_v15  ;;  %vm340_vm7 = vcmp.eq.s32.totalorder %v5794_v7, %v5815_v15  ;;  %vm338_vm8 = vcmp.eq.s32.totalorder %v5773_v2, %v5818_v16 }
  0x46   : > { %v8775_v21 = vsel %vm5836_vm4, 4294967295, %v8774_v21  ;;  %4822 = vmatprep.subr.msk.bf16.mxu0 %vm5836_vm4, %v8444_v24  ;;  %vm5849_vm5 = vmpackc.low %vm343_vm3, %vm339_vm2  ;;  %vm342_vm9 = vcmp.eq.s32.totalorder %v5794_v7, %v5818_v16  ;;  %v4462_v30 = vsel %vm336_vm6, 1.0, %v8458_v1  ;;  %v4466_v31 = vsel %vm340_vm7, 1.0, %v8458_v1 }
  0x47   : > { %8776 = vst [vmem:[#allocation20_spill] sm:$0xff] %v8775_v21  ;;  %v8778_v27 = vsel %vm5849_vm5, 4294967295, %v8777_v27  ;;  %4918 = vmatprep.subr.msk.bf16.mxu1 %vm5849_vm5, %v8444_v24  ;;  %vm5870_vm10 = vmpackc.low %vm340_vm7, %vm336_vm6  ;;  %v4464_v33 = vsel %vm338_vm8, 1.0, %v8458_v1  ;;  %v4468_v34 = vsel %vm342_vm9, 1.0, %v8458_v1  ;;  %v5879_v35 = vsub.f32 %v4462_v30, %v4462_v30 }
  0x48   : > { %8779 = vst [vmem:[#allocation21_spill] sm:$0xff] %v8778_v27  ;;  %v8781_v32 = vsel %vm5870_vm10, 4294967295, %v8780_v32  ;;  %4824 = vmatpush1.bf16.msk.msra.mxu0 %vm5870_vm10, %v8444_v24  ;;  %v5881_v36 = vsub.f32 %v4466_v31, %v4466_v31  ;;  %vm5883_vm11 = vmpackc.low %vm342_vm9, %vm338_vm8  ;;  %v5887_v38 = vsub.f32 %v4464_v33, %v4464_v33  ;;  %v5889_v39 = vsub.f32 %v4468_v34, %v4468_v34 }
  0x49   : > { %8782 = vst [vmem:[#allocation22_spill] sm:$0xff] %v8781_v32  ;;  %v8784_v37 = vsel %vm5883_vm11, 4294967295, %v8783_v37  ;;  %4920 = vmatpush1.bf16.msk.msra.mxu1 %vm5883_vm11, %v8444_v24  ;;  %vm345_vm12 = vcmp.eq.s32.totalorder %v5797_v9, %v5803_v11  ;;  %vm349_vm13 = vcmp.eq.s32.totalorder %v5800_v10, %v5803_v11  ;;  %vm347_vm14 = vcmp.eq.s32.totalorder %v5797_v9, %v5806_v12 }
  0x4a   : > { %8785 = vst [vmem:[#allocation23_spill] sm:$0xff] %v8784_v37  ;;  %vm351_vm15 = vcmp.eq.s32.totalorder %v5800_v10, %v5806_v12  ;;  %v8433_v40 = vand.u32 4294901760, %v5879_v35  ;;  %v8432_v41 = vand.u32 4294901760, %v5881_v36  ;;  %v8431_v42 = vand.u32 4294901760, %v5887_v38  ;;  %vm5906_vm0 = vmpackc.low %vm349_vm13, %vm345_vm12 }
  0x4b   : > { %v8430_v43 = vand.u32 4294901760, %v5889_v39  ;;  %v8787_v44 = vsel %vm5906_vm0, 4294967295, %v8786_v44  ;;  %v4471_v45 = vsel %vm345_vm12, 1.0, %v8458_v1  ;;  %v4475_v46 = vsel %vm349_vm13, 1.0, %v8458_v1  ;;  %4826 = vmatprep.subr.msk.bf16.mxu0 %vm5906_vm0, %v8444_v24  ;;  %vm5917_vm1 = vmpackc.low %vm351_vm15, %vm347_vm14 }
  0x4c   : > { %8788 = vst [vmem:[#allocation24_spill] sm:$0xff] %v8787_v44  ;;  %v4473_v47 = vsel %vm347_vm14, 1.0, %v8458_v1  ;;  %v4477_v48 = vsel %vm351_vm15, 1.0, %v8458_v1  ;;  %v8790_v49 = vsel %vm5917_vm1, 4294967295, %v8789_v49  ;;  %v5924_v50 = vsub.f32 %v5879_v35, %v8433_v40  ;;  %4922 = vmatprep.subr.msk.bf16.mxu1 %vm5917_vm1, %v8444_v24 }
  0x4d   : > { %8791 = vst [vmem:[#allocation25_spill] sm:$0xff] %v8790_v49  ;;  %v5929_v51 = vsub.f32 %v5881_v36, %v8432_v41  ;;  %v5934_v52 = vsub.f32 %v5887_v38, %v8431_v42  ;;  %v5939_v53 = vsub.f32 %v5889_v39, %v8430_v43  ;;  %v5944_v54 = vsub.f32 %v4471_v45, %v4471_v45 }
  0x4e   : > { %v5946_v55 = vsub.f32 %v4475_v46, %v4475_v46  ;;  %v5948_v56 = vsub.f32 %v4473_v47, %v4473_v47  ;;  %v5950_v57 = vsub.f32 %v4477_v48, %v4477_v48  ;;  %vm344_vm2 = vcmp.eq.s32.totalorder %v5797_v9, %v5815_v15 }
  0x4f   : > { %vm348_vm3 = vcmp.eq.s32.totalorder %v5800_v10, %v5815_v15  ;;  %vm346_vm6 = vcmp.eq.s32.totalorder %v5797_v9, %v5818_v16  ;;  %vm350_vm7 = vcmp.eq.s32.totalorder %v5800_v10, %v5818_v16  ;;  %v4470_v62 = vsel %vm344_vm2, 1.0, %v8458_v1 }
  0x50   : > { %v4474_v63 = vsel %vm348_vm3, 1.0, %v8458_v1  ;;  %vm5966_vm8 = vmpackc.low %vm348_vm3, %vm344_vm2  ;;  %v4472_v19 = vsel %vm346_vm6, 1.0, %v8458_v1  ;;  %v4476_v20 = vsel %vm350_vm7, 1.0, %v8458_v1  ;;  %v5975_v22 = vsub.f32 %v4470_v62, %v4470_v62 }
  0x51   : > { %v8793_v8 = vsel %vm5966_vm8, 4294967295, %v8792_v8  ;;  %4828 = vmatpush1.bf16.msk.msra.mxu0 %vm5966_vm8, %v8444_v24  ;;  %v5977_v23 = vsub.f32 %v4474_v63, %v4474_v63  ;;  %vm5979_vm9 = vmpackc.low %vm350_vm7, %vm346_vm6  ;;  %v8795_v30 = vmov 0  ;;  %v5983_v31 = vsub.f32 %v4472_v19, %v4472_v19 }
  0x52   : > { %8794 = vst [vmem:[#allocation26_spill] sm:$0xff] %v8793_v8  ;;  %v8796_v30 = vsel %vm5979_vm9, 4294967295, %v8795_v30  ;;  %v5985_v33 = vsub.f32 %v4476_v20, %v4476_v20  ;;  %4924 = vmatpush1.bf16.msk.msra.mxu1 %vm5979_vm9, %v8444_v24  ;;  %vm353_vm12 = vcmp.eq.s32.totalorder %v5809_v13, %v5803_v11  ;;  %vm357_vm13 = vcmp.eq.s32.totalorder %v5812_v14, %v5803_v11 }
  0x53   : > { %8797 = vst [vmem:[#allocation27_spill] sm:$0xff] %v8796_v30  ;;  %vm355_vm14 = vcmp.eq.s32.totalorder %v5809_v13, %v5806_v12  ;;  %vm359_vm15 = vcmp.eq.s32.totalorder %v5812_v14, %v5806_v12  ;;  %vm6002_vm2 = vmpackc.low %vm357_vm13, %vm353_vm12  ;;  %v8798_v48 = vmov 0  ;;  %v4479_v62 = vsel %vm353_vm12, 1.0, %v8458_v1 }
  0x54   : > { %v8799_v48 = vsel %vm6002_vm2, 4294967295, %v8798_v48  ;;  %v4483_v63 = vsel %vm357_vm13, 1.0, %v8458_v1  ;;  %4830 = vmatprep.subr.msk.bf16.mxu0 %vm6002_vm2, %v8444_v24  ;;  %v4481_v19 = vsel %vm355_vm14, 1.0, %v8458_v1  ;;  %v4485_v20 = vsel %vm359_vm15, 1.0, %v8458_v1  ;;  %vm6013_vm3 = vmpackc.low %vm359_vm15, %vm355_vm14 }
  0x55   : > { %8800 = vst [vmem:[#allocation28_spill] sm:$0xff] %v8799_v48  ;;  %v8802_v0 = vsel %vm6013_vm3, 4294967295, %v8801_v0  ;;  %v6017_v43 = vsub.f32 %v4479_v62, %v4479_v62  ;;  %v6019_v42 = vsub.f32 %v4483_v63, %v4483_v63  ;;  %4926 = vmatprep.subr.msk.bf16.mxu1 %vm6013_vm3, %v8444_v24  ;;  %v6024_v41 = vsub.f32 %v4481_v19, %v4481_v19 }
  0x56   : > { %8803 = vst [vmem:[#allocation29_spill] sm:$0xff] %v8802_v0  ;;  %v6026_v40 = vsub.f32 %v4485_v20, %v4485_v20  ;;  %vm352_vm7 = vcmp.eq.s32.totalorder %v5809_v13, %v5815_v15  ;;  %vm356_vm12 = vcmp.eq.s32.totalorder %v5812_v14, %v5815_v15  ;;  %vm354_vm13 = vcmp.eq.s32.totalorder %v5809_v13, %v5818_v16 }
  0x57   : > { %vm358_vm14 = vcmp.eq.s32.totalorder %v5812_v14, %v5818_v16  ;;  %v4478_v62 = vsel %vm352_vm7, 1.0, %v8458_v1  ;;  %v4482_v63 = vsel %vm356_vm12, 1.0, %v8458_v1  ;;  %vm6038_vm15 = vmpackc.low %vm356_vm12, %vm352_vm7  ;;  %v8804_v19 = vmov 0 }
  0x58   : > { %v8805_v19 = vsel %vm6038_vm15, 4294967295, %v8804_v19  ;;  %v4480_v20 = vsel %vm354_vm13, 1.0, %v8458_v1  ;;  %v4484_v47 = vsel %vm358_vm14, 1.0, %v8458_v1  ;;  %4832 = vmatpush1.bf16.msk.msra.mxu0 %vm6038_vm15, %v8444_v24  ;;  %v6047_v46 = vsub.f32 %v4478_v62, %v4478_v62  ;;  %vm6051_vm6 = vmpackc.low %vm358_vm14, %vm354_vm13 }
  0x59   : > { %8806 = vst [vmem:[#allocation30_spill] sm:$0xff] %v8805_v19  ;;  %v6049_v45 = vsub.f32 %v4482_v63, %v4482_v63  ;;  %v8807_v34 = vmov 0  ;;  %v6055_v61 = vsub.f32 %v4480_v20, %v4480_v20  ;;  %v6057_v60 = vsub.f32 %v4484_v47, %v4484_v47  ;;  %4928 = vmatpush1.bf16.msk.msra.mxu1 %vm6051_vm6, %v8444_v24  ;;  %v709_v19 = vld [vmem:[%s8421_s0 + $0x8] sm:$0xff] }
  0x5a   : > { %v8808_v34 = vsel %vm6051_vm6, 4294967295, %v8807_v34  ;;  %vm361_vm7 = vcmp.eq.s32.totalorder %v5821_v17, %v5803_v11  ;;  %vm365_vm12 = vcmp.eq.s32.totalorder %v5824_v18, %v5803_v11  ;;  %vm363_vm13 = vcmp.eq.s32.totalorder %v5821_v17, %v5806_v12 }
  0x5b   : > { %8809 = vst [vmem:[#allocation31_spill] sm:$0xff] %v8808_v34  ;;  %vm367_vm14 = vcmp.eq.s32.totalorder %v5824_v18, %v5806_v12  ;;  %vm6074_vm6 = vmpackc.low %vm365_vm12, %vm361_vm7  ;;  %v4487_v11 = vsel %vm361_vm7, 1.0, %v8458_v1  ;;  %v4491_v58 = vsel %vm365_vm12, 1.0, %v8458_v1  ;;  %v4489_v12 = vsel %vm363_vm13, 1.0, %v8458_v1 }
  0x5c   : > { %v8811_v59 = vsel %vm6074_vm6, 4294967295, %v8810_v59  ;;  %4834 = vmatprep.subr.msk.bf16.mxu0 %vm6074_vm6, %v8444_v24  ;;  %v4493_v47 = vsel %vm367_vm14, 1.0, %v8458_v1  ;;  %vm6085_vm15 = vmpackc.low %vm367_vm14, %vm363_vm13  ;;  %v8813_v63 = vmov 0  ;;  %v6089_v20 = vsub.f32 %v4487_v11, %v4487_v11 }
  0x5d   : > { %8812 = vst [vmem:[#allocation32_spill] sm:$0xff] %v8811_v59  ;;  %v8814_v63 = vsel %vm6085_vm15, 4294967295, %v8813_v63  ;;  %v6091_v62 = vsub.f32 %v4491_v58, %v4491_v58  ;;  %4930 = vmatprep.subr.msk.bf16.mxu1 %vm6085_vm15, %v8444_v24  ;;  %v6096_v14 = vsub.f32 %v4489_v12, %v4489_v12  ;;  %v6098_v59 = vsub.f32 %v4493_v47, %v4493_v47  ;;  %v708_v58 = vld [vmem:[%s8421_s0] sm:$0xff] }
  0x5e   : > { %8815 = vst [vmem:[#allocation33_spill] sm:$0xff] %v8814_v63  ;;  %vm360_vm7 = vcmp.eq.s32.totalorder %v5821_v17, %v5815_v15  ;;  %vm364_vm12 = vcmp.eq.s32.totalorder %v5824_v18, %v5815_v15  ;;  %vm362_vm13 = vcmp.eq.s32.totalorder %v5821_v17, %v5818_v16  ;;  %vm366_vm14 = vcmp.eq.s32.totalorder %v5824_v18, %v5818_v16 }
  0x5f   : > { %v4486_v11 = vsel %vm360_vm7, 1.0, %v8458_v1  ;;  %v4490_v47 = vsel %vm364_vm12, 1.0, %v8458_v1  ;;  %vm6113_vm15 = vmpackc.low %vm364_vm12, %vm360_vm7  ;;  %v8816_v12 = vmov 0  ;;  %v4488_v15 = vsel %vm362_vm13, 1.0, %v8458_v1 }
  0x60   : > { %v8817_v12 = vsel %vm6113_vm15, 4294967295, %v8816_v12  ;;  %v4492_v24 = vsel %vm366_vm14, 1.0, %v8458_v1  ;;  %v8819_v17 = vmov 1.0|1.0   ;;  %v6122_v16 = vsub.f32 %v4486_v11, %v4486_v11  ;;  %vm6126_vm6 = vmpackc.low %vm366_vm14, %vm362_vm13 }
  0x61   : > { %8818 = vst [vmem:[#allocation34_spill] sm:$0xff] %v8817_v12  ;;  %4836 = vmatpush1.bf16.msk.msra.mxu0 %vm6113_vm15, %v8819_v17  ;;  %v6124_v18 = vsub.f32 %v4490_v47, %v4490_v47  ;;  %v8820_v63 = vmov 0  ;;  %v6130_v13 = vsub.f32 %v4488_v15, %v4488_v15  ;;  %v6132_v34 = vsub.f32 %v4492_v24, %v4492_v24 }
  0x62   : > { %v8821_v63 = vsel %vm6126_vm6, 4294967295, %v8820_v63  ;;  %4932 = vmatpush1.bf16.msk.msra.mxu1 %vm6126_vm6, %v8819_v17  ;;  %vm8823_vm7 = vcmask 523264   ;;  %v8478_v12 = vand.u32 4294901760, %v5845_v25  ;;  %v8481_v11 = vand.u32 4294901760, %v5847_v26 }
  0x63   : > { %8822 = vst [vmem:[#allocation35_spill] sm:$0xff] %v8821_v63  ;;  %v714_v1 = vsel %vm8823_vm7, %v708_v58, 0  ;;  %v8824_v30 = vand.u32 4294901760, %v5853_v28  ;;  %v8490_v24 = vand.u32 4294901760, %v5855_v29  ;;  %v8825_v0 = vand.u32 4294901760, %v5924_v50  ;;  %vm8829_vm12 = vmmov %vm8823_vm7 }
  0x64   : > { %v6148_v48 = vand.u32 4294901760, %v714_v1  ;;  %v853_v58 = vsub.f32 %v5845_v25, %v8478_v12  ;;  %v865_v47 = vsub.f32 %v5847_v26, %v8481_v11  ;;  %v8826_v63 = vand.u32 4294901760, %v5929_v51  ;;  %vm8838_vm13 = vmmov %vm8823_vm7 }
  0x65   : > { %v1647_v15 = vsub.f32 %v5853_v28, %v8824_v30  ;;  %v8827_v10 = vand.u32 4294901760, %v5934_v52  ;;  %v8828_v49 = vand.u32 4294901760, %v5939_v53  ;;  %v717_v9 = vsel %vm8829_vm12, %v709_v19, 0  ;;  %vm8845_vm14 = vmmov %vm8823_vm7 }
  0x66   : > { %v4839_v8 = vpack.c.bf16 %v8826_v63, %v8825_v0  ;;  %v6170_v11 = vsub.f32 %v714_v1, %v6148_v48  ;;  %v854_v44 = vand.u32 4294901760, %v853_v58  ;;  %v866_v37 = vand.u32 4294901760, %v865_v47 }
  0x67   : > { %v4935_v12 = vpack.c.bf16 %v8828_v49, %v8827_v10  ;;  %v1648_v30 = vand.u32 4294901760, %v1647_v15  ;;  %v1659_v50 = vsub.f32 %v5855_v29, %v8490_v24  ;;  %v6175_v32 = vand.u32 4294901760, %v717_v9 }
  0x68   : > { %8830 = vst [vmem:[#allocation36_spill] sm:$0xff] %v6170_v11  ;;  %v8488_v0 = vand.u32 4294901760, %v5944_v54  ;;  %v8489_v51 = vand.u32 4294901760, %v5946_v55  ;;  %v6180_v10 = vand.u32 4294901760, %v6170_v11  ;;  %v4837_v49 = vpack.c.bf16 %v866_v37, %v854_v44 }
  0x69   : > { %v8493_v1 = vand.u32 4294901760, %v5948_v56  ;;  %v8498_v52 = vand.u32 4294901760, %v5950_v57  ;;  %v1660_v53 = vand.u32 4294901760, %v1659_v50  ;;  %v6185_v19 = vsub.f32 %v717_v9, %v6175_v32 }
  0x6a   : > { %8831 = vst [vmem:[#allocation37_spill] sm:$0xff] %v6180_v10  ;;  %v877_v63 = vsub.f32 %v5944_v54, %v8488_v0  ;;  %v889_v47 = vsub.f32 %v5946_v55, %v8489_v51  ;;  %v809_v15 = vsub.f32 %v6170_v11, %v6180_v10  ;;  %4838 = vmatprep.subr.bf16.mxu0 %v4837_v49  ;;  %v8833_v44 = vand.u32 4294901760, %v5975_v22  ;;  %v710_v49 = vld [vmem:[%s8421_s0 + $0x10] sm:$0xff] }
  0x6b   : > { %8832 = vst [vmem:[#allocation38_spill] sm:$0xff] %v6185_v19  ;;  %v1671_v37 = vsub.f32 %v5948_v56, %v8493_v1  ;;  %v1683_v9 = vsub.f32 %v5950_v57, %v8498_v52  ;;  %v4933_v50 = vpack.c.bf16 %v1660_v53, %v1648_v30  ;;  %v6205_v0 = vand.u32 4294901760, %v6185_v19 }
  0x6c   : > { %v883_v58 = vsub.f32 %v5975_v22, %v8833_v44  ;;  %v878_v51 = vand.u32 4294901760, %v877_v63  ;;  %v890_v24 = vand.u32 4294901760, %v889_v47  ;;  %v810_v10 = vand.u32 4294901760, %v809_v15 }
  0x6d   : > { %8834 = vst [vmem:[#allocation39_spill] sm:$0xff] %v6205_v0  ;;  %v1672_v1 = vand.u32 4294901760, %v1671_v37  ;;  %v1684_v27 = vand.u32 4294901760, %v1683_v9  ;;  %4934 = vmatprep.subr.bf16.mxu1 %v4933_v50  ;;  %v820_v52 = vsub.f32 %v6185_v19, %v6205_v0  ;;  %v8835_v30 = vand.u32 4294901760, %v5977_v23 }
  0x6e   : > { %v884_v11 = vand.u32 4294901760, %v883_v58  ;;  %v4841_v21 = vpack.c.bf16 %v890_v24, %v878_v51  ;;  %v8836_v63 = vand.u32 4294901760, %v5983_v31  ;;  %811 = vmatmul.mubr.f32.vlgmr.msra.gmra.mrb[0].mxu0 %v810_v10  ;;  %1605 = vmatmul.mubr.f32.vlgmr.msra.gmra.mrb[0].mxu1 %v810_v10  ;;  %v8837_v15 = vand.u32 4294901760, %v5985_v33 }
  0x6f   : > { %v895_v53 = vsub.f32 %v5977_v23, %v8835_v30  ;;  %v4937_v44 = vpack.c.bf16 %v1684_v27, %v1672_v1  ;;  %v720_v9 = vsel %vm8838_vm13, %v710_v49, 0  ;;  %v8506_v58 = vand.u32 4294901760, %v6017_v43  ;;  %4840 = vmatpush1.bf16.msra.mxu0 %v4839_v8  ;;  %4936 = vmatpush1.bf16.msra.mxu1 %v4935_v12 }
  0x70   : > { %v1677_v47 = vsub.f32 %v5983_v31, %v8836_v63  ;;  %v1689_v37 = vsub.f32 %v5985_v33, %v8837_v15  ;;  %v821_v24 = vand.u32 4294901760, %v820_v52  ;;  %v6223_v30 = vand.u32 4294901760, %v720_v9  ;;  %4842 = vmatprep.subr.bf16.mxu0 %v4841_v21 }
  0x71   : > { %v896_v51 = vand.u32 4294901760, %v895_v53  ;;  %v8840_v0 = vmov 0.0   ;;  %v901_v10 = vsub.f32 %v6017_v43, %v8506_v58  ;;  %v8504_v1 = vand.u32 4294901760, %v6019_v42  ;;  %4938 = vmatprep.subr.bf16.mxu1 %v4937_v44 }
  0x72   : > { %v1678_v50 = vand.u32 4294901760, %v1677_v47  ;;  %8839 = vst [vmem:[#allocation40_spill] sm:$0xff] %v6223_v30  ;;  %816 = vmatprep.mubr.f32.mxu0 %v8840_v0  ;;  %1610 = vmatprep.mubr.f32.mxu1 %v8840_v0  ;;  %v1690_v27 = vand.u32 4294901760, %v1689_v37  ;;  %v8503_v49 = vand.u32 4294901760, %v6024_v41  ;;  %v6233_v12 = vsub.f32 %v720_v9, %v6223_v30 }
  0x73   : > { %v4843_v8 = vpack.c.bf16 %v896_v51, %v884_v11  ;;  %v8505_v52 = vand.u32 4294901760, %v6026_v40  ;;  %v8841_v53 = vand.u32 4294901760, %v6047_v46  ;;  %822 = vmatmul.mubr.f32.gmra.mrb[2].mxu0 %v821_v24  ;;  %1616 = vmatmul.mubr.f32.gmra.mrb[2].mxu1 %v821_v24  ;;  %v902_v15 = vand.u32 4294901760, %v901_v10  ;;  %v711_v11 = vld [vmem:[%s8421_s0 + $0x18] sm:$0xff] }
  0x74   : > { %v4939_v47 = vpack.c.bf16 %v1690_v27, %v1678_v50  ;;  %v913_v37 = vsub.f32 %v6019_v42, %v8504_v1  ;;  %v1695_v21 = vsub.f32 %v6024_v41, %v8503_v49  ;;  %827 = vmatprep.mubr.f32.mxu0 %v8840_v0  ;;  %v6250_v44 = vand.u32 4294901760, %v6233_v12  ;;  %1621 = vmatprep.mubr.f32.mxu1 %v8840_v0 }
  0x75   : > { %v907_v63 = vsub.f32 %v6047_v46, %v8841_v53  ;;  %4844 = vmatpush1.bf16.msra.mxu0 %v4843_v8  ;;  %v1707_v9 = vsub.f32 %v6026_v40, %v8505_v52  ;;  %v8842_v51 = vand.u32 4294901760, %v6049_v45  ;;  %v8843_v8 = vand.u32 4294901760, %v6055_v61 }
  0x76   : > { %4940 = vmatpush1.bf16.msra.mxu1 %v4939_v47  ;;  %v914_v27 = vand.u32 4294901760, %v913_v37  ;;  %v1696_v10 = vand.u32 4294901760, %v1695_v21  ;;  %v8844_v49 = vand.u32 4294901760, %v6057_v60  ;;  %vm8523_vm7 = vcmask 785408  }
  0x77   : > { %v908_v24 = vand.u32 4294901760, %v907_v63  ;;  %v919_v50 = vsub.f32 %v6049_v45, %v8842_v51  ;;  %v1701_v53 = vsub.f32 %v6055_v61, %v8843_v8  ;;  %v831_v63 = vsub.f32 %v6233_v12, %v6250_v44 }
  0x78   : > { %v1713_v1 = vsub.f32 %v6057_v60, %v8844_v49  ;;  %v1708_v52 = vand.u32 4294901760, %v1707_v9  ;;  %v723_v51 = vsel %vm8845_vm14, %v711_v11, 0  ;;  %v4845_v47 = vpack.c.bf16 %v914_v27, %v902_v15 }
  0x79   : > { %v920_v58 = vand.u32 4294901760, %v919_v50  ;;  %v1702_v19 = vand.u32 4294901760, %v1701_v53  ;;  %v6268_v37 = vand.u32 4294901760, %v723_v51  ;;  %v832_v21 = vand.u32 4294901760, %v831_v63 }
  0x7a   : > { %v1714_v17 = vand.u32 4294901760, %v1713_v1  ;;  %v4941_v7 = vpack.c.bf16 %v1708_v52, %v1696_v10  ;;  %v8518_v8 = vand.u32 4294901760, %v6089_v20  ;;  %4846 = vmatprep.subr.bf16.mxu0 %v4845_v47  ;;  %v8517_v9 = vand.u32 4294901760, %v6091_v62 }
  0x7b   : > { %8846 = vst [vmem:[#allocation41_spill] sm:$0xff] %v6268_v37  ;;  %v4847_v30 = vpack.c.bf16 %v920_v58, %v908_v24  ;;  %v6272_v49 = vsub.f32 %v723_v51, %v6268_v37  ;;  %v8516_v50 = vand.u32 4294901760, %v6096_v14  ;;  %833 = vmatmul.mubr.f32.gmra.mrb[4].mxu0 %v832_v21  ;;  %1627 = vmatmul.mubr.f32.gmra.mrb[4].mxu1 %v832_v21  ;;  %v8519_v52 = vand.u32 4294901760, %v6098_v59 }
  0x7c   : > { %v4943_v2 = vpack.c.bf16 %v1714_v17, %v1702_v19  ;;  %v925_v1 = vsub.f32 %v6089_v20, %v8518_v8  ;;  %v8847_v58 = vand.u32 4294901760, %v6122_v16  ;;  %v8848_v17 = vand.u32 4294901760, %v6124_v18  ;;  %4942 = vmatprep.subr.bf16.mxu1 %v4941_v7  ;;  %838 = vmatprep.mubr.f32.mxu0 %v8840_v0 }
  0x7d   : > { %4848 = vmatpush1.bf16.msra.mxu0 %v4847_v30  ;;  %v6287_v11 = vand.u32 4294901760, %v6272_v49  ;;  %v937_v24 = vsub.f32 %v6091_v62, %v8517_v9  ;;  %v1719_v27 = vsub.f32 %v6096_v14, %v8516_v50  ;;  %v8849_v10 = vand.u32 4294901760, %v6130_v13  ;;  %1632 = vmatprep.mubr.f32.mxu1 %v8840_v0 }
  0x7e   : > { %v931_v15 = vsub.f32 %v6122_v16, %v8847_v58  ;;  %v943_v19 = vsub.f32 %v6124_v18, %v8848_v17  ;;  %4944 = vmatpush1.bf16.msra.mxu1 %v4943_v2  ;;  %v926_v7 = vand.u32 4294901760, %v925_v1  ;;  %v1731_v30 = vsub.f32 %v6098_v59, %v8519_v52 }
  0x7f   : > { %v1725_v53 = vsub.f32 %v6130_v13, %v8849_v10  ;;  %v842_v47 = vsub.f32 %v6272_v49, %v6287_v11  ;;  %v938_v21 = vand.u32 4294901760, %v937_v24  ;;  %v1720_v58 = vand.u32 4294901760, %v1719_v27 }
  0x80   : > { %v932_v63 = vand.u32 4294901760, %v931_v15  ;;  %v944_v51 = vand.u32 4294901760, %v943_v19  ;;  %v1732_v17 = vand.u32 4294901760, %v1731_v30  ;;  %v8850_v2 = vand.u32 4294901760, %v6132_v34 }
  0x81   : > { %v1726_v50 = vand.u32 4294901760, %v1725_v53  ;;  %v843_v1 = vand.u32 4294901760, %v842_v47  ;;  %v4849_v9 = vpack.c.bf16 %v938_v21, %v926_v7  ;;  %v4853_v19 = vpack.c.bf16 %v5847_v26, %v5845_v25  ;;  %v309_v7 = vld [vmem:[%s304_s20] sm:$0xf] }
  0x82   : > { %v1737_v10 = vsub.f32 %v6132_v34, %v8850_v2  ;;  %v4851_v8 = vpack.c.bf16 %v944_v51, %v932_v63  ;;  %v4945_v52 = vpack.c.bf16 %v1732_v17, %v1720_v58  ;;  %v4949_v24 = vpack.c.bf16 %v5855_v29, %v5853_v28 }
  0x83   : > { %844 = vmatmul.mubr.f32.gmra.mrb[6].mxu0 %v843_v1  ;;  %4850 = vmatprep.subr.bf16.mxu0 %v4849_v9  ;;  %v4855_v53 = vpack.c.bf16 %v5881_v36, %v5879_v35  ;;  %v4951_v9 = vpack.c.bf16 %v5889_v39, %v5887_v38  ;;  %v4955_v30 = vpack.c.bf16 %v5985_v33, %v5983_v31 }
  0x84   : > { %v1738_v15 = vand.u32 4294901760, %v1737_v10  ;;  %1638 = vmatmul.mubr.f32.gmra.mrb[6].mxu1 %v843_v1  ;;  %4946 = vmatprep.subr.bf16.mxu1 %v4945_v52  ;;  %v4859_v52 = vpack.c.bf16 %v5977_v23, %v5975_v22  ;;  %v4861_v63 = vpack.c.bf16 %v6019_v42, %v6017_v43  ;;  %v4957_v51 = vpack.c.bf16 %v6026_v40, %v6024_v41  ;;  %v2313_v1 = vld [vmem:[%s8422_s1] sm:$0xff] }
  0x85   : > { %4852 = vmatpush1.bf16.msra.mxu0 %v4851_v8  ;;  %994 = vmatprep.mubr.f32.mxu0 %v8840_v0  ;;  %v4857_v8 = vpack.c.bf16 %v5946_v55, %v5944_v54  ;;  %v6340_v47 = vrot.slane %v309_v7, %v5778_v3  ;;  %v6343_v21 = vrot.slane %v309_v7, %v5781_v4 }
  0x86   : > { %v4947_v27 = vpack.c.bf16 %v1738_v15, %v1726_v50  ;;  %1788 = vmatprep.mubr.f32.mxu1 %v8840_v0  ;;  %4854 = vmatprep.subr.bf16.mxu0 %v4853_v19  ;;  %v4953_v50 = vpack.c.bf16 %v5950_v57, %v5948_v56  ;;  %v4863_v58 = vpack.c.bf16 %v6049_v45, %v6047_v46 }
  0x87   : > { %v6349_v17 = vrot.slane %v309_v7, %v5788_v5  ;;  %v6352_v2 = vrot.slane %v309_v7, %v5791_v6  ;;  %v4959_v10 = vpack.c.bf16 %v6057_v60, %v6055_v61  ;;  %v4865_v15 = vpack.c.bf16 %v6091_v62, %v6089_v20 }
  0x88   : > { %4948 = vmatpush1.bf16.msra.mxu1 %v4947_v27  ;;  %996 = vmatmul.mubr.f32.vlgmr.msra.gmra.mrb[0].mxu0 %v6148_v48  ;;  %v4961_v19 = vpack.c.bf16 %v6098_v59, %v6096_v14  ;;  %v8851_v27 = vld [vmem:[#allocation8_spill] sm:$0xff] }
  0x89   : > { %4950 = vmatprep.subr.bf16.mxu1 %v4949_v24  ;;  %4856 = vmatpush1.bf16.msra.mxu0 %v4855_v53  ;;  %v4867_v24 = vpack.c.bf16 %v6124_v18, %v6122_v16  ;;  %v6368_v53 = vadd.s32 64, %v8851_v27  ;;  %v6386_v6 = vadd.s32 72, %v8851_v27  ;;  %vm8525_vm12 = vcmp.eq.s32.totalorder %v8851_v27, %v6340_v47 }
  0x8a   : > { %1001 = vmatprep.mubr.f32.mxu0 %v8840_v0  ;;  %4858 = vmatprep.subr.bf16.mxu0 %v4857_v8  ;;  %v4963_v8 = vpack.c.bf16 %v6132_v34, %v6130_v13  ;;  %vm8531_vm14 = vcmp.eq.s32.totalorder %v8851_v27, %v6343_v21 }
  0x8b   : > { %1790 = vmatmul.mubr.f32.vlgmr.msra.gmra.mrb[0].mxu1 %v6148_v48 }
  0x8c   : > { %4952 = vmatpush1.bf16.msra.mxu1 %v4951_v9  ;;  %1795 = vmatprep.mubr.f32.mxu1 %v8840_v0  ;;  %v8852_v9 = vld [vmem:[#allocation40_spill] sm:$0xff] }
  0x8d   : > { %1003 = vmatmul.mubr.f32.gmra.mrb[2].mxu0 %v6175_v32  ;;  %4954 = vmatprep.subr.bf16.mxu1 %v4953_v50  ;;  %v8853_v50 = vand.u32 4294901760, %v5845_v25  ;;  %v8858_v25 = vand.u32 4294901760, %v5881_v36  ;;  %v8864_v36 = vand.u32 4294901760, %v5950_v57  ;;  %v8869_v57 = vand.u32 4294901760, %v6017_v43 }
  0x8e   : > { %4860 = vmatpush1.bf16.msra.mxu0 %v4859_v52  ;;  %1008 = vmatprep.mubr.f32.mxu0 %v8840_v0  ;;  %v8854_v52 = vand.u32 4294901760, %v5847_v26  ;;  %v8859_v26 = vand.u32 4294901760, %v5887_v38 }
  0x8f   : > { %1797 = vmatmul.mubr.f32.gmra.mrb[2].mxu1 %v6175_v32  ;;  %4862 = vmatprep.subr.bf16.mxu0 %v4861_v63  ;;  %v8856_v63 = vand.u32 4294901760, %v5855_v29  ;;  %v8861_v29 = vand.u32 4294901760, %v5944_v54  ;;  %v8866_v54 = vand.u32 4294901760, %v5977_v23 }
  0x90   : > { %4956 = vmatpush1.bf16.msra.mxu1 %v4955_v30  ;;  %1802 = vmatprep.mubr.f32.mxu1 %v8840_v0  ;;  %v6377_v7 = vpack.c.bf16 %v8854_v52, %v8853_v50  ;;  %v8855_v30 = vand.u32 4294901760, %v5853_v28  ;;  %v8860_v28 = vand.u32 4294901760, %v5889_v39  ;;  %v8862_v52 = vand.u32 4294901760, %v5946_v55 }
  0x91   : > { %1010 = vmatmul.mubr.f32.gmra.mrb[4].mxu0 %v8852_v9  ;;  %4958 = vmatprep.subr.bf16.mxu1 %v4957_v51  ;;  %v8857_v51 = vand.u32 4294901760, %v5879_v35  ;;  %v8863_v35 = vand.u32 4294901760, %v5948_v56  ;;  %v8865_v39 = vand.u32 4294901760, %v5975_v22  ;;  %v8867_v55 = vand.u32 4294901760, %v5983_v31  ;;  %v2314_v56 = vld [vmem:[%s8422_s1 + $0x8] sm:$0xff] }
  0x92   : > { %v6383_v4 = vpack.c.bf16 %v8856_v63, %v8855_v30  ;;  %4864 = vmatpush1.bf16.msra.mxu0 %v4863_v58  ;;  %v6399_v50 = vpack.c.bf16 %v8860_v28, %v8859_v26  ;;  %v6405_v30 = vpack.c.bf16 %v8862_v52, %v8861_v29  ;;  %v6408_v58 = vsel %vm8523_vm7, %v2313_v1, 0  ;;  %1015 = vmatprep.mubr.f32.mxu0 %v8840_v0 }
  0x93   : > { %1804 = vmatmul.mubr.f32.gmra.mrb[4].mxu1 %v8852_v9  ;;  %v6393_v3 = vpack.c.bf16 %v8858_v25, %v8857_v51  ;;  %v6415_v38 = vpack.c.bf16 %v8864_v36, %v8863_v35  ;;  %v6421_v63 = vpack.c.bf16 %v8866_v54, %v8865_v39  ;;  %v8868_v1 = vand.u32 4294901760, %v5985_v33  ;;  %4866 = vmatprep.subr.bf16.mxu0 %v4865_v15  ;;  %v2315_v54 = vld [vmem:[%s8422_s1 + $0x10] sm:$0xff] }
  0x94   : > { %4960 = vmatpush1.bf16.msra.mxu1 %v4959_v10  ;;  %v6430_v10 = vadd.s32 80, %v8851_v27  ;;  %1809 = vmatprep.mubr.f32.mxu1 %v8840_v0  ;;  %v8870_v22 = vand.u32 4294901760, %v6019_v42  ;;  %v8871_v31 = vand.u32 4294901760, %v6024_v41  ;;  %v8872_v33 = vand.u32 4294901760, %v6026_v40 }
  0x95   : > { %v6427_v51 = vpack.c.bf16 %v8868_v1, %v8867_v55  ;;  %v8873_v26 = vand.u32 4294901760, %v6047_v46  ;;  %v8874_v28 = vand.u32 4294901760, %v6049_v45  ;;  %v6455_v15 = vadd.s32 88, %v8851_v27  ;;  %1017 = vmatmul.mubr.f32.gmra.mrb[6].mxu0 %v6268_v37  ;;  %4962 = vmatprep.subr.bf16.mxu1 %v4961_v19  ;;  %v8888_v55 = vld [vmem:[#allocation36_spill] sm:$0xff] }
  0x96   : > { %v6440_v23 = vpack.c.bf16 %v8870_v22, %v8869_v57  ;;  %v6446_v25 = vpack.c.bf16 %v8872_v33, %v8871_v31  ;;  %v8875_v42 = vand.u32 4294901760, %v6055_v61  ;;  %v8876_v41 = vand.u32 4294901760, %v6057_v60  ;;  %4868 = vmatpush1.bf16.msra.mxu0 %v4867_v24  ;;  %1119 = vmatprep.mubr.f32.mxu0 %v8840_v0 }
  0x97   : > { %v6452_v29 = vpack.c.bf16 %v8874_v28, %v8873_v26  ;;  %v8877_v40 = vand.u32 4294901760, %v6089_v20  ;;  %v8878_v46 = vand.u32 4294901760, %v6091_v62  ;;  %v8879_v45 = vand.u32 4294901760, %v6096_v14  ;;  %1811 = vmatmul.mubr.f32.gmra.mrb[6].mxu1 %v6268_v37  ;;  %v8884_v14 = vld [vmem:[#allocation13_spill] sm:$0xff] }
  0x98   : > { %v6462_v43 = vpack.c.bf16 %v8876_v41, %v8875_v42  ;;  %v8880_v35 = vand.u32 4294901760, %v6098_v59  ;;  %v6477_v19 = vand.u32 4294901760, %v6408_v58  ;;  %v8882_v60 = vand.u32 4294901760, %v6122_v16  ;;  %4964 = vmatpush1.bf16.msra.mxu1 %v4963_v8  ;;  %1913 = vmatprep.mubr.f32.mxu1 %v8840_v0 }
  0x99   : > { %v6468_v52 = vpack.c.bf16 %v8878_v46, %v8877_v40  ;;  %v8883_v61 = vand.u32 4294901760, %v6124_v18  ;;  %vm8524_vm13 = vcmp.eq.s32.totalorder %v8884_v14, %v6340_v47  ;;  %v6491_v59 = vsel %vm8523_vm7, %v2314_v56, 0  ;;  %1122 = vmatmul.mubr.f32.vlgmr.msra.gmra.mrb[0].mxu0 %v8888_v55 }
  0x9a   : > { %v6474_v36 = vpack.c.bf16 %v8880_v35, %v8879_v45  ;;  %8881 = vst [vmem:[#allocation42_spill] sm:$0xff] %v6477_v19  ;;  %8885 = vst [vmem:[#allocation43_spill] sm:$0xff] %v6491_v59  ;;  %v4495_v62 = vsel %vm8525_vm12, 1.0, %v8840_v0  ;;  %v4499_v18 = vsel %vm8524_vm13, 1.0, %v8840_v0  ;;  %vm8526_vm7 = vcmp.eq.s32.totalorder %v8884_v14, %v6343_v21  ;;  %1127 = vmatprep.mubr.f32.mxu0 %v8840_v0 }
  0x9b   : > { %v6484_v20 = vpack.c.bf16 %v8883_v61, %v8882_v60  ;;  %v8886_v16 = vmov 1.0|1.0   ;;  %v4497_v8 = vsel %vm8531_vm14, 1.0, %v8840_v0  ;;  %v4501_v39 = vsel %vm8526_vm7, 1.0, %v8840_v0  ;;  %1916 = vmatmul.mubr.f32.vlgmr.msra.gmra.mrb[0].mxu1 %v8888_v55  ;;  %v8908_v55 = vld [vmem:[#allocation15_spill] sm:$0xff] }
  0x9c   : > { %4870 = vmatprep.subr.msk.bf16.mxu0 %vm5836_vm4, %v8886_v16  ;;  %vm8528_vm13 = vcmp.eq.s32.totalorder %v8851_v27, %v6349_v17  ;;  %vm8527_vm12 = vcmp.eq.s32.totalorder %v8884_v14, %v6349_v17  ;;  %4966 = vmatprep.subr.msk.bf16.mxu1 %vm5849_vm5, %v8886_v16  ;;  %v8890_v56 = vand.u32 4294901760, %v6130_v13  ;;  %v8891_v57 = vand.u32 4294901760, %v6132_v34 }
  0x9d   : > { %v4494_v31 = vsel %vm8528_vm13, 1.0, %v8840_v0  ;;  %v4498_v33 = vsel %vm8527_vm12, 1.0, %v8840_v0  ;;  %vm8529_vm7 = vcmp.eq.s32.totalorder %v8851_v27, %v6352_v2  ;;  %4872 = vmatpush1.bf16.msk.msra.mxu0 %vm5870_vm10, %v8886_v16  ;;  %v6549_v34 = vsub.f32 %v4495_v62, %v4495_v62  ;;  %4968 = vmatpush1.bf16.msk.msra.mxu1 %vm5883_vm11, %v8886_v16 }
  0x9e   : > { %v6533_v22 = vpack.c.bf16 %v8891_v57, %v8890_v56  ;;  %v6551_v26 = vsub.f32 %v4499_v18, %v4499_v18  ;;  %v4496_v28 = vsel %vm8529_vm7, 1.0, %v8840_v0  ;;  %v6558_v42 = vand.u32 4294901760, %v6491_v59  ;;  %1921 = vmatprep.mubr.f32.mxu1 %v8840_v0  ;;  %4874 = vmatprep.subr.msk.bf16.mxu0 %vm5906_vm0, %v8886_v16  ;;  %v8904_v18 = vld [vmem:[#allocation14_spill] sm:$0xff]  ;;  %v8921_v57 = vld [vmem:[#allocation31_spill] sm:$0xff] }
  0x9f   : > { %8893 = vst [vmem:[#allocation20_spill] sm:$0xff] %v6549_v34  ;;  %v6564_v40 = vsub.f32 %v4497_v8, %v4497_v8  ;;  %v6566_v46 = vsub.f32 %v4501_v39, %v4501_v39  ;;  %vm8530_vm12 = vcmp.eq.s32.totalorder %v8884_v14, %v6352_v2  ;;  %vm8899_vm13 = vcmask 785408   ;;  %v8905_v8 = vld [vmem:[#allocation38_spill] sm:$0xff]  ;;  %4970 = vmatprep.subr.msk.bf16.mxu1 %vm5917_vm1, %v8886_v16 }
  0xa0   : > { %8894 = vst [vmem:[#allocation36_spill] sm:$0xff] %v6551_v26  ;;  %8895 = vst [vmem:[#allocation21_spill] sm:$0xff] %v6558_v42  ;;  %v6571_v45 = vsel %vm8899_vm13, %v2315_v54, 0  ;;  %v6577_v60 = vsub.f32 %v4494_v31, %v4494_v31  ;;  %v6579_v61 = vsub.f32 %v4498_v33, %v4498_v33  ;;  %v4500_v62 = vsel %vm8530_vm12, 1.0, %v8840_v0  ;;  %1130 = vmatmul.mubr.f32.gmra.mrb[2].mxu0 %v8905_v8 }
  0xa1   : > { %8897 = vst [vmem:[#allocation22_spill] sm:$0xff] %v6564_v40  ;;  %8898 = vst [vmem:[#allocation23_spill] sm:$0xff] %v6566_v46  ;;  %vm8532_vm7 = vcmp.eq.s32.totalorder %v8904_v18, %v6340_v47  ;;  %v6591_v54 = vsub.f32 %v4496_v28, %v4496_v28  ;;  %vm8533_vm13 = vcmp.eq.s32.totalorder %v8908_v55, %v6340_v47  ;;  %1924 = vmatmul.mubr.f32.gmra.mrb[2].mxu1 %v8905_v8 }
  0xa2   : > { %8900 = vst [vmem:[#allocation44_spill] sm:$0xff] %v6571_v45  ;;  %8902 = vst [vmem:[#allocation24_spill] sm:$0xff] %v6577_v60  ;;  %v4503_v56 = vsel %vm8532_vm7, 1.0, %v8840_v0  ;;  %vm8535_vm12 = vcmp.eq.s32.totalorder %v8904_v18, %v6343_v21  ;;  %4876 = vmatpush1.bf16.msk.msra.mxu0 %vm5966_vm8, %v8886_v16  ;;  %v4507_v31 = vsel %vm8533_vm13, 1.0, %v8840_v0  ;;  %vm8539_vm14 = vcmp.eq.s32.totalorder %v8908_v55, %v6343_v21 }
  0xa3   : > { %8903 = vst [vmem:[#allocation45_spill] sm:$0xff] %v6579_v61  ;;  %8907 = vst [vmem:[#allocation38_spill] sm:$0xff] %v6591_v54  ;;  %v4505_v33 = vsel %vm8535_vm12, 1.0, %v8840_v0  ;;  %vm8550_vm7 = vcmp.eq.s32.totalorder %v8904_v18, %v6349_v17  ;;  %4972 = vmatpush1.bf16.msk.msra.mxu1 %vm5979_vm9, %v8886_v16  ;;  %1135 = vmatprep.mubr.f32.mxu0 %v8840_v0  ;;  %v4509_v8 = vsel %vm8539_vm14, 1.0, %v8840_v0  ;;  %v8953_v13 = vand.u32 4294901760, %v6549_v34 }
  0xa4   : > { %vm8547_vm13 = vcmp.eq.s32.totalorder %v8908_v55, %v6349_v17  ;;  %v4502_v5 = vsel %vm8550_vm7, 1.0, %v8840_v0  ;;  %vm8546_vm12 = vcmp.eq.s32.totalorder %v8904_v18, %v6352_v2  ;;  %1929 = vmatprep.mubr.f32.mxu1 %v8840_v0  ;;  %4878 = vmatprep.subr.msk.bf16.mxu0 %vm6002_vm2, %v8886_v16  ;;  %v6637_v59 = vsub.f32 %v4500_v62, %v4500_v62  ;;  %v8916_v18 = vld [vmem:[#allocation30_spill] sm:$0xff] }
  0xa5   : > { %v4506_v42 = vsel %vm8547_vm13, 1.0, %v8840_v0  ;;  %vm8549_vm14 = vcmp.eq.s32.totalorder %v8908_v55, %v6352_v2  ;;  %v4504_v37 = vsel %vm8546_vm12, 1.0, %v8840_v0  ;;  %1138 = vmatmul.mubr.f32.gmra.mrb[4].mxu0 %v6233_v12  ;;  %4974 = vmatprep.subr.msk.bf16.mxu1 %vm6013_vm3, %v8886_v16  ;;  %v6653_v62 = vsub.f32 %v4503_v56, %v4503_v56  ;;  %v8925_v55 = vld [vmem:[#allocation16_spill] sm:$0xff] }
  0xa6   : > { %8912 = vst [vmem:[#allocation25_spill] sm:$0xff] %v6637_v59  ;;  %v6655_v27 = vsub.f32 %v4507_v31, %v4507_v31  ;;  %v4508_v9 = vsel %vm8549_vm14, 1.0, %v8840_v0  ;;  %1932 = vmatmul.mubr.f32.gmra.mrb[4].mxu1 %v6233_v12  ;;  %vm8917_vm12 = vnez %v8916_v18  ;;  %v6666_v28 = vsub.f32 %v4505_v33, %v4505_v33  ;;  %1143 = vmatprep.mubr.f32.mxu0 %v8840_v0  ;;  %v8929_v31 = vld [vmem:[#allocation17_spill] sm:$0xff] }
  0xa7   : > { %8914 = vst [vmem:[#allocation46_spill] sm:$0xff] %v6653_v62  ;;  %4880 = vmatpush1.bf16.msk.msra.mxu0 %vm8917_vm12, %v8886_v16  ;;  %v6668_v14 = vsub.f32 %v4509_v8, %v4509_v8  ;;  %v6670_v56 = vsub.f32 %v4502_v5, %v4502_v5  ;;  %vm8922_vm13 = vnez %v8921_v57  ;;  %v6677_v45 = vsub.f32 %v4506_v42, %v4506_v42  ;;  %v8926_v5 = vld [vmem:[#allocation32_spill] sm:$0xff]  ;;  %v8930_v42 = vld [vmem:[#allocation33_spill] sm:$0xff] }
  0xa8   : > { %8915 = vst [vmem:[#allocation47_spill] sm:$0xff] %v6655_v27  ;;  %8918 = vst [vmem:[#allocation48_spill] sm:$0xff] %v6666_v28  ;;  %4976 = vmatpush1.bf16.msk.msra.mxu1 %vm8922_vm13, %v8886_v16  ;;  %v6679_v12 = vsub.f32 %v4504_v37, %v4504_v37  ;;  %vm8552_vm14 = vcmp.eq.s32.totalorder %v8925_v55, %v6340_v47  ;;  %1937 = vmatprep.mubr.f32.mxu1 %v8840_v0  ;;  %vm8927_vm7 = vnez %v8926_v5 }
  0xa9   : > { %8919 = vst [vmem:[#allocation49_spill] sm:$0xff] %v6668_v14  ;;  %8920 = vst [vmem:[#allocation50_spill] sm:$0xff] %v6670_v56  ;;  %4882 = vmatprep.subr.msk.bf16.mxu0 %vm8927_vm7, %v8886_v16  ;;  %v6688_v8 = vsub.f32 %v4508_v9, %v4508_v9  ;;  %vm8554_vm13 = vcmp.eq.s32.totalorder %v8929_v31, %v6340_v47  ;;  %v4511_v37 = vsel %vm8552_vm14, 1.0, %v8840_v0  ;;  %1146 = vmatmul.mubr.f32.gmra.mrb[6].mxu0 %v6272_v49  ;;  %v8936_v56 = vld [vmem:[#allocation18_spill] sm:$0xff] }
  0xaa   : > { %8923 = vst [vmem:[#allocation51_spill] sm:$0xff] %v6677_v45  ;;  %8924 = vst [vmem:[#allocation52_spill] sm:$0xff] %v6679_v12  ;;  %vm8556_vm12 = vcmp.eq.s32.totalorder %v8925_v55, %v6343_v21  ;;  %vm8931_vm3 = vnez %v8930_v42  ;;  %v4515_v9 = vsel %vm8554_vm13, 1.0, %v8840_v0  ;;  %vm8557_vm7 = vcmp.eq.s32.totalorder %v8929_v31, %v6343_v21  ;;  %1940 = vmatmul.mubr.f32.gmra.mrb[6].mxu1 %v6272_v49 }
  0xab   : > { %8928 = vst [vmem:[#allocation53_spill] sm:$0xff] %v6688_v8  ;;  %4978 = vmatprep.subr.msk.bf16.mxu1 %vm8931_vm3, %v8886_v16  ;;  %v4513_v33 = vsel %vm8556_vm12, 1.0, %v8840_v0  ;;  %vm8568_vm14 = vcmp.eq.s32.totalorder %v8925_v55, %v6349_v17  ;;  %4884 = vmatpush1.bf16.msk.msra.mxu0 %vm6113_vm15, %v8886_v16  ;;  %v4517_v8 = vsel %vm8557_vm7, 1.0, %v8840_v0  ;;  %vm8560_vm13 = vcmp.eq.s32.totalorder %v8929_v31, %v6349_v17 }
  0xac   : > { %v4510_v12 = vsel %vm8568_vm14, 1.0, %v8840_v0  ;;  %vm8566_vm12 = vcmp.eq.s32.totalorder %v8925_v55, %v6352_v2  ;;  %4980 = vmatpush1.bf16.msk.msra.mxu1 %vm6126_vm6, %v8886_v16  ;;  %1232 = vmatprep.mubr.f32.mxu0 %v8840_v0  ;;  %v4514_v42 = vsel %vm8560_vm13, 1.0, %v8840_v0  ;;  %vm8564_vm7 = vcmp.eq.s32.totalorder %v8929_v31, %v6352_v2  ;;  %v8937_v55 = vld [vmem:[#allocation37_spill] sm:$0xff] }
  0xad   : > { %v4512_v5 = vsel %vm8566_vm12, 1.0, %v8840_v0  ;;  %2026 = vmatprep.mubr.f32.mxu1 %v8840_v0  ;;  %4886 = vmatprep.subr.bf16.mxu0 %v6377_v7  ;;  %v6747_v49 = vsub.f32 %v4511_v37, %v4511_v37  ;;  %v6749_v57 = vsub.f32 %v4515_v9, %v4515_v9  ;;  %v4516_v18 = vsel %vm8564_vm7, 1.0, %v8840_v0 }
  0xae   : > { %vm8565_vm13 = vcmp.eq.s32.totalorder %v8936_v56, %v6340_v47  ;;  %1236 = vmatmul.mubr.f32.vlgmr.msra.gmra.mrb[0].mxu0 %v8937_v55  ;;  %4982 = vmatprep.subr.bf16.mxu1 %v6383_v4  ;;  %v6759_v45 = vsub.f32 %v4513_v33, %v4513_v33  ;;  %v6761_v14 = vsub.f32 %v4517_v8, %v4517_v8  ;;  %v8943_v4 = vld [vmem:[#allocation19_spill] sm:$0xff] }
  0xaf   : > { %8934 = vst [vmem:[#allocation54_spill] sm:$0xff] %v6747_v49  ;;  %8935 = vst [vmem:[#allocation55_spill] sm:$0xff] %v6749_v57  ;;  %v6763_v7 = vsub.f32 %v4510_v12, %v4510_v12  ;;  %v4519_v37 = vsel %vm8565_vm13, 1.0, %v8840_v0  ;;  %2030 = vmatmul.mubr.f32.vlgmr.msra.gmra.mrb[0].mxu1 %v8937_v55  ;;  %4888 = vmatpush1.bf16.msra.mxu0 %v6393_v3  ;;  %v6771_v9 = vsub.f32 %v4514_v42, %v4514_v42 }
  0xb0   : > { %8938 = vst [vmem:[#allocation37_spill] sm:$0xff] %v6759_v45  ;;  %8939 = vst [vmem:[#allocation56_spill] sm:$0xff] %v6761_v14  ;;  %v6773_v31 = vsub.f32 %v4512_v5, %v4512_v5  ;;  %vm8567_vm7 = vcmp.eq.s32.totalorder %v8943_v4, %v6340_v47  ;;  %4984 = vmatpush1.bf16.msra.mxu1 %v6399_v50  ;;  %1241 = vmatprep.mubr.f32.mxu0 %v8840_v0 }
  0xb1   : > { %8940 = vst [vmem:[#allocation57_spill] sm:$0xff] %v6763_v7  ;;  %8941 = vst [vmem:[#allocation58_spill] sm:$0xff] %v6771_v9  ;;  %v6780_v12 = vsub.f32 %v4516_v18, %v4516_v18  ;;  %v4523_v3 = vsel %vm8567_vm7, 1.0, %v8840_v0  ;;  %vm8569_vm13 = vcmp.eq.s32.totalorder %v8936_v56, %v6343_v21  ;;  %2035 = vmatprep.mubr.f32.mxu1 %v8840_v0  ;;  %4890 = vmatprep.subr.bf16.mxu0 %v6405_v30  ;;  %v8946_v18 = vld [vmem:[#allocation39_spill] sm:$0xff] }
  0xb2   : > { %8942 = vst [vmem:[#allocation59_spill] sm:$0xff] %v6773_v31  ;;  %v6791_v5 = vsub.f32 %v4519_v37, %v4519_v37  ;;  %vm8570_vm12 = vcmp.eq.s32.totalorder %v8943_v4, %v6343_v21  ;;  %v4521_v50 = vsel %vm8569_vm13, 1.0, %v8840_v0  ;;  %vm8571_vm7 = vcmp.eq.s32.totalorder %v8936_v56, %v6349_v17  ;;  %1245 = vmatmul.mubr.f32.gmra.mrb[2].mxu0 %v8946_v18 }
  0xb3   : > { %8944 = vst [vmem:[#allocation60_spill] sm:$0xff] %v6780_v12  ;;  %4986 = vmatprep.subr.bf16.mxu1 %v6415_v38  ;;  %v4525_v30 = vsel %vm8570_vm12, 1.0, %v8840_v0  ;;  %vm8572_vm14 = vcmp.eq.s32.totalorder %v8943_v4, %v6349_v17  ;;  %v4518_v8 = vsel %vm8571_vm7, 1.0, %v8840_v0  ;;  %vm8578_vm13 = vcmp.eq.s32.totalorder %v8936_v56, %v6352_v2  ;;  %2039 = vmatmul.mubr.f32.gmra.mrb[2].mxu1 %v8946_v18 }
  0xb4   : > { %8945 = vst [vmem:[#allocation61_spill] sm:$0xff] %v6791_v5  ;;  %4892 = vmatpush1.bf16.msra.mxu0 %v6421_v63  ;;  %v4522_v38 = vsel %vm8572_vm14, 1.0, %v8840_v0  ;;  %vm8577_vm12 = vcmp.eq.s32.totalorder %v8943_v4, %v6352_v2  ;;  %v4520_v42 = vsel %vm8578_vm13, 1.0, %v8840_v0  ;;  %vm8575_vm7 = vcmp.eq.s32.totalorder %v6368_v53, %v6340_v47  ;;  %4988 = vmatpush1.bf16.msra.mxu1 %v6427_v51 }
  0xb5   : > { %1250 = vmatprep.mubr.f32.mxu0 %v8840_v0  ;;  %v6831_v63 = vsub.f32 %v4523_v3, %v4523_v3  ;;  %v4524_v37 = vsel %vm8577_vm12, 1.0, %v8840_v0  ;;  %vm8576_vm14 = vcmp.eq.s32.totalorder %v6386_v6, %v6340_v47  ;;  %v4527_v18 = vsel %vm8575_vm7, 1.0, %v8840_v0  ;;  %2044 = vmatprep.mubr.f32.mxu1 %v8840_v0 }
  0xb6   : > { %4894 = vmatprep.subr.bf16.mxu0 %v6440_v23  ;;  %v6845_v51 = vsub.f32 %v4521_v50, %v4521_v50  ;;  %v6847_v3 = vsub.f32 %v4525_v30, %v4525_v30  ;;  %v6849_v55 = vsub.f32 %v4518_v8, %v4518_v8  ;;  %v4531_v33 = vsel %vm8576_vm14, 1.0, %v8840_v0  ;;  %1254 = vmatmul.mubr.f32.gmra.mrb[4].mxu0 %v6250_v44 }
  0xb7   : > { %8947 = vst [vmem:[#allocation39_spill] sm:$0xff] %v6831_v63  ;;  %4990 = vmatprep.subr.bf16.mxu1 %v6446_v25  ;;  %v6857_v4 = vsub.f32 %v4522_v38, %v4522_v38  ;;  %v6859_v56 = vsub.f32 %v4520_v42, %v4520_v42  ;;  %vm8580_vm7 = vcmp.eq.s32.totalorder %v6368_v53, %v6343_v21 }
  0xb8   : > { %8948 = vst [vmem:[#allocation62_spill] sm:$0xff] %v6847_v3  ;;  %2048 = vmatmul.mubr.f32.gmra.mrb[4].mxu1 %v6250_v44  ;;  %4896 = vmatpush1.bf16.msra.mxu0 %v6452_v29  ;;  %v6866_v50 = vsub.f32 %v4524_v37, %v4524_v37  ;;  %v6868_v30 = vsub.f32 %v4527_v18, %v4527_v18  ;;  %v4529_v25 = vsel %vm8580_vm7, 1.0, %v8840_v0 }
  0xb9   : > { %vm8579_vm14 = vcmp.eq.s32.totalorder %v6386_v6, %v6343_v21  ;;  %4992 = vmatpush1.bf16.msra.mxu1 %v6462_v43  ;;  %1259 = vmatprep.mubr.f32.mxu0 %v8840_v0  ;;  %v6878_v8 = vsub.f32 %v4531_v33, %v4531_v33  ;;  %vm8582_vm12 = vcmp.eq.s32.totalorder %v6368_v53, %v6349_v17 }
  0xba   : > { %v4533_v44 = vsel %vm8579_vm14, 1.0, %v8840_v0  ;;  %vm8581_vm13 = vcmp.eq.s32.totalorder %v6386_v6, %v6349_v17  ;;  %2053 = vmatprep.mubr.f32.mxu1 %v8840_v0  ;;  %4898 = vmatprep.subr.bf16.mxu0 %v6468_v52  ;;  %v4526_v29 = vsel %vm8582_vm12, 1.0, %v8840_v0  ;;  %vm8584_vm14 = vcmp.eq.s32.totalorder %v6368_v53, %v6352_v2 }
  0xbb   : > { %v4530_v43 = vsel %vm8581_vm13, 1.0, %v8840_v0  ;;  %vm8583_vm7 = vcmp.eq.s32.totalorder %v6386_v6, %v6352_v2  ;;  %1263 = vmatmul.mubr.f32.gmra.mrb[6].mxu0 %v6287_v11  ;;  %4994 = vmatprep.subr.bf16.mxu1 %v6474_v36  ;;  %v4528_v52 = vsel %vm8584_vm14, 1.0, %v8840_v0  ;;  %vm8667_vm13 = vcmp.eq.s32.totalorder %v6430_v10, %v6340_v47 }
  0xbc   : > { %v4532_v33 = vsel %vm8583_vm7, 1.0, %v8840_v0  ;;  %vm8663_vm12 = vcmp.eq.s32.totalorder %v6455_v15, %v6340_v47  ;;  %2057 = vmatmul.mubr.f32.gmra.mrb[6].mxu1 %v6287_v11  ;;  %4900 = vmatpush1.bf16.msra.mxu0 %v6484_v20  ;;  %v4535_v36 = vsel %vm8667_vm13, 1.0, %v8840_v0  ;;  %vm8655_vm7 = vcmp.eq.s32.totalorder %v6430_v10, %v6343_v21 }
  0xbd   : > { %v4539_v38 = vsel %vm8663_vm12, 1.0, %v8840_v0  ;;  %vm8650_vm14 = vcmp.eq.s32.totalorder %v6455_v15, %v6343_v21  ;;  %4996 = vmatpush1.bf16.msra.mxu1 %v6533_v22  ;;  %1381 = vmatprep.mubr.f32.mxu0 %v8840_v0  ;;  %v6932_v11 = vsub.f32 %v4529_v25, %v4529_v25  ;;  %v6934_v20 = vsub.f32 %v4533_v44, %v4533_v44 }
  0xbe   : > { %v4537_v42 = vsel %vm8655_vm7, 1.0, %v8840_v0  ;;  %v4541_v37 = vsel %vm8650_vm14, 1.0, %v8840_v0  ;;  %2175 = vmatprep.mubr.f32.mxu1 %v8840_v0  ;;  %4902 = vmatprep.subr.msk.bf16.mxu0 %vm5836_vm4, %v8886_v16  ;;  %v6948_v22 = vsub.f32 %v4526_v29, %v4526_v29  ;;  %v6950_v18 = vsub.f32 %v4530_v43, %v4530_v43  ;;  %v8959_v29 = vld [vmem:[#allocation49_spill] sm:$0xff] }
  0xbf   : > { %8949 = vst [vmem:[#allocation63_spill] sm:$0xff] %v6934_v20  ;;  %v6952_v25 = vsub.f32 %v4528_v52, %v4528_v52  ;;  %1383 = vmatmul.mubr.f32.vlgmr.msra.gmra.mrb[0].mxu0 %v6148_v48  ;;  %4998 = vmatprep.subr.msk.bf16.mxu1 %vm5849_vm5, %v8886_v16  ;;  %v6959_v23 = vsub.f32 %v4532_v33, %v4532_v33  ;;  %v8963_v44 = vand.u32 4294901760, %v6637_v59 }
  0xc0   : > { %v6961_v20 = vsub.f32 %v4535_v36, %v4535_v36  ;;  %v6963_v24 = vsub.f32 %v4539_v38, %v4539_v38  ;;  %2177 = vmatmul.mubr.f32.vlgmr.msra.gmra.mrb[0].mxu1 %v6148_v48  ;;  %4904 = vmatpush1.bf16.msk.msra.mxu0 %vm5870_vm10, %v8886_v16  ;;  %v6970_v43 = vsub.f32 %v4537_v42, %v4537_v42  ;;  %v8954_v38 = vand.u32 4294901760, %v6551_v26 }
  0xc1   : > { %v6972_v52 = vsub.f32 %v4541_v37, %v4541_v37  ;;  %vm8645_vm4 = vcmp.eq.s32.totalorder %v6430_v10, %v6349_v17  ;;  %5000 = vmatpush1.bf16.msk.msra.mxu1 %vm5883_vm11, %v8886_v16  ;;  %1388 = vmatprep.mubr.f32.mxu0 %v8840_v0  ;;  %vm8635_vm5 = vcmp.eq.s32.totalorder %v6455_v15, %v6349_v17  ;;  %v8955_v37 = vand.u32 4294901760, %v6564_v40 }
  0xc2   : > { %8950 = vst [vmem:[#allocation64_spill] sm:$0xff] %v6963_v24  ;;  %8951 = vst [vmem:[#allocation65_spill] sm:$0xff] %v6970_v43  ;;  %vm8627_vm10 = vcmp.eq.s32.totalorder %v6430_v10, %v6352_v2  ;;  %v2466_v33 = vsub.f32 %v6549_v34, %v8953_v13  ;;  %2182 = vmatprep.mubr.f32.mxu1 %v8840_v0  ;;  %4906 = vmatprep.subr.msk.bf16.mxu0 %vm5906_vm0, %v8886_v16  ;;  %v4534_v41 = vsel %vm8645_vm4, 1.0, %v8840_v0  ;;  %v8968_v34 = vld [vmem:[#allocation40_spill] sm:$0xff]  ;;  %v8977_v24 = vld [vmem:[#allocation31_spill] sm:$0xff] }
  0xc3   : > { %8952 = vst [vmem:[#allocation66_spill] sm:$0xff] %v6972_v52  ;;  %v2478_v42 = vsub.f32 %v6551_v26, %v8954_v38  ;;  %v3364_v13 = vsub.f32 %v6564_v40, %v8955_v37  ;;  %v8956_v36 = vand.u32 4294901760, %v6566_v46  ;;  %1390 = vmatmul.mubr.f32.gmra.mrb[2].mxu0 %v6175_v32  ;;  %5002 = vmatprep.subr.msk.bf16.mxu1 %vm5917_vm1, %v8886_v16  ;;  %v8958_v38 = vand.u32 4294901760, %v6577_v60 }
  0xc4   : > { %vm8624_vm11 = vcmp.eq.s32.totalorder %v6455_v15, %v6352_v2  ;;  %v7014_v35 = vsub.f32 %v6408_v58, %v6477_v19  ;;  %2184 = vmatmul.mubr.f32.gmra.mrb[2].mxu1 %v6175_v32  ;;  %4908 = vmatpush1.bf16.msk.msra.mxu0 %vm5966_vm8, %v8886_v16  ;;  %v4538_v39 = vsel %vm8635_vm5, 1.0, %v8840_v0  ;;  %v8961_v58 = vand.u32 4294901760, %v6579_v61 }
  0xc5   : > { %v3376_v1 = vsub.f32 %v6566_v46, %v8956_v36  ;;  %v2472_v37 = vsub.f32 %v6577_v60, %v8958_v38  ;;  %v8962_v46 = vand.u32 4294901760, %v6591_v54  ;;  %v3382_v60 = vsub.f32 %v6637_v59, %v8963_v44  ;;  %5004 = vmatpush1.bf16.msk.msra.mxu1 %vm5979_vm9, %v8886_v16  ;;  %1395 = vmatprep.mubr.f32.mxu0 %v8840_v0 }
  0xc6   : > { %8957 = vst [vmem:[#allocation67_spill] sm:$0xff] %v7014_v35  ;;  %v2484_v19 = vsub.f32 %v6579_v61, %v8961_v58  ;;  %v7041_v40 = vsub.f32 %v4534_v41, %v4534_v41  ;;  %v4536_v58 = vsel %vm8627_vm10, 1.0, %v8840_v0  ;;  %2189 = vmatprep.mubr.f32.mxu1 %v8840_v0  ;;  %4910 = vmatprep.subr.msk.bf16.mxu0 %vm6002_vm2, %v8886_v16  ;;  %v2467_v41 = vand.u32 4294901760, %v2466_v33 }
  0xc7   : > { %v3370_v38 = vsub.f32 %v6591_v54, %v8962_v46  ;;  %v4540_v46 = vsel %vm8624_vm11, 1.0, %v8840_v0  ;;  %v8966_v54 = vld [vmem:[#allocation50_spill] sm:$0xff]  ;;  %v2479_v59 = vand.u32 4294901760, %v2478_v42  ;;  %v3365_v61 = vand.u32 4294901760, %v3364_v13  ;;  %1397 = vmatmul.mubr.f32.gmra.mrb[4].mxu0 %v8968_v34 }
  0xc8   : > { %8965 = vst [vmem:[#allocation26_spill] sm:$0xff] %v7041_v40  ;;  %v3377_v26 = vand.u32 4294901760, %v3376_v1  ;;  %v8969_v40 = vld [vmem:[#allocation29_spill] sm:$0xff]  ;;  %v7060_v52 = vsub.f32 %v4538_v39, %v4538_v39  ;;  %v7063_v44 = vand.u32 4294901760, %v7014_v35  ;;  %v8973_v43 = vand.u32 4294901760, %v6653_v62  ;;  %2191 = vmatmul.mubr.f32.gmra.mrb[4].mxu1 %v8968_v34  ;;  %v8975_v1 = vld [vmem:[#allocation30_spill] sm:$0xff]  ;;  %1402 = vmatprep.mubr.f32.mxu0 %v8840_v0 }
  0xc9   : > { %vm8970_vm0 = vnez %v8969_v40  ;;  %v8974_v33 = vand.u32 4294901760, %v6655_v27  ;;  %vm8976_vm1 = vnez %v8975_v1  ;;  %v2473_v40 = vand.u32 4294901760, %v2472_v37  ;;  %v8982_v1 = vld [vmem:[#allocation51_spill] sm:$0xff]  ;;  %2196 = vmatprep.mubr.f32.mxu1 %v8840_v0 }
  0xca   : > { %5006 = vmatprep.subr.msk.bf16.mxu1 %vm8970_vm0, %v8886_v16  ;;  %8971 = vst [vmem:[#allocation27_spill] sm:$0xff] %v7060_v52  ;;  %8972 = vst [vmem:[#allocation28_spill] sm:$0xff] %v7063_v44  ;;  %v2490_v36 = vsub.f32 %v6653_v62, %v8973_v43  ;;  %4912 = vmatpush1.bf16.msk.msra.mxu0 %vm8976_vm1, %v8886_v16  ;;  %v2485_v13 = vand.u32 4294901760, %v2484_v19  ;;  %v3371_v39 = vand.u32 4294901760, %v3370_v38  ;;  %v3383_v52 = vand.u32 4294901760, %v3382_v60  ;;  %v8983_v19 = vld [vmem:[#allocation32_spill] sm:$0xff] }
  0xcb   : > { %v2502_v42 = vsub.f32 %v6655_v27, %v8974_v33  ;;  %vm8978_vm8 = vnez %v8977_v24  ;;  %v7079_v43 = vsub.f32 %v4536_v58, %v4536_v58  ;;  %v7081_v62 = vsub.f32 %v4540_v46, %v4540_v46  ;;  %v8985_v60 = vld [vmem:[#allocation8_spill] sm:$0xff]  ;;  %v8987_v24 = vld [vmem:[#allocation13_spill] sm:$0xff]  ;;  %v9018_v37 = vld [vmem:[#allocation15_spill] sm:$0xff] }
  0xcc   : > { %5008 = vmatpush1.bf16.msk.msra.mxu1 %vm8978_vm8, %v8886_v16  ;;  %v8981_v33 = vand.u32 4294901760, %v6666_v28  ;;  %vm8984_vm9 = vnez %v8983_v19  ;;  %vm8986_vm2 = vcmp.eq.s32.totalorder %v8985_v60, %v6340_v47  ;;  %vm8988_vm0 = vcmp.eq.s32.totalorder %v8987_v24, %v6340_v47  ;;  %v8995_v19 = vld [vmem:[#allocation41_spill] sm:$0xff] }
  0xcd   : > { %8979 = vst [vmem:[#allocation40_spill] sm:$0xff] %v7079_v43  ;;  %8980 = vst [vmem:[#allocation29_spill] sm:$0xff] %v7081_v62  ;;  %4914 = vmatprep.subr.msk.bf16.mxu0 %vm8984_vm9, %v8886_v16  ;;  %v8989_v38 = vmov 0  ;;  %v7103_v58 = vpack.c.bf16 %v2479_v59, %v2467_v41  ;;  %v7105_v46 = vpack.c.bf16 %v3377_v26, %v3365_v61  ;;  %1404 = vmatmul.mubr.f32.gmra.mrb[6].mxu0 %v8995_v19  ;;  %v8999_v59 = vmov 0 }
  0xce   : > { %v7086_v27 = vsub.f32 %v6666_v28, %v8981_v33  ;;  %vm7099_vm1 = vmpackc.low %vm8988_vm0, %vm8986_vm2  ;;  %v8993_v33 = vld [vmem:[#allocation52_spill] sm:$0xff]  ;;  %v8994_v28 = vld [vmem:[#allocation53_spill] sm:$0xff]  ;;  %5010 = vmatprep.subr.msk.bf16.mxu1 %vm8931_vm3, %v8886_v16  ;;  %vm8997_vm8 = vcmp.eq.s32.totalorder %v8985_v60, %v6343_v21  ;;  %vm8998_vm9 = vcmp.eq.s32.totalorder %v8987_v24, %v6343_v21  ;;  %v2491_v61 = vand.u32 4294901760, %v2490_v36  ;;  %2198 = vmatmul.mubr.f32.gmra.mrb[6].mxu1 %v8995_v19 }
  0xcf   : > { %v8990_v38 = vsel %vm7099_vm1, 4294967295, %v8989_v38  ;;  %8992 = vst [vmem:[#allocation31_spill] sm:$0xff] %v7105_v46  ;;  %vm7119_vm2 = vmpackc.low %vm8998_vm9, %vm8997_vm8  ;;  %v2503_v41 = vand.u32 4294901760, %v2502_v42  ;;  %v9002_v62 = vand.u32 4294901760, %v8959_v29  ;;  %4916 = vmatpush1.bf16.msk.msra.mxu0 %vm6113_vm15, %v8886_v16  ;;  %vm9004_vm3 = vcmp.eq.s32.totalorder %v8985_v60, %v6349_v17  ;;  %1490 = vmatprep.mubr.f32.mxu0 %v8840_v0 }
  0xd0   : > { %8991 = vst [vmem:[#allocation30_spill] sm:$0xff] %v8990_v38  ;;  %v9000_v59 = vsel %vm7119_vm2, 4294967295, %v8999_v59  ;;  %vm9005_vm0 = vcmp.eq.s32.totalorder %v8987_v24, %v6349_v17  ;;  %v9006_v36 = vmov 0  ;;  %v7144_v42 = vpack.c.bf16 %v2485_v13, %v2473_v40  ;;  %5012 = vmatpush1.bf16.msk.msra.mxu1 %vm6126_vm6, %v8886_v16  ;;  %2284 = vmatprep.mubr.f32.mxu1 %v8840_v0 }
  0xd1   : > { %9001 = vst [vmem:[#allocation32_spill] sm:$0xff] %v9000_v59  ;;  %v7128_v43 = vsub.f32 %v8959_v29, %v9002_v62  ;;  %vm7140_vm8 = vmpackc.low %vm9005_vm0, %vm9004_vm3  ;;  %v7146_v62 = vpack.c.bf16 %v3383_v52, %v3371_v39  ;;  %v9009_v26 = vand.u32 4294901760, %v8966_v54  ;;  %vm9011_vm15 = vcmp.eq.s32.totalorder %v8985_v60, %v6352_v2  ;;  %5014 = vmatprep.subr.msk.bf16.mxu0 %vm7099_vm1, %v8886_v16 }
  0xd2   : > { %v9007_v36 = vsel %vm7140_vm8, 4294967295, %v9006_v36  ;;  %vm9012_vm9 = vcmp.eq.s32.totalorder %v8987_v24, %v6352_v2  ;;  %v9013_v52 = vmov 0  ;;  %vm9019_vm0 = vcmp.eq.s32.totalorder %v9018_v37, %v6340_v47  ;;  %1492 = vmatmul.mubr.f32.vlgmr.msra.gmra.mrb[0].mxu0 %v6148_v48  ;;  %5158 = vmatprep.subr.msk.bf16.mxu1 %vm7119_vm2, %v8886_v16 }
  0xd3   : > { %9008 = vst [vmem:[#allocation41_spill] sm:$0xff] %v9007_v36  ;;  %v7151_v29 = vsub.f32 %v8966_v54, %v9009_v26  ;;  %vm7164_vm3 = vmpackc.low %vm9012_vm9, %vm9011_vm15  ;;  %v9016_v26 = vld [vmem:[#allocation14_spill] sm:$0xff]  ;;  %v9020_v40 = vmov 0  ;;  %v9023_v39 = vand.u32 4294901760, %v8982_v1  ;;  %v7208_v13 = vpack.c.bf16 %v2503_v41, %v2491_v61  ;;  %2286 = vmatmul.mubr.f32.vlgmr.msra.gmra.mrb[0].mxu1 %v6148_v48  ;;  %5016 = vmatpush1.bf16.msk.msra.mxu0 %vm7140_vm8, %v8886_v16 }
  0xd4   : > { %v9014_v52 = vsel %vm7164_vm3, 4294967295, %v9013_v52  ;;  %vm9017_vm6 = vcmp.eq.s32.totalorder %v9016_v26, %v6340_v47  ;;  %vm9024_vm9 = vcmp.eq.s32.totalorder %v9016_v26, %v6343_v21  ;;  %v3401_v60 = vand.u32 4294901760, %v7128_v43  ;;  %5160 = vmatpush1.bf16.msk.msra.mxu1 %vm7164_vm3, %v8886_v16  ;;  %1497 = vmatprep.mubr.f32.mxu0 %v8840_v0 }
  0xd5   : > { %9015 = vst [vmem:[#allocation33_spill] sm:$0xff] %v9014_v52  ;;  %vm7182_vm15 = vmpackc.low %vm9019_vm0, %vm9017_vm6  ;;  %v7189_v46 = vsub.f32 %v8982_v1, %v9023_v39  ;;  %vm9025_vm6 = vcmp.eq.s32.totalorder %v9018_v37, %v6343_v21  ;;  %v9026_v39 = vmov 0  ;;  %v9029_v24 = vand.u32 4294901760, %v8993_v33  ;;  %2291 = vmatprep.mubr.f32.mxu1 %v8840_v0 }
  0xd6   : > { %v9021_v40 = vsel %vm7182_vm15, 4294967295, %v9020_v40  ;;  %vm7204_vm0 = vmpackc.low %vm9025_vm6, %vm9024_vm9  ;;  %vm9030_vm9 = vcmp.eq.s32.totalorder %v9016_v26, %v6349_v17  ;;  %vm9031_vm6 = vcmp.eq.s32.totalorder %v9018_v37, %v6349_v17  ;;  %v9032_v61 = vmov 0  ;;  %5018 = vmatprep.subr.msk.bf16.mxu0 %vm7182_vm15, %v8886_v16  ;;  %1499 = vmatmul.mubr.f32.gmra.mrb[2].mxu0 %v6175_v32 }
  0xd7   : > { %9022 = vst [vmem:[#allocation34_spill] sm:$0xff] %v9021_v40  ;;  %v9027_v39 = vsel %vm7204_vm0, 4294967295, %v9026_v39  ;;  %v7214_v38 = vsub.f32 %v8993_v33, %v9029_v24  ;;  %vm7227_vm11 = vmpackc.low %vm9031_vm6, %vm9030_vm9  ;;  %v9035_v24 = vand.u32 4294901760, %v8994_v28  ;;  %v9036_v48 = vand.u32 4294901760, %v6747_v49  ;;  %5162 = vmatprep.subr.msk.bf16.mxu1 %vm7204_vm0, %v8886_v16  ;;  %2293 = vmatmul.mubr.f32.gmra.mrb[2].mxu1 %v6175_v32 }
  0xd8   : > { %9028 = vst [vmem:[#allocation35_spill] sm:$0xff] %v9027_v39  ;;  %v9033_v61 = vsel %vm7227_vm11, 4294967295, %v9032_v61  ;;  %vm9037_vm9 = vcmp.eq.s32.totalorder %v9016_v26, %v6352_v2  ;;  %vm9038_vm6 = vcmp.eq.s32.totalorder %v9018_v37, %v6352_v2  ;;  %v9042_v36 = vand.u32 4294901760, %v6749_v57  ;;  %v9045_v37 = vld [vmem:[#allocation16_spill] sm:$0xff]  ;;  %5020 = vmatpush1.bf16.msk.msra.mxu0 %vm7227_vm11, %v8886_v16  ;;  %1504 = vmatprep.mubr.f32.mxu0 %v8840_v0 }
  0xd9   : > { %9034 = vst [vmem:[#allocation68_spill] sm:$0xff] %v9033_v61  ;;  %v7234_v41 = vsub.f32 %v8994_v28, %v9035_v24  ;;  %v7239_v43 = vsub.f32 %v6747_v49, %v9036_v48  ;;  %vm7253_vm10 = vmpackc.low %vm9038_vm6, %vm9037_vm9  ;;  %v9039_v24 = vmov 0  ;;  %v2497_v48 = vand.u32 4294901760, %v7151_v29  ;;  %v9047_v29 = vld [vmem:[#allocation17_spill] sm:$0xff]  ;;  %2298 = vmatprep.mubr.f32.mxu1 %v8840_v0 }
  0xda   : > { %v9040_v24 = vsel %vm7253_vm10, 4294967295, %v9039_v24  ;;  %v2526_v59 = vsub.f32 %v6749_v57, %v9042_v36  ;;  %v9043_v52 = vand.u32 4294901760, %v6759_v45  ;;  %v9044_v28 = vand.u32 4294901760, %v6761_v14  ;;  %5164 = vmatpush1.bf16.msk.msra.mxu1 %vm7253_vm10, %v8886_v16  ;;  %1506 = vmatmul.mubr.f32.gmra.mrb[4].mxu0 %v8968_v34 }
  0xdb   : > { %9041 = vst [vmem:[#allocation69_spill] sm:$0xff] %v9040_v24  ;;  %vm9046_vm9 = vcmp.eq.s32.totalorder %v9045_v37, %v6340_v47  ;;  %vm9048_vm6 = vcmp.eq.s32.totalorder %v9047_v29, %v6340_v47  ;;  %v9049_v36 = vmov 0  ;;  %v9054_v57 = vand.u32 4294901760, %v6773_v31  ;;  %2300 = vmatmul.mubr.f32.gmra.mrb[4].mxu1 %v8968_v34  ;;  %1511 = vmatprep.mubr.f32.mxu0 %v8840_v0 }
  0xdc   : > { %v3412_v49 = vsub.f32 %v6759_v45, %v9043_v52  ;;  %v3424_v26 = vsub.f32 %v6761_v14, %v9044_v28  ;;  %vm7277_vm5 = vmpackc.low %vm9048_vm6, %vm9046_vm9  ;;  %v2509_v52 = vand.u32 4294901760, %v7189_v46  ;;  %v9052_v28 = vand.u32 4294901760, %v6763_v7  ;;  %2305 = vmatprep.mubr.f32.mxu1 %v8840_v0 }
  0xdd   : > { %v9050_v36 = vsel %vm7277_vm5, 4294967295, %v9049_v36  ;;  %v9053_v45 = vand.u32 4294901760, %v6771_v9  ;;  %v3418_v33 = vsub.f32 %v6773_v31, %v9054_v57  ;;  %vm9055_vm9 = vcmp.eq.s32.totalorder %v9045_v37, %v6343_v21  ;;  %5022 = vmatprep.subr.msk.bf16.mxu0 %vm7277_vm5, %v8886_v16 }
  0xde   : > { %9051 = vst [vmem:[#allocation70_spill] sm:$0xff] %v9050_v36  ;;  %v2520_v14 = vsub.f32 %v6763_v7, %v9052_v28  ;;  %vm9056_vm6 = vcmp.eq.s32.totalorder %v9047_v29, %v6343_v21  ;;  %v9057_v46 = vmov 0  ;;  %v9060_v57 = vand.u32 4294901760, %v6780_v12  ;;  %1513 = vmatmul.mubr.f32.gmra.mrb[6].mxu0 %v8995_v19 }
  0xdf   : > { %v2532_v40 = vsub.f32 %v6771_v9, %v9053_v45  ;;  %vm7301_vm4 = vmpackc.low %vm9056_vm6, %vm9055_vm9  ;;  %v3395_v45 = vand.u32 4294901760, %v7214_v38  ;;  %vm9061_vm9 = vcmp.eq.s32.totalorder %v9045_v37, %v6349_v17  ;;  %vm9062_vm6 = vcmp.eq.s32.totalorder %v9047_v29, %v6349_v17  ;;  %2307 = vmatmul.mubr.f32.gmra.mrb[6].mxu1 %v8995_v19  ;;  %v9126_v19 = vld [vmem:[#allocation63_spill] sm:$0xff]  ;;  %2418 = vmatprep.mubr.f32.mxu0 %v8840_v0 }
  0xe0   : > { %v9058_v46 = vsel %vm7301_vm4, 4294967295, %v9057_v46  ;;  %v3430_v28 = vsub.f32 %v6780_v12, %v9060_v57  ;;  %vm7321_vm14 = vmpackc.low %vm9062_vm6, %vm9061_vm9  ;;  %v9063_v38 = vmov 0  ;;  %v3407_v57 = vand.u32 4294901760, %v7234_v41  ;;  %5166 = vmatprep.subr.msk.bf16.mxu1 %vm7301_vm4, %v8886_v16  ;;  %3316 = vmatprep.mubr.f32.mxu1 %v8840_v0 }
  0xe1   : > { %9059 = vst [vmem:[#allocation71_spill] sm:$0xff] %v9058_v46  ;;  %v9064_v38 = vsel %vm7321_vm14, 4294967295, %v9063_v38  ;;  %v2515_v39 = vand.u32 4294901760, %v7239_v43  ;;  %v9066_v32 = vand.u32 4294901760, %v6791_v5  ;;  %v9067_v61 = vand.u32 4294901760, %v6831_v63  ;;  %5024 = vmatpush1.bf16.msk.msra.mxu0 %vm7321_vm14, %v8886_v16 }
  0xe2   : > { %9065 = vst [vmem:[#allocation72_spill] sm:$0xff] %v9064_v38  ;;  %vm9068_vm9 = vcmp.eq.s32.totalorder %v9045_v37, %v6352_v2  ;;  %vm9069_vm6 = vcmp.eq.s32.totalorder %v9047_v29, %v6352_v2  ;;  %v9070_v41 = vmov 0  ;;  %v2527_v43 = vand.u32 4294901760, %v2526_v59  ;;  %v9076_v37 = vld [vmem:[#allocation18_spill] sm:$0xff]  ;;  %v9078_v29 = vld [vmem:[#allocation19_spill] sm:$0xff] }
  0xe3   : > { %v2538_v31 = vsub.f32 %v6791_v5, %v9066_v32  ;;  %v2550_v12 = vsub.f32 %v6831_v63, %v9067_v61  ;;  %vm7343_vm7 = vmpackc.low %vm9069_vm6, %vm9068_vm9  ;;  %v3413_v32 = vand.u32 4294901760, %v3412_v49  ;;  %v3425_v5 = vand.u32 4294901760, %v3424_v26  ;;  %v9073_v61 = vld [vmem:[#allocation21_spill] sm:$0xff]  ;;  %v9074_v63 = vld [vmem:[#allocation43_spill] sm:$0xff] }
  0xe4   : > { %v9071_v41 = vsel %vm7343_vm7, 4294967295, %v9070_v41  ;;  %v7349_v9 = vsub.f32 %v9074_v63, %v9073_v61  ;;  %vm9077_vm12 = vcmp.eq.s32.totalorder %v9076_v37, %v6340_v47  ;;  %vm9079_vm9 = vcmp.eq.s32.totalorder %v9078_v29, %v6340_v47  ;;  %5168 = vmatpush1.bf16.msk.msra.mxu1 %vm7343_vm7, %v8886_v16  ;;  %v9163_v38 = vld [vmem:[#allocation31_spill] sm:$0xff] }
  0xe5   : > { %9072 = vst [vmem:[#allocation73_spill] sm:$0xff] %v9071_v41  ;;  %vm7361_vm6 = vmpackc.low %vm9079_vm9, %vm9077_vm12  ;;  %v9080_v59 = vmov 0  ;;  %v2521_v49 = vand.u32 4294901760, %v2520_v14  ;;  %v2533_v26 = vand.u32 4294901760, %v2532_v40  ;;  %v3419_v63 = vand.u32 4294901760, %v3418_v33 }
  0xe6   : > { %9075 = vst [vmem:[#allocation43_spill] sm:$0xff] %v7349_v9  ;;  %v9081_v59 = vsel %vm7361_vm6, 4294967295, %v9080_v59  ;;  %vm9083_vm13 = vcmp.eq.s32.totalorder %v9076_v37, %v6343_v21  ;;  %vm9084_vm12 = vcmp.eq.s32.totalorder %v9078_v29, %v6343_v21  ;;  %v9085_v36 = vmov 0  ;;  %5026 = vmatprep.subr.msk.bf16.mxu0 %vm7361_vm6, %v8886_v16 }
  0xe7   : > { %9082 = vst [vmem:[#allocation74_spill] sm:$0xff] %v9081_v59  ;;  %vm7376_vm9 = vmpackc.low %vm9084_vm12, %vm9083_vm13  ;;  %v3431_v14 = vand.u32 4294901760, %v3430_v28  ;;  %v9088_v33 = vand.u32 4294901760, %v6845_v51  ;;  %v9089_v24 = vand.u32 4294901760, %v6847_v3  ;;  %vm9090_vm13 = vcmp.eq.s32.totalorder %v9076_v37, %v6349_v17 }
  0xe8   : > { %v9086_v36 = vsel %vm7376_vm9, 4294967295, %v9085_v36  ;;  %vm9091_vm12 = vcmp.eq.s32.totalorder %v9078_v29, %v6349_v17  ;;  %v9092_v28 = vmov 0  ;;  %v7409_v61 = vpack.c.bf16 %v2509_v52, %v2497_v48  ;;  %5170 = vmatprep.subr.msk.bf16.mxu1 %vm7376_vm9, %v8886_v16 }
  0xe9   : > { %9087 = vst [vmem:[#allocation75_spill] sm:$0xff] %v9086_v36  ;;  %v7383_v40 = vsub.f32 %v6845_v51, %v9088_v33  ;;  %v7388_v46 = vsub.f32 %v6847_v3, %v9089_v24  ;;  %vm7401_vm4 = vmpackc.low %vm9091_vm12, %vm9090_vm13  ;;  %v9095_v24 = vand.u32 4294901760, %v7086_v27  ;;  %v2539_v34 = vand.u32 4294901760, %v2538_v31 }
  0xea   : > { %v9093_v28 = vsel %vm7401_vm4, 4294967295, %v9092_v28  ;;  %v2551_v3 = vand.u32 4294901760, %v2550_v12  ;;  %vm9096_vm13 = vcmp.eq.s32.totalorder %v9076_v37, %v6352_v2  ;;  %vm9097_vm12 = vcmp.eq.s32.totalorder %v9078_v29, %v6352_v2  ;;  %5028 = vmatpush1.bf16.msk.msra.mxu0 %vm7401_vm4, %v8886_v16 }
  0xeb   : > { %9094 = vst [vmem:[#allocation76_spill] sm:$0xff] %v9093_v28  ;;  %v7407_v33 = vpack.c.bf16 %v3401_v60, %v9095_v24  ;;  %vm7421_vm14 = vmpackc.low %vm9097_vm12, %vm9096_vm13  ;;  %v9098_v27 = vmov 0  ;;  %v7425_v60 = vpack.c.bf16 %v3407_v57, %v3395_v45  ;;  %v7427_v31 = vpack.c.bf16 %v2527_v43, %v2515_v39  ;;  %v9108_v43 = vld [vmem:[#allocation44_spill] sm:$0xff] }
  0xec   : > { %v9099_v27 = vsel %vm7421_vm14, 4294967295, %v9098_v27  ;;  %v7429_v12 = vpack.c.bf16 %v3425_v5, %v3413_v32  ;;  %v7432_v48 = vand.u32 4294901760, %v7349_v9  ;;  %vm9102_vm13 = vcmp.eq.s32.totalorder %v6368_v53, %v6340_v47  ;;  %5172 = vmatpush1.bf16.msk.msra.mxu1 %vm7421_vm14, %v8886_v16 }
  0xed   : > { %9100 = vst [vmem:[#allocation77_spill] sm:$0xff] %v9099_v27  ;;  %vm9103_vm12 = vcmp.eq.s32.totalorder %v6386_v6, %v6340_v47  ;;  %v9104_v39 = vmov 0  ;;  %v7448_v5 = vpack.c.bf16 %v2533_v26, %v2521_v49  ;;  %v9107_v52 = vand.u32 4294901760, %v6849_v55 }
  0xee   : > { %9101 = vst [vmem:[#allocation78_spill] sm:$0xff] %v7432_v48  ;;  %vm7444_vm7 = vmpackc.low %vm9103_vm12, %vm9102_vm13  ;;  %v7455_v32 = vand.u32 4294901760, %v9108_v43  ;;  %vm9110_vm13 = vcmp.eq.s32.totalorder %v6368_v53, %v6343_v21  ;;  %vm9111_vm12 = vcmp.eq.s32.totalorder %v6386_v6, %v6343_v21  ;;  %v9112_v49 = vmov 0 }
  0xef   : > { %v9105_v39 = vsel %vm7444_vm7, 4294967295, %v9104_v39  ;;  %v2544_v45 = vsub.f32 %v6849_v55, %v9107_v52  ;;  %vm7467_vm6 = vmpackc.low %vm9111_vm12, %vm9110_vm13  ;;  %v7471_v26 = vpack.c.bf16 %v3431_v14, %v3419_v63  ;;  %v3437_v24 = vand.u32 4294901760, %v7383_v40  ;;  %5030 = vmatprep.subr.msk.bf16.mxu0 %vm7444_vm7, %v8886_v16 }
  0xf0   : > { %9106 = vst [vmem:[#allocation79_spill] sm:$0xff] %v9105_v39  ;;  %9109 = vst [vmem:[#allocation44_spill] sm:$0xff] %v7455_v32  ;;  %v9113_v49 = vsel %vm7467_vm6, 4294967295, %v9112_v49  ;;  %v3449_v52 = vand.u32 4294901760, %v7388_v46  ;;  %v9115_v57 = vand.u32 4294901760, %v6857_v4  ;;  %vm9116_vm13 = vcmp.eq.s32.totalorder %v6368_v53, %v6349_v17  ;;  %5174 = vmatprep.subr.msk.bf16.mxu1 %vm7467_vm6, %v8886_v16 }
  0xf1   : > { %9114 = vst [vmem:[#allocation80_spill] sm:$0xff] %v9113_v49  ;;  %vm9117_vm12 = vcmp.eq.s32.totalorder %v6386_v6, %v6349_v17  ;;  %v9118_v63 = vmov 0  ;;  %v7492_v46 = vpack.c.bf16 %v2551_v3, %v2539_v34  ;;  %v9123_v3 = vmov 0 }
  0xf2   : > { %v2556_v29 = vsub.f32 %v6857_v4, %v9115_v57  ;;  %vm7488_vm9 = vmpackc.low %vm9117_vm12, %vm9116_vm13  ;;  %v2316_v57 = vld [vmem:[%s8422_s1 + $0x18] sm:$0xff]  ;;  %vm9121_vm13 = vcmp.eq.s32.totalorder %v6368_v53, %v6352_v2  ;;  %vm9122_vm12 = vcmp.eq.s32.totalorder %v6386_v6, %v6352_v2  ;;  %v2433_v34 = vsub.f32 %v7349_v9, %v7432_v48 }
  0xf3   : > { %v9119_v63 = vsel %vm7488_vm9, 4294967295, %v9118_v63  ;;  %vm7512_vm4 = vmpackc.low %vm9122_vm12, %vm9121_vm13  ;;  %vm9127_vm7 = vcmp.eq.s32.totalorder %v6430_v10, %v6340_v47  ;;  %vm9128_vm13 = vcmp.eq.s32.totalorder %v6455_v15, %v6340_v47  ;;  %v9129_v6 = vmov 0  ;;  %5032 = vmatpush1.bf16.msk.msra.mxu0 %vm7488_vm9, %v8886_v16 }
  0xf4   : > { %9120 = vst [vmem:[#allocation81_spill] sm:$0xff] %v9119_v63  ;;  %v9124_v3 = vsel %vm7512_vm4, 4294967295, %v9123_v3  ;;  %vm7530_vm12 = vmpackc.low %vm9128_vm13, %vm9127_vm7  ;;  %v2545_v53 = vand.u32 4294901760, %v2544_v45  ;;  %v9132_v14 = vand.u32 4294901760, %v6859_v56  ;;  %v7540_v40 = vsub.f32 %v9108_v43, %v7455_v32  ;;  %5176 = vmatpush1.bf16.msk.msra.mxu1 %vm7512_vm4, %v8886_v16 }
  0xf5   : > { %9125 = vst [vmem:[#allocation82_spill] sm:$0xff] %v9124_v3  ;;  %v9130_v6 = vsel %vm7530_vm12, 4294967295, %v9129_v6  ;;  %vm9134_vm6 = vcmp.eq.s32.totalorder %v6430_v10, %v6343_v21  ;;  %vm9135_vm7 = vcmp.eq.s32.totalorder %v6455_v15, %v6343_v21  ;;  %v9136_v47 = vmov 0  ;;  %5034 = vmatprep.subr.msk.bf16.mxu0 %vm7530_vm12, %v8886_v16 }
  0xf6   : > { %9131 = vst [vmem:[#allocation63_spill] sm:$0xff] %v9130_v6  ;;  %v3442_v37 = vsub.f32 %v6859_v56, %v9132_v14  ;;  %9133 = vst [vmem:[#allocation83_spill] sm:$0xff] %v7540_v40  ;;  %v2557_v45 = vand.u32 4294901760, %v2556_v29  ;;  %vm9139_vm14 = vcmask 785408   ;;  %v9140_v48 = vand.u32 4294901760, %v6866_v50 }
  0xf7   : > { %vm7549_vm13 = vmpackc.low %vm9135_vm7, %vm9134_vm6  ;;  %v2328_v49 = vsel %vm9139_vm14, %v2316_v57, 0  ;;  %v9141_v39 = vand.u32 4294901760, %v6868_v30  ;;  %v9142_v29 = vand.u32 4294901760, %v6878_v8  ;;  %vm9144_vm14 = vcmp.eq.s32.totalorder %v6430_v10, %v6349_v17 }
  0xf8   : > { %v9137_v47 = vsel %vm7549_vm13, 4294967295, %v9136_v47  ;;  %v3454_v21 = vsub.f32 %v6866_v50, %v9140_v48  ;;  %v7569_v28 = vand.u32 4294901760, %v2328_v49  ;;  %vm9145_vm6 = vcmp.eq.s32.totalorder %v6455_v15, %v6349_v17  ;;  %5178 = vmatprep.subr.msk.bf16.mxu1 %vm7549_vm13, %v8886_v16 }
  0xf9   : > { %9138 = vst [vmem:[#allocation84_spill] sm:$0xff] %v9137_v47  ;;  %v2562_v27 = vsub.f32 %v6868_v30, %v9141_v39  ;;  %v2574_v14 = vsub.f32 %v6878_v8, %v9142_v29  ;;  %vm7583_vm7 = vmpackc.low %vm9145_vm6, %vm9144_vm14  ;;  %v9146_v48 = vmov 0  ;;  %v9149_v39 = vsub.f32 %v7014_v35, %v7063_v44  ;;  %v9166_v35 = vld [vmem:[#allocation66_spill] sm:$0xff] }
  0xfa   : > { %9143 = vst [vmem:[#allocation85_spill] sm:$0xff] %v7569_v28  ;;  %v9147_v48 = vsel %vm7583_vm7, 4294967295, %v9146_v48  ;;  %v9150_v29 = vand.u32 4294901760, %v6932_v11  ;;  %v9151_v6 = vand.u32 4294901760, %v9126_v19  ;;  %v9152_v63 = vand.u32 4294901760, %v6948_v22  ;;  %5036 = vmatpush1.bf16.msk.msra.mxu0 %vm7583_vm7, %v8886_v16 }
  0xfb   : > { %9148 = vst [vmem:[#allocation86_spill] sm:$0xff] %v9147_v48  ;;  %v2423_v57 = vand.u32 4294901760, %v9149_v39  ;;  %vm9153_vm14 = vcmp.eq.s32.totalorder %v6430_v10, %v6352_v2  ;;  %vm9154_vm6 = vcmp.eq.s32.totalorder %v6455_v15, %v6352_v2  ;;  %v9155_v39 = vmov 0  ;;  %5038 = vmatprep.subr.bf16.mxu0 %v7103_v58 }
  0xfc   : > { %v3460_v43 = vsub.f32 %v6932_v11, %v9150_v29  ;;  %v3472_v3 = vsub.f32 %v9126_v19, %v9151_v6  ;;  %v2568_v17 = vsub.f32 %v6948_v22, %v9152_v63  ;;  %vm7608_vm12 = vmpackc.low %vm9154_vm6, %vm9153_vm14  ;;  %v7612_v29 = vpack.c.bf16 %v3449_v52, %v3437_v24 }
  0xfd   : > { %v9156_v39 = vsel %vm7608_vm12, 4294967295, %v9155_v39  ;;  %v2434_v6 = vand.u32 4294901760, %v2433_v34  ;;  %v7615_v44 = vand.u32 4294901760, %v7540_v40  ;;  %v9159_v63 = vand.u32 4294901760, %v6950_v18  ;;  %5180 = vmatpush1.bf16.msk.msra.mxu1 %vm7608_vm12, %v8886_v16  ;;  %2424 = vmatmul.mubr.f32.vlgmr.msra.gmra.mrb[8].mxu0 %v2423_v57 }
  0xfe   : > { %9157 = vst [vmem:[#allocation87_spill] sm:$0xff] %v9156_v39  ;;  %v3443_v36 = vand.u32 4294901760, %v3442_v37  ;;  %v9160_v10 = vand.u32 4294901760, %v6952_v25  ;;  %v9161_v2 = vand.u32 4294901760, %v6959_v23  ;;  %v7627_v24 = vsub.f32 %v2328_v49, %v7569_v28  ;;  %5182 = vmatprep.subr.bf16.mxu1 %v9163_v38  ;;  %5040 = vmatpush1.bf16.msra.mxu0 %v7144_v42 }
  0xff   : > { %9158 = vst [vmem:[#allocation88_spill] sm:$0xff] %v7615_v44  ;;  %v2580_v47 = vsub.f32 %v6950_v18, %v9159_v63  ;;  %v7632_v52 = vpack.c.bf16 %v2557_v45, %v2545_v53  ;;  %v3455_v34 = vand.u32 4294901760, %v3454_v21  ;;  %v2563_v63 = vand.u32 4294901760, %v2562_v27  ;;  %v9164_v21 = vld [vmem:[#allocation64_spill] sm:$0xff]  ;;  %5042 = vmatprep.subr.bf16.mxu0 %v7208_v13  ;;  %2429 = vmatprep.mubr.f32.mxu0 %v8840_v0 }
 0x100   : > { %v3466_v59 = vsub.f32 %v6952_v25, %v9160_v10  ;;  %v3478_v15 = vsub.f32 %v6959_v23, %v9161_v2  ;;  %9162 = vst [vmem:[#allocation89_spill] sm:$0xff] %v7627_v24  ;;  %v2575_v37 = vand.u32 4294901760, %v2574_v14  ;;  %v3461_v10 = vand.u32 4294901760, %v3460_v43  ;;  %v9165_v14 = vld [vmem:[#allocation65_spill] sm:$0xff]  ;;  %3322 = vmatmul.mubr.f32.vlgmr.msra.gmra.mrb[8].mxu1 %v2423_v57  ;;  %v9168_v43 = vld [vmem:[#allocation26_spill] sm:$0xff]  ;;  %v9170_v27 = vld [vmem:[#allocation40_spill] sm:$0xff] }
 0x101   : > { %v3473_v2 = vand.u32 4294901760, %v3472_v3  ;;  %v2569_v41 = vand.u32 4294901760, %v2568_v17  ;;  %v2444_v53 = vsub.f32 %v7540_v40, %v7615_v44  ;;  %v2581_v45 = vand.u32 4294901760, %v2580_v47  ;;  %v9169_v47 = vld [vmem:[#allocation27_spill] sm:$0xff]  ;;  %5184 = vmatpush1.bf16.msra.mxu1 %v7146_v62  ;;  %3327 = vmatprep.mubr.f32.mxu1 %v8840_v0 }
 0x102   : > { %v8737_v48 = vand.u32 4294901760, %v9165_v14  ;;  %v3467_v39 = vand.u32 4294901760, %v3466_v59  ;;  %v3479_v9 = vand.u32 4294901760, %v3478_v15  ;;  %v7646_v3 = vand.u32 4294901760, %v7627_v24  ;;  %5186 = vmatprep.subr.bf16.mxu1 %v7407_v33  ;;  %2435 = vmatmul.mubr.f32.gmra.mrb[10].mxu0 %v2434_v6 }
 0x103   : > { %v7649_v38 = vpack.c.bf16 %v3455_v34, %v3443_v36  ;;  %v8735_v17 = vand.u32 4294901760, %v9168_v43  ;;  %v8734_v49 = vand.u32 4294901760, %v9169_v47  ;;  %v8736_v44 = vand.u32 4294901760, %v9170_v27  ;;  %v9172_v36 = vld [vmem:[#allocation29_spill] sm:$0xff]  ;;  %5044 = vmatpush1.bf16.msra.mxu0 %v7409_v61  ;;  %2440 = vmatprep.mubr.f32.mxu0 %v8840_v0 }
 0x104   : > { %9167 = vst [vmem:[#allocation31_spill] sm:$0xff] %v7646_v3  ;;  %v7656_v59 = vpack.c.bf16 %v2575_v37, %v2563_v63  ;;  %v7658_v15 = vpack.c.bf16 %v3473_v2, %v3461_v10  ;;  %v9171_v58 = vand.u32 4294901760, %v6961_v20  ;;  %v8740_v57 = vand.u32 4294901760, %v9172_v36  ;;  %3333 = vmatmul.mubr.f32.gmra.mrb[10].mxu1 %v2434_v6  ;;  %5046 = vmatprep.subr.bf16.mxu0 %v7427_v31 }
 0x105   : > { %v7668_v34 = vpack.c.bf16 %v2581_v45, %v2569_v41  ;;  %v9173_v62 = vand.u32 4294901760, %v9164_v21  ;;  %v7678_v63 = vsub.f32 %v9165_v14, %v8737_v48  ;;  %v2445_v37 = vand.u32 4294901760, %v2444_v53  ;;  %5188 = vmatpush1.bf16.msra.mxu1 %v7425_v60  ;;  %v9175_v53 = vld [vmem:[#allocation20_spill] sm:$0xff]  ;;  %v9182_v48 = vld [vmem:[#allocation23_spill] sm:$0xff]  ;;  %3338 = vmatprep.mubr.f32.mxu1 %v8840_v0 }
 0x106   : > { %v7663_v42 = vsub.f32 %v6961_v20, %v9171_v58  ;;  %v7681_v10 = vpack.c.bf16 %v3479_v9, %v3467_v39  ;;  %v9174_v33 = vand.u32 4294901760, %v9166_v35  ;;  %v2455_v2 = vsub.f32 %v7627_v24, %v7646_v3  ;;  %5190 = vmatprep.subr.bf16.mxu1 %v7429_v12  ;;  %v9187_v24 = vld [vmem:[#allocation45_spill] sm:$0xff] }
 0x107   : > { %v7673_v13 = vsub.f32 %v9164_v21, %v9173_v62  ;;  %v7694_v45 = vsub.f32 %v9168_v43, %v8735_v17  ;;  %v7699_v9 = vsub.f32 %v9169_v47, %v8734_v49  ;;  %v7704_v39 = vsub.f32 %v9170_v27, %v8736_v44  ;;  %v9177_v62 = vld [vmem:[#allocation36_spill] sm:$0xff]  ;;  %v9180_v17 = vld [vmem:[#allocation22_spill] sm:$0xff]  ;;  %2446 = vmatmul.mubr.f32.gmra.mrb[12].mxu0 %v2445_v37 }
 0x108   : > { %v7686_v41 = vsub.f32 %v9166_v35, %v9174_v33  ;;  %v2587_v61 = vand.u32 4294901760, %v7663_v42  ;;  %v7712_v6 = vsub.f32 %v9172_v36, %v8740_v57  ;;  %v9176_v58 = vand.u32 4294901760, %v9175_v53  ;;  %v9185_v42 = vld [vmem:[#allocation24_spill] sm:$0xff]  ;;  %5048 = vmatpush1.bf16.msra.mxu0 %v7448_v5  ;;  %3344 = vmatmul.mubr.f32.gmra.mrb[12].mxu1 %v2445_v37 }
 0x109   : > { %v9178_v33 = vand.u32 4294901760, %v9177_v62  ;;  %v9181_v44 = vand.u32 4294901760, %v9180_v17  ;;  %v9183_v3 = vand.u32 4294901760, %v9182_v48  ;;  %v2599_v31 = vand.u32 4294901760, %v7673_v13  ;;  %5192 = vmatpush1.bf16.msra.mxu1 %v7471_v26  ;;  %5050 = vmatprep.subr.bf16.mxu0 %v7492_v46 }
 0x10a   : > { %v9186_v57 = vand.u32 4294901760, %v9185_v42  ;;  %v9188_v40 = vand.u32 4294901760, %v9187_v24  ;;  %v2456_v13 = vand.u32 4294901760, %v2455_v2  ;;  %v9200_v42 = vld [vmem:[#allocation48_spill] sm:$0xff]  ;;  %v3485_v2 = vand.u32 4294901760, %v7678_v63  ;;  %5194 = vmatprep.subr.bf16.mxu1 %v7612_v29  ;;  %2451 = vmatprep.mubr.f32.mxu0 %v8840_v0 }
 0x10b   : > { %v7718_v49 = vpack.c.bf16 %v9178_v33, %v9176_v58  ;;  %v7724_v60 = vpack.c.bf16 %v9183_v3, %v9181_v44  ;;  %v9190_v58 = vld [vmem:[#allocation38_spill] sm:$0xff]  ;;  %v9201_v24 = vand.u32 4294901760, %v9200_v42  ;;  %v3497_v63 = vand.u32 4294901760, %v7686_v41  ;;  %3349 = vmatprep.mubr.f32.mxu1 %v8840_v0 }
 0x10c   : > { %v7733_v16 = vpack.c.bf16 %v9188_v40, %v9186_v57  ;;  %v9191_v33 = vand.u32 4294901760, %v9190_v58  ;;  %v9195_v44 = vld [vmem:[#allocation46_spill] sm:$0xff]  ;;  %v9202_v40 = vld [vmem:[#allocation49_spill] sm:$0xff]  ;;  %v2593_v46 = vand.u32 4294901760, %v7694_v45  ;;  %v9240_v41 = vand.u32 4294901760, %v6857_v4  ;;  %2457 = vmatmul.mubr.f32.gmra.mrb[14].mxu0 %v2456_v13  ;;  %3355 = vmatmul.mubr.f32.gmra.mrb[14].mxu1 %v2456_v13 }
 0x10d   : > { %9179 = vst [vmem:[#allocation64_spill] sm:$0xff] %v7718_v49  ;;  %9184 = vst [vmem:[#allocation65_spill] sm:$0xff] %v7724_v60  ;;  %v9192_v49 = vld [vmem:[#allocation25_spill] sm:$0xff]  ;;  %v9196_v3 = vand.u32 4294901760, %v9195_v44  ;;  %v9197_v60 = vld [vmem:[#allocation47_spill] sm:$0xff]  ;;  %v9203_v57 = vand.u32 4294901760, %v9202_v40  ;;  %5052 = vmatpush1.bf16.msra.mxu0 %v7632_v52  ;;  %5196 = vmatpush1.bf16.msra.mxu1 %v7649_v38  ;;  %v5057_v52 = vpack.c.bf16 %v2599_v31, %v2587_v61 }
 0x10e   : > { %9189 = vst [vmem:[#allocation66_spill] sm:$0xff] %v7733_v16  ;;  %v9193_v28 = vand.u32 4294901760, %v9192_v49  ;;  %v9198_v12 = vand.u32 4294901760, %v9197_v60  ;;  %v9205_v49 = vand.u32 4294901760, %v8966_v54  ;;  %v9213_v40 = vld [vmem:[#allocation54_spill] sm:$0xff]  ;;  %v9246_v29 = vand.u32 4294901760, %v6878_v8  ;;  %5054 = vmatprep.subr.bf16.mxu0 %v7656_v59  ;;  %5198 = vmatprep.subr.bf16.mxu1 %v7658_v15 }
 0x10f   : > { %v7752_v16 = vpack.c.bf16 %v9203_v57, %v9201_v24  ;;  %v9214_v24 = vand.u32 4294901760, %v9213_v40  ;;  %v9215_v57 = vld [vmem:[#allocation55_spill] sm:$0xff]  ;;  %v2605_v45 = vand.u32 4294901760, %v7699_v9  ;;  %v9256_v9 = vand.u32 4294901760, %v6961_v20  ;;  %2647 = vmatprep.mubr.f32.mxu0 %v8840_v0  ;;  %3545 = vmatprep.mubr.f32.mxu1 %v8840_v0  ;;  %v4128_v61 = vld [vmem:[%s8423_s2 + $0x10] sm:$0xff] }
 0x110   : > { %v7739_v32 = vpack.c.bf16 %v9193_v28, %v9191_v33  ;;  %v7745_v48 = vpack.c.bf16 %v9198_v12, %v9196_v3  ;;  %v9206_v28 = vand.u32 4294901760, %v8982_v1  ;;  %v9210_v3 = vld [vmem:[#allocation53_spill] sm:$0xff]  ;;  %v3491_v13 = vand.u32 4294901760, %v7704_v39  ;;  %v4127_v31 = vld [vmem:[%s8423_s2 + $0x8] sm:$0xff] }
 0x111   : > { %9204 = vst [vmem:[#allocation40_spill] sm:$0xff] %v7752_v16  ;;  %v9211_v12 = vand.u32 4294901760, %v9210_v3  ;;  %v9216_v16 = vand.u32 4294901760, %v9215_v57  ;;  %v9218_v1 = vld [vmem:[#allocation37_spill] sm:$0xff]  ;;  %v5201_v38 = vpack.c.bf16 %v3497_v63, %v3485_v2  ;;  %v5614_v59 = vmov 0   ;;  %5056 = vmatpush1.bf16.msra.mxu0 %v7668_v34  ;;  %5200 = vmatpush1.bf16.msra.mxu1 %v7681_v10  ;;  %v9264_v34 = vld [vmem:[#allocation23_spill] sm:$0xff] }
 0x112   : > { %9194 = vst [vmem:[#allocation26_spill] sm:$0xff] %v7739_v32  ;;  %9199 = vst [vmem:[#allocation27_spill] sm:$0xff] %v7745_v48  ;;  %v7758_v33 = vpack.c.bf16 %v9206_v28, %v9205_v49  ;;  %v9208_v32 = vld [vmem:[#allocation52_spill] sm:$0xff]  ;;  %v9219_v49 = vand.u32 4294901760, %v9218_v1  ;;  %5511 = vset.pattern.permute.xlu0 %v5614_v59  ;;  %v5059_v39 = vpack.c.bf16 %v2605_v45, %v2593_v46  ;;  %5058 = vmatprep.subr.bf16.mxu0 %v5057_v52  ;;  %v9266_v46 = vld [vmem:[#allocation45_spill] sm:$0xff] }
 0x113   : > { %v9209_v60 = vand.u32 4294901760, %v9208_v32  ;;  %v7772_v54 = vpack.c.bf16 %v9216_v16, %v9214_v24  ;;  %v9220_v28 = vld [vmem:[#allocation56_spill] sm:$0xff]  ;;  %v9227_v16 = vld [vmem:[#allocation59_spill] sm:$0xff]  ;;  %v5061_v15 = vpack.c.bf16 %v9177_v62, %v9175_v53  ;;  %5202 = vmatprep.subr.bf16.mxu1 %v5201_v38  ;;  %v5205_v2 = vpack.c.bf16 %v9264_v34, %v9180_v17  ;;  %5512 = vset.pattern.permute.xlu1 %v5614_v59  ;;  %v9267_v10 = vld [vmem:[#allocation25_spill] sm:$0xff] }
 0x114   : > { %9207 = vst [vmem:[#allocation29_spill] sm:$0xff] %v7758_v33  ;;  %v9221_v33 = vand.u32 4294901760, %v9220_v28  ;;  %v9228_v37 = vand.u32 4294901760, %v9227_v16  ;;  %v9229_v24 = vld [vmem:[#allocation60_spill] sm:$0xff]  ;;  %4146 = vperm.xlu1 %5512, %v4128_v61   ;;  %v5207_v53 = vpack.c.bf16 %v9267_v10, %v9190_v58  ;;  %v9268_v62 = vld [vmem:[#allocation47_spill] sm:$0xff]  ;;  %v9269_v52 = vld [vmem:[#allocation49_spill] sm:$0xff] }
 0x115   : > { %v7764_v48 = vpack.c.bf16 %v9211_v12, %v9209_v60  ;;  %9217 = vst [vmem:[#allocation36_spill] sm:$0xff] %v7772_v54  ;;  %v9223_v60 = vand.u32 4294901760, %v6763_v7  ;;  %v9224_v12 = vld [vmem:[#allocation58_spill] sm:$0xff]  ;;  %v9230_v54 = vand.u32 4294901760, %v9229_v24  ;;  %5060 = vmatpush1.bf16.msra.mxu0 %v5059_v39  ;;  %v9265_v63 = vld [vmem:[#allocation24_spill] sm:$0xff]  ;;  %v9274_v38 = vld [vmem:[#allocation37_spill] sm:$0xff] }
 0x116   : > { %v7778_v32 = vpack.c.bf16 %v9221_v33, %v9219_v49  ;;  %v9231_v33 = vld [vmem:[#allocation61_spill] sm:$0xff]  ;;  %v5063_v45 = vpack.c.bf16 %v9266_v46, %v9265_v63  ;;  %5062 = vmatprep.subr.bf16.mxu0 %v5061_v15  ;;  %v9270_v17 = vld [vmem:[#allocation42_spill] sm:$0xff]  ;;  %v9275_v59 = vld [vmem:[#allocation56_spill] sm:$0xff] }
 0x117   : > { %9212 = vst [vmem:[#allocation20_spill] sm:$0xff] %v7764_v48  ;;  %v9225_v48 = vand.u32 4294901760, %v9224_v12  ;;  %v7793_v1 = vpack.c.bf16 %v9230_v54, %v9228_v37  ;;  %v9232_v49 = vand.u32 4294901760, %v9231_v33  ;;  %v9239_v54 = vand.u32 4294901760, %v6849_v55  ;;  %v9276_v39 = vld [vmem:[#allocation21_spill] sm:$0xff]  ;;  %v9278_v15 = vld [vmem:[#allocation44_spill] sm:$0xff] }
 0x118   : > { %9222 = vst [vmem:[#allocation22_spill] sm:$0xff] %v7778_v32  ;;  %v9233_v32 = vld [vmem:[#allocation39_spill] sm:$0xff]  ;;  %2649 = vmatmul.mubr.f32.vlgmr.msra.gmra.mrb[8].mxu0 %v9270_v17  ;;  %v9277_v61 = vld [vmem:[#allocation57_spill] sm:$0xff]  ;;  %v9304_v63 = vld [vmem:[#allocation76_spill] sm:$0xff] }
 0x119   : > { %v7784_v5 = vpack.c.bf16 %v9225_v48, %v9223_v60  ;;  %v9234_v7 = vand.u32 4294901760, %v9233_v32  ;;  %v9236_v48 = vand.u32 4294901760, %v6845_v51  ;;  %v9237_v60 = vld [vmem:[#allocation62_spill] sm:$0xff]  ;;  %v7814_v37 = vpack.c.bf16 %v9240_v41, %v9239_v54  ;;  %5064 = vmatpush1.bf16.msra.mxu0 %v5063_v45  ;;  %2654 = vmatprep.mubr.f32.mxu0 %v8840_v0  ;;  %v9301_v34 = vld [vmem:[#allocation75_spill] sm:$0xff]  ;;  %v4129_v46 = vld [vmem:[%s8423_s2 + $0x18] sm:$0xff] }
 0x11a   : > { %v9238_v26 = vand.u32 4294901760, %v9237_v60  ;;  %v9248_v54 = vand.u32 4294901760, %v6932_v11  ;;  %v9249_v41 = vand.u32 4294901760, %v9126_v19  ;;  %v9306_v45 = vld [vmem:[#allocation77_spill] sm:$0xff]  ;;  %v9308_v10 = vld [vmem:[#allocation79_spill] sm:$0xff]  ;;  %4151 = vperm.xlu1 %5512, %v4129_v46  }
 0x11b   : > { %9226 = vst [vmem:[#allocation38_spill] sm:$0xff] %v7784_v5  ;;  %v7799_v28 = vpack.c.bf16 %v9234_v7, %v9232_v49  ;;  %9241 = vst [vmem:[#allocation48_spill] sm:$0xff] %v7814_v37  ;;  %v9242_v7 = vand.u32 4294901760, %v6859_v56  ;;  %v9243_v49 = vand.u32 4294901760, %v6866_v50 }
 0x11c   : > { %v7805_v5 = vpack.c.bf16 %v9238_v26, %v9236_v48  ;;  %v9245_v48 = vand.u32 4294901760, %v6868_v30  ;;  %v7834_v37 = vpack.c.bf16 %v9249_v41, %v9248_v54  ;;  %v9257_v54 = vand.u32 4294901760, %v9164_v21  ;;  %2656 = vmatmul.mubr.f32.gmra.mrb[10].mxu0 %v9276_v39 }
 0x11d   : > { %9235 = vst [vmem:[#allocation46_spill] sm:$0xff] %v7799_v28  ;;  %v7820_v28 = vpack.c.bf16 %v9243_v49, %v9242_v7  ;;  %v9251_v7 = vand.u32 4294901760, %v6948_v22  ;;  %v9252_v49 = vand.u32 4294901760, %v6950_v18  ;;  %2661 = vmatprep.mubr.f32.mxu0 %v8840_v0 }
 0x11e   : > { %v7826_v26 = vpack.c.bf16 %v9246_v29, %v9245_v48  ;;  %9250 = vst [vmem:[#allocation55_spill] sm:$0xff] %v7834_v37  ;;  %v9254_v48 = vand.u32 4294901760, %v6952_v25  ;;  %v9255_v29 = vand.u32 4294901760, %v6959_v23  ;;  %v7853_v41 = vpack.c.bf16 %v9257_v54, %v9256_v9 }
 0x11f   : > { %9244 = vst [vmem:[#allocation53_spill] sm:$0xff] %v7820_v28  ;;  %v7840_v28 = vpack.c.bf16 %v9252_v49, %v9251_v7  ;;  %v9258_v37 = vand.u32 4294901760, %v9165_v14  ;;  %v9259_v7 = vand.u32 4294901760, %v9166_v35  ;;  %v3503_v9 = vand.u32 4294901760, %v7712_v6 }
 0x120   : > { %9247 = vst [vmem:[#allocation54_spill] sm:$0xff] %v7826_v26  ;;  %v7846_v26 = vpack.c.bf16 %v9255_v29, %v9254_v48  ;;  %v9261_v48 = vand.u32 4294901760, %v9169_v47  ;;  %v9262_v54 = vand.u32 4294901760, %v9170_v27  ;;  %2663 = vmatmul.mubr.f32.gmra.mrb[12].mxu0 %v9278_v15 }
 0x121   : > { %9253 = vst [vmem:[#allocation58_spill] sm:$0xff] %v7840_v28  ;;  %v7859_v49 = vpack.c.bf16 %v9259_v7, %v9258_v37  ;;  %v9260_v28 = vand.u32 4294901760, %v9168_v43  ;;  %v9263_v37 = vand.u32 4294901760, %v9172_v36  ;;  %v5203_v6 = vpack.c.bf16 %v3503_v9, %v3491_v13  ;;  %v9271_v9 = vld [vmem:[#allocation50_spill] sm:$0xff]  ;;  %2668 = vmatprep.mubr.f32.mxu0 %v8840_v0 }
 0x122   : > { %v5209_v13 = vpack.c.bf16 %v9269_v52, %v9200_v42  ;;  %v5213_v42 = vpack.c.bf16 %v9275_v59, %v9274_v38  ;;  %v4131_v52 = vld [vmem:[%s8423_s2 + $0x28] sm:$0xff]  ;;  %v9319_v38 = vld [vmem:[#allocation64_spill] sm:$0xff]  ;;  %v9320_v59 = vld [vmem:[#allocation65_spill] sm:$0xff] }
 0x123   : > { %v7865_v29 = vpack.c.bf16 %v9261_v48, %v9260_v28  ;;  %v7875_v7 = vpack.c.bf16 %v9263_v37, %v9262_v54  ;;  %v4126_v28 = vld [vmem:[%s8423_s2] sm:$0xff]  ;;  %5204 = vmatpush1.bf16.msra.mxu1 %v5203_v6  ;;  %v5065_v48 = vpack.c.bf16 %v9268_v62, %v9195_v44  ;;  %v9272_v54 = vld [vmem:[#allocation51_spill] sm:$0xff]  ;;  %v5069_v44 = vpack.c.bf16 %v9215_v57, %v9213_v40  ;;  %v9310_v62 = vld [vmem:[#allocation80_spill] sm:$0xff] }
 0x124   : > { %4136 = vperm.xlu0 %5511, %v4126_v28   ;;  %5206 = vmatprep.subr.bf16.mxu1 %v5205_v2  ;;  %v5067_v37 = vpack.c.bf16 %v9272_v54, %v9271_v9  ;;  %v9273_v28 = vld [vmem:[#allocation52_spill] sm:$0xff]  ;;  %v5071_v6 = vpack.c.bf16 %v9224_v12, %v9277_v61  ;;  %v5215_v40 = vpack.c.bf16 %v9229_v24, %v9227_v16  ;;  %v9279_v24 = vld [vmem:[#allocation85_spill] sm:$0xff]  ;;  %v9314_v9 = vld [vmem:[#allocation63_spill] sm:$0xff] }
 0x125   : > { %5066 = vmatprep.subr.bf16.mxu0 %v5065_v48  ;;  %v5211_v58 = vpack.c.bf16 %v9210_v3, %v9273_v28  ;;  %v5073_v3 = vpack.c.bf16 %v9233_v32, %v9231_v33  ;;  %v5217_v57 = vpack.c.bf16 %v9237_v60, %v6845_v51  ;;  %v5075_v12 = vpack.c.bf16 %v6857_v4, %v6849_v55  ;;  %v9295_v33 = vld [vmem:[#allocation72_spill] sm:$0xff]  ;;  %v9297_v60 = vld [vmem:[#allocation73_spill] sm:$0xff]  ;;  %v9322_v61 = vld [vmem:[#allocation66_spill] sm:$0xff] }
 0x126   : > { %3547 = vmatmul.mubr.f32.vlgmr.msra.gmra.mrb[8].mxu1 %v9270_v17  ;;  %5068 = vmatpush1.bf16.msra.mxu0 %v5067_v37  ;;  %v5219_v32 = vpack.c.bf16 %v6866_v50, %v6859_v56  ;;  %v5077_v51 = vpack.c.bf16 %v6878_v8, %v6868_v30  ;;  %v5221_v16 = vpack.c.bf16 %v9126_v19, %v6932_v11  ;;  %v9280_v8 = vmov 1.0|1.0   ;;  %v9303_v2 = vld [vmem:[#allocation89_spill] sm:$0xff]  ;;  %v4132_v54 = vld [vmem:[%s8423_s2 + $0x30] sm:$0xff]  ;;  %v310_v19 = vld [vmem:[%s5763_s19] sm:$0xf] }
 0x127   : > { %5208 = vmatpush1.bf16.msra.mxu1 %v5207_v53  ;;  %3552 = vmatprep.mubr.f32.mxu1 %v8840_v0  ;;  %v5079_v4 = vpack.c.bf16 %v6950_v18, %v6948_v22  ;;  %v5223_v56 = vpack.c.bf16 %v6959_v23, %v6952_v25  ;;  %v5081_v55 = vpack.c.bf16 %v9164_v21, %v6961_v20  ;;  %v9283_v22 = vld [vmem:[#allocation67_spill] sm:$0xff]  ;;  %v4130_v53 = vld [vmem:[%s8423_s2 + $0x20] sm:$0xff]  ;;  %s4820_s19 = sshll.u32 %s5673_s25, 6  ;;  %s5543_s25 = scalar_lea.vmem %s8379_s7, 64 }
 0x128   : > { %4141 = vperm.xlu0 %5511, %v4127_v31   ;;  %5210 = vmatprep.subr.bf16.mxu1 %v5209_v13  ;;  %v5225_v50 = vpack.c.bf16 %v9166_v35, %v9165_v14  ;;  %v5083_v30 = vpack.c.bf16 %v9169_v47, %v9168_v43  ;;  %v5227_v23 = vpack.c.bf16 %v9172_v36, %v9170_v27  ;;  %v9288_v21 = vld [vmem:[#allocation43_spill] sm:$0xff]  ;;  %v9290_v14 = vld [vmem:[#allocation69_spill] sm:$0xff]  ;;  %v9291_v43 = vld [vmem:[#allocation70_spill] sm:$0xff]  ;;  %s8377_s11 = scalar_lea.hbm %s8427_s6, %s4820_s19  ;;  %p5544_p6 = scmp.ne.s32.totalorder %s8379_s7, %s5543_s25 }
 0x129   : > { %5070 = vmatprep.subr.bf16.mxu0 %v5069_v44  ;;  %2670 = vmatmul.mubr.f32.gmra.mrb[14].mxu0 %v9279_v24  ;;  %v9292_v47 = vld [vmem:[#allocation71_spill] sm:$0xff]  ;;  %vm9296_vm6 = vnez %v9295_v33  ;;  %v9299_v31 = vld [vmem:[#allocation74_spill] sm:$0xff]  ;;  %p5551_p2 = scmp.lt.s32.totalorder %s5549_s17, %s5543_s25 }
 0x12a   : > { %3554 = vmatmul.mubr.f32.gmra.mrb[10].mxu1 %v9276_v39  ;;  %5072 = vmatpush1.bf16.msra.mxu0 %v5071_v6  ;;  %vm9293_vm14 = vnez %v9292_v47  ;;  %v9294_v36 = vld [vmem:[#allocation83_spill] sm:$0xff]  ;;  %v9323_v6 = vld [vmem:[#allocation26_spill] sm:$0xff]  ;;  %p5545_p13 = pnand %p5544_p6, %p9361_p12 }
 0x12b   : > { %5212 = vmatpush1.bf16.msra.mxu1 %v5211_v58  ;;  %3559 = vmatprep.mubr.f32.mxu1 %v8840_v0  ;;  %v4133_v58 = vld [vmem:[%s8423_s2 + $0x38] sm:$0xff]  ;;  %v9348_v27 = vld [vmem:[#allocation11_spill] sm:$0xff]  ;;  %p5552_p4 = por %p5551_p2, %p5550_p10 }
 0x12c   : > { %5214 = vmatprep.subr.bf16.mxu1 %v5213_v42  ;;  %5074 = vmatprep.subr.bf16.mxu0 %v5073_v3  ;;  %v9321_v42 = vld [vmem:[#allocation28_spill] sm:$0xff]  ;;  %p5546_p7 = pneg %p5545_p13 }
 0x12d   : > { %2788 = vmatprep.mubr.f32.mxu0 %v8840_v0  ;;  %4156 = vperm.xlu0 %5511, %v4130_v53   ;;  %v9325_v3 = vld [vmem:[#allocation40_spill] sm:$0xff] }
 0x12e   : > { %3561 = vmatmul.mubr.f32.gmra.mrb[12].mxu1 %v9278_v15  ;;  %5076 = vmatpush1.bf16.msra.mxu0 %v5075_v12  ;;  %v9327_v12 = vld [vmem:[#allocation29_spill] sm:$0xff]  ;;  %p5553_p5 = pnand %p5552_p4, %p5546_p7 }
 0x12f   : > { %5216 = vmatpush1.bf16.msra.mxu1 %v5215_v40  ;;  %3566 = vmatprep.mubr.f32.mxu1 %v8840_v0  ;;  %v9324_v40 = vld [vmem:[#allocation27_spill] sm:$0xff] }
 0x130   : > { %5218 = vmatprep.subr.bf16.mxu1 %v5217_v57  ;;  %5078 = vmatprep.subr.bf16.mxu0 %v5077_v51  ;;  %v9326_v57 = vld [vmem:[#allocation78_spill] sm:$0xff]  ;;  %v9329_v51 = vld [vmem:[#allocation36_spill] sm:$0xff] }
 0x131   : > { %4161 = vperm.xlu1 %5512, %v4131_v52   ;;  %4166 = vperm.xlu0 %5511, %v4132_v54  }
 0x132   : > { %3568 = vmatmul.mubr.f32.gmra.mrb[14].mxu1 %v9279_v24  ;;  %5080 = vmatpush1.bf16.msra.mxu0 %v5079_v4  ;;  %v9331_v4 = vld [vmem:[#allocation88_spill] sm:$0xff] }
 0x133   : > { %5220 = vmatpush1.bf16.msra.mxu1 %v5219_v32  ;;  %3686 = vmatprep.mubr.f32.mxu1 %v8840_v0  ;;  %v9328_v32 = vld [vmem:[#allocation20_spill] sm:$0xff] }
 0x134   : > { %5222 = vmatprep.subr.bf16.mxu1 %v5221_v16  ;;  %5082 = vmatprep.subr.bf16.mxu0 %v5081_v55  ;;  %v9330_v16 = vld [vmem:[#allocation22_spill] sm:$0xff] }
 0x135   : > { %4171 = vperm.xlu1 %5512, %v4133_v58   ;;  %v9333_v55 = vld [vmem:[#allocation46_spill] sm:$0xff] }
 0x136   : > { %5084 = vmatpush1.bf16.msra.mxu0 %v5083_v30  ;;  %v9335_v30 = vld [vmem:[#allocation48_spill] sm:$0xff] }
 0x137   : > { %5224 = vmatpush1.bf16.msra.mxu1 %v5223_v56  ;;  %5086 = vmatprep.subr.msk.bf16.mxu0 %vm7099_vm1, %v9280_v8  ;;  %v9332_v56 = vld [vmem:[#allocation38_spill] sm:$0xff] }
 0x138   : > { %5226 = vmatprep.subr.bf16.mxu1 %v5225_v50  ;;  %v9334_v50 = vld [vmem:[#allocation31_spill] sm:$0xff] }
 0x139   : > { %2791 = vmatmul.mubr.f32.vlgmr.msra.gmra.mrb[8].mxu0 %v9283_v22 }
 0x13a   : > { %5088 = vmatpush1.bf16.msk.msra.mxu0 %vm7140_vm8, %v9280_v8  ;;  %2796 = vmatprep.mubr.f32.mxu0 %v8840_v0 }
 0x13b   : > { %5228 = vmatpush1.bf16.msra.mxu1 %v5227_v23  ;;  %5090 = vmatprep.subr.msk.bf16.mxu0 %vm7182_vm15, %v9280_v8  ;;  %v9336_v23 = vld [vmem:[#allocation53_spill] sm:$0xff] }
 0x13c   : > { %5230 = vmatprep.subr.msk.bf16.mxu1 %vm7119_vm2, %v9280_v8 }
 0x13d   : > { %2799 = vmatmul.mubr.f32.gmra.mrb[10].mxu0 %v9288_v21 }
 0x13e   : > { %3689 = vmatmul.mubr.f32.vlgmr.msra.gmra.mrb[8].mxu1 %v9283_v22  ;;  %5092 = vmatpush1.bf16.msk.msra.mxu0 %vm7227_vm11, %v9280_v8  ;;  %v9337_v22 = vld [vmem:[#allocation54_spill] sm:$0xff] }
 0x13f   : > { %5232 = vmatpush1.bf16.msk.msra.mxu1 %vm7164_vm3, %v9280_v8  ;;  %3694 = vmatprep.mubr.f32.mxu1 %v8840_v0 }
 0x140   : > { %5234 = vmatprep.subr.msk.bf16.mxu1 %vm7204_vm0, %v9280_v8  ;;  %5094 = vmatprep.subr.msk.bf16.mxu0 %vm7277_vm5, %v9280_v8  ;;  %vm9300_vm5 = vnez %v9299_v31 }
 0x141   : > { %2804 = vmatprep.mubr.f32.mxu0 %v8840_v0 }
 0x142   : > { %3697 = vmatmul.mubr.f32.gmra.mrb[10].mxu1 %v9288_v21  ;;  %2807 = vmatmul.mubr.f32.gmra.mrb[12].mxu0 %v9294_v36  ;;  %v9338_v21 = vld [vmem:[#allocation55_spill] sm:$0xff] }
 0x143   : > { %5236 = vmatpush1.bf16.msk.msra.mxu1 %vm7253_vm10, %v9280_v8  ;;  %3702 = vmatprep.mubr.f32.mxu1 %v8840_v0  ;;  %vm9298_vm10 = vnez %v9297_v60 }
 0x144   : > { %5238 = vmatprep.subr.msk.bf16.mxu1 %vm9293_vm14, %v9280_v8  ;;  %5096 = vmatpush1.bf16.msk.msra.mxu0 %vm9296_vm6, %v9280_v8  ;;  %vm9302_vm14 = vnez %v9301_v34  ;;  %vm9305_vm6 = vnez %v9304_v63 }
 0x145   : > { %5098 = vmatprep.subr.msk.bf16.mxu0 %vm9300_vm5, %v9280_v8  ;;  %2812 = vmatprep.mubr.f32.mxu0 %v8840_v0  ;;  %vm9307_vm5 = vnez %v9306_v45 }
 0x146   : > { %3705 = vmatmul.mubr.f32.gmra.mrb[12].mxu1 %v9294_v36  ;;  %2815 = vmatmul.mubr.f32.gmra.mrb[14].mxu0 %v9303_v2 }
 0x147   : > { %5240 = vmatpush1.bf16.msk.msra.mxu1 %vm9298_vm10, %v9280_v8  ;;  %3710 = vmatprep.mubr.f32.mxu1 %v8840_v0 }
 0x148   : > { %5242 = vmatprep.subr.msk.bf16.mxu1 %vm9302_vm14, %v9280_v8  ;;  %5100 = vmatpush1.bf16.msk.msra.mxu0 %vm9305_vm6, %v9280_v8  ;;  %vm9309_vm14 = vnez %v9308_v10  ;;  %vm9311_vm6 = vnez %v9310_v62  ;;  %v9354_v10 = vld [vmem:[#allocation14_spill] sm:$0xff] }
 0x149   : > { %5102 = vmatprep.subr.msk.bf16.mxu0 %vm9309_vm14, %v9280_v8  ;;  %2909 = vmatprep.mubr.f32.mxu0 %v8840_v0 }
 0x14a   : > { %3713 = vmatmul.mubr.f32.gmra.mrb[14].mxu1 %v9303_v2  ;;  %v9352_v2 = vld [vmem:[#allocation8_spill] sm:$0xff] }
 0x14b   : > { %5244 = vmatpush1.bf16.msk.msra.mxu1 %vm9307_vm5, %v9280_v8  ;;  %3807 = vmatprep.mubr.f32.mxu1 %v8840_v0 }
 0x14c   : > { %5246 = vmatprep.subr.msk.bf16.mxu1 %vm9311_vm6, %v9280_v8  ;;  %5104 = vmatpush1.bf16.msk.msra.mxu0 %vm7488_vm9, %v9280_v8  ;;  %vm9315_vm6 = vnez %v9314_v9 }
 0x14d   : > { %5106 = vmatprep.subr.msk.bf16.mxu0 %vm9315_vm6, %v9280_v8 }
 0x14f   : > { %5248 = vmatpush1.bf16.msk.msra.mxu1 %vm7512_vm4, %v9280_v8 }
 0x150   : > { %5250 = vmatprep.subr.msk.bf16.mxu1 %vm7549_vm13, %v9280_v8  ;;  %5108 = vmatpush1.bf16.msk.msra.mxu0 %vm7583_vm7, %v9280_v8 }
 0x151   : > { %5110 = vmatprep.subr.bf16.mxu0 %v9319_v38  ;;  %v9355_v38 = vld [vmem:[#allocation15_spill] sm:$0xff] }
 0x153   : > { %5252 = vmatpush1.bf16.msk.msra.mxu1 %vm7608_vm12, %v9280_v8  ;;  %2913 = vmatmul.mubr.f32.vlgmr.msra.gmra.mrb[8].mxu0 %v9321_v42 }
 0x154   : > { %5254 = vmatprep.subr.bf16.mxu1 %v9320_v59  ;;  %5112 = vmatpush1.bf16.msra.mxu0 %v9322_v61 }
 0x155   : > { %5114 = vmatprep.subr.bf16.mxu0 %v9324_v40  ;;  %2918 = vmatprep.mubr.f32.mxu0 %v8840_v0 }
 0x156   : > { %3811 = vmatmul.mubr.f32.vlgmr.msra.gmra.mrb[8].mxu1 %v9321_v42 }
 0x157   : > { %5256 = vmatpush1.bf16.msra.mxu1 %v9323_v6  ;;  %3816 = vmatprep.mubr.f32.mxu1 %v8840_v0 }
 0x158   : > { %5258 = vmatprep.subr.bf16.mxu1 %v9325_v3  ;;  %2922 = vmatmul.mubr.f32.gmra.mrb[10].mxu0 %v9326_v57 }
 0x159   : > { %5116 = vmatpush1.bf16.msra.mxu0 %v9327_v12  ;;  %2927 = vmatprep.mubr.f32.mxu0 %v8840_v0 }
 0x15a   : > { %3820 = vmatmul.mubr.f32.gmra.mrb[10].mxu1 %v9326_v57  ;;  %5118 = vmatprep.subr.bf16.mxu0 %v9329_v51 }
 0x15b   : > { %5260 = vmatpush1.bf16.msra.mxu1 %v9328_v32  ;;  %3825 = vmatprep.mubr.f32.mxu1 %v8840_v0 }
 0x15c   : > { %5262 = vmatprep.subr.bf16.mxu1 %v9330_v16  ;;  %2931 = vmatmul.mubr.f32.gmra.mrb[12].mxu0 %v9331_v4 }
 0x15d   : > { %5120 = vmatpush1.bf16.msra.mxu0 %v9332_v56  ;;  %2936 = vmatprep.mubr.f32.mxu0 %v8840_v0  ;;  %v9356_v56 = vld [vmem:[#allocation16_spill] sm:$0xff] }
 0x15e   : > { %3829 = vmatmul.mubr.f32.gmra.mrb[12].mxu1 %v9331_v4  ;;  %5122 = vmatprep.subr.bf16.mxu0 %v9333_v55 }
 0x15f   : > { %5264 = vmatpush1.bf16.msra.mxu1 %v7793_v1  ;;  %3834 = vmatprep.mubr.f32.mxu1 %v8840_v0  ;;  %v9339_v1 = vld [vmem:[#allocation58_spill] sm:$0xff] }
 0x160   : > { %5266 = vmatprep.subr.bf16.mxu1 %v7805_v5  ;;  %2940 = vmatmul.mubr.f32.gmra.mrb[14].mxu0 %v9334_v50 }
 0x161   : > { %5124 = vmatpush1.bf16.msra.mxu0 %v9335_v30  ;;  %3082 = vmatprep.mubr.f32.mxu0 %v8840_v0 }
 0x162   : > { %3838 = vmatmul.mubr.f32.gmra.mrb[14].mxu1 %v9334_v50  ;;  %5126 = vmatprep.subr.bf16.mxu0 %v9337_v22 }
 0x163   : > { %5268 = vmatpush1.bf16.msra.mxu1 %v9336_v23  ;;  %3980 = vmatprep.mubr.f32.mxu1 %v8840_v0 }
 0x164   : > { %5270 = vmatprep.subr.bf16.mxu1 %v9338_v21 }
 0x165   : > { %5128 = vmatpush1.bf16.msra.mxu0 %v9339_v1 }
 0x166   : > { %5130 = vmatprep.subr.bf16.mxu0 %v7853_v41 }
 0x167   : > { %5272 = vmatpush1.bf16.msra.mxu1 %v7846_v26 }
 0x168   : > { %5274 = vmatprep.subr.bf16.mxu1 %v7859_v49 }
 0x169   : > { %5132 = vmatpush1.bf16.msra.mxu0 %v7865_v29 }
 0x16a   : > { %5134 = vmatprep.subr.msk.bf16.mxu0 %vm7099_vm1, %v9280_v8  ;;  %vm9340_vm1 = vnez %v9290_v14  ;;  %v8234_v14 = vrot.slane %v310_v19, %v9348_v27 }
 0x16b   : > { %5276 = vmatpush1.bf16.msra.mxu1 %v7875_v7 }
 0x16c   : > { %5278 = vmatprep.subr.msk.bf16.mxu1 %vm7119_vm2, %v9280_v8  ;;  %3084 = vmatmul.mubr.f32.vlgmr.msra.gmra.mrb[8].mxu0 %v9270_v17  ;;  %vm9341_vm2 = vnez %v9291_v43  ;;  %v9349_v43 = vld [vmem:[#allocation9_spill] sm:$0xff] }
 0x16d   : > { %5136 = vmatpush1.bf16.msk.msra.mxu0 %vm7140_vm8, %v9280_v8  ;;  %3089 = vmatprep.mubr.f32.mxu0 %v8840_v0  ;;  %vm9342_vm8 = vnez %v9292_v47  ;;  %v8237_v47 = vrot.slane %v310_v19, %v9349_v43 }
 0x16e   : > { %3982 = vmatmul.mubr.f32.vlgmr.msra.gmra.mrb[8].mxu1 %v9270_v17  ;;  %5138 = vmatprep.subr.msk.bf16.mxu0 %vm7182_vm15, %v9280_v8  ;;  %vm9345_vm15 = vnez %v9301_v34 }
 0x16f   : > { %5280 = vmatpush1.bf16.msk.msra.mxu1 %vm7164_vm3, %v9280_v8  ;;  %3987 = vmatprep.mubr.f32.mxu1 %v8840_v0  ;;  %vm9344_vm3 = vnez %v9299_v31  ;;  %v9351_v31 = vld [vmem:[#allocation10_spill] sm:$0xff] }
 0x170   : > { %5282 = vmatprep.subr.msk.bf16.mxu1 %vm7204_vm0, %v9280_v8  ;;  %3091 = vmatmul.mubr.f32.gmra.mrb[10].mxu0 %v9276_v39  ;;  %vm9346_vm0 = vnez %v9304_v63  ;;  %v8243_v34 = vrot.slane %v310_v19, %v9351_v31  ;;  %v9353_v63 = vld [vmem:[#allocation13_spill] sm:$0xff] }
 0x171   : > { %5140 = vmatpush1.bf16.msk.msra.mxu0 %vm7227_vm11, %v9280_v8  ;;  %3096 = vmatprep.mubr.f32.mxu0 %v8840_v0  ;;  %vm9343_vm11 = vnez %v9295_v33  ;;  %v9350_v33 = vld [vmem:[#allocation12_spill] sm:$0xff] }
 0x172   : > { %3989 = vmatmul.mubr.f32.gmra.mrb[10].mxu1 %v9276_v39  ;;  %5142 = vmatprep.subr.msk.bf16.mxu0 %vm9341_vm2, %v9280_v8  ;;  %v8240_v60 = vrot.slane %v310_v19, %v9350_v33  ;;  %vm621_vm2 = vcmp.eq.s32.totalorder %v9354_v10, %v8237_v47 }
 0x173   : > { %5284 = vmatpush1.bf16.msk.msra.mxu1 %vm9340_vm1, %v9280_v8  ;;  %3994 = vmatprep.mubr.f32.mxu1 %v8840_v0  ;;  %vm620_vm1 = vcmp.eq.s32.totalorder %v9354_v10, %v8234_v14  ;;  %v4551_v3 = vsel %vm621_vm2, 1.0, %v8840_v0 }
 0x174   : > { %5286 = vmatprep.subr.msk.bf16.mxu1 %vm9342_vm8, %v9280_v8  ;;  %3098 = vmatmul.mubr.f32.gmra.mrb[12].mxu0 %v9278_v15  ;;  %vm622_vm8 = vcmp.eq.s32.totalorder %v9354_v10, %v8240_v60  ;;  %v4550_v58 = vsel %vm620_vm1, 1.0, %v8840_v0 }
 0x175   : > { %5144 = vmatpush1.bf16.msk.msra.mxu0 %vm9343_vm11, %v9280_v8  ;;  %3103 = vmatprep.mubr.f32.mxu0 %v8840_v0  ;;  %vm623_vm11 = vcmp.eq.s32.totalorder %v9354_v10, %v8243_v34  ;;  %v4552_v57 = vsel %vm622_vm8, 1.0, %v8840_v0 }
 0x176   : > { %3996 = vmatmul.mubr.f32.gmra.mrb[12].mxu1 %v9278_v15  ;;  %5146 = vmatprep.subr.msk.bf16.mxu0 %vm9344_vm3, %v9280_v8  ;;  %vm624_vm3 = vcmp.eq.s32.totalorder %v9355_v38, %v8234_v14  ;;  %v4553_v32 = vsel %vm623_vm11, 1.0, %v8840_v0 }
 0x177   : > { %5288 = vmatpush1.bf16.msk.msra.mxu1 %vm9298_vm10, %v9280_v8  ;;  %4001 = vmatprep.mubr.f32.mxu1 %v8840_v0  ;;  %vm9347_vm10 = vnez %v9310_v62  ;;  %v4554_v4 = vsel %vm624_vm3, 1.0, %v8840_v0 }
 0x178   : > { %5290 = vmatprep.subr.msk.bf16.mxu1 %vm9345_vm15, %v9280_v8  ;;  %3105 = vmatmul.mubr.f32.gmra.mrb[14].mxu0 %v9279_v24  ;;  %vm625_vm15 = vcmp.eq.s32.totalorder %v9355_v38, %v8237_v47 }
 0x179   : > { %5148 = vmatpush1.bf16.msk.msra.mxu0 %vm9346_vm0, %v9280_v8  ;;  %3199 = vmatprep.mubr.f32.mxu0 %v8840_v0  ;;  %vm626_vm0 = vcmp.eq.s32.totalorder %v9355_v38, %v8240_v60  ;;  %v4555_v19 = vsel %vm625_vm15, 1.0, %v8840_v0 }
 0x17a   : > { %4003 = vmatmul.mubr.f32.gmra.mrb[14].mxu1 %v9279_v24  ;;  %5150 = vmatprep.subr.msk.bf16.mxu0 %vm9309_vm14, %v9280_v8  ;;  %vm618_vm14 = vcmp.eq.s32.totalorder %v9353_v63, %v8240_v60  ;;  %v4556_v27 = vsel %vm626_vm0, 1.0, %v8840_v0 }
 0x17b   : > { %5292 = vmatpush1.bf16.msk.msra.mxu1 %vm9307_vm5, %v9280_v8  ;;  %4097 = vmatprep.mubr.f32.mxu1 %v8840_v0  ;;  %vm613_vm5 = vcmp.eq.s32.totalorder %v9352_v2, %v8237_v47  ;;  %v4548_v9 = vsel %vm618_vm14, 1.0, %v8840_v0 }
 0x17c   : > { %5294 = vmatprep.subr.msk.bf16.mxu1 %vm9347_vm10, %v9280_v8  ;;  %v4543_v45 = vsel %vm613_vm5, 1.0, %v8840_v0  ;;  %vm627_vm10 = vcmp.eq.s32.totalorder %v9355_v38, %v8243_v34  ;;  %vm629_vm5 = vcmp.eq.s32.totalorder %v9356_v56, %v8237_v47 }
 0x17d   : > { %5152 = vmatpush1.bf16.msk.msra.mxu0 %vm7488_vm9, %v9280_v8  ;;  %vm616_vm9 = vcmp.eq.s32.totalorder %v9353_v63, %v8234_v14  ;;  %v4557_v43 = vsel %vm627_vm10, 1.0, %v8840_v0 }
 0x17e   : > { %5154 = vmatprep.subr.msk.bf16.mxu0 %vm9315_vm6, %v9280_v8  ;;  %vm619_vm6 = vcmp.eq.s32.totalorder %v9353_v63, %v8243_v34  ;;  %v4546_v62 = vsel %vm616_vm9, 1.0, %v8840_v0  ;;  %vm630_vm9 = vcmp.eq.s32.totalorder %v9356_v56, %v8240_v60 }
 0x17f   : > { %5296 = vmatpush1.bf16.msk.msra.mxu1 %vm7512_vm4, %v9280_v8  ;;  %vm612_vm4 = vcmp.eq.s32.totalorder %v9352_v2, %v8234_v14  ;;  %v4549_v37 = vsel %vm619_vm6, 1.0, %v8840_v0 }
 0x180   : > { %5298 = vmatprep.subr.msk.bf16.mxu1 %vm7549_vm13, %v9280_v8  ;;  %vm615_vm13 = vcmp.eq.s32.totalorder %v9352_v2, %v8243_v34  ;;  %v4542_v46 = vsel %vm612_vm4, 1.0, %v8840_v0  ;;  %vm628_vm4 = vcmp.eq.s32.totalorder %v9356_v56, %v8234_v14 }
 0x181   : > { %5156 = vmatpush1.bf16.msk.msra.mxu0 %vm7583_vm7, %v9280_v8  ;;  %vm617_vm7 = vcmp.eq.s32.totalorder %v9353_v63, %v8237_v47  ;;  %v4545_v52 = vsel %vm615_vm13, 1.0, %v8840_v0  ;;  %v4558_v31 = vsel %vm628_vm4, 1.0, %v8840_v0  ;;  %v9357_v63 = vld [vmem:[#allocation17_spill] sm:$0xff] }
 0x182   : > { %v4547_v13 = vsel %vm617_vm7, 1.0, %v8840_v0  ;;  %vm632_vm13 = vcmp.eq.s32.totalorder %v9357_v63, %v8234_v14  ;;  %vm633_vm7 = vcmp.eq.s32.totalorder %v9357_v63, %v8237_v47  ;;  %vm634_vm14 = vcmp.eq.s32.totalorder %v9357_v63, %v8240_v60 }
 0x183   : > { %5300 = vmatpush1.bf16.msk.msra.mxu1 %vm7608_vm12, %v9280_v8  ;;  %vm614_vm12 = vcmp.eq.s32.totalorder %v9352_v2, %v8240_v60  ;;  %vm635_vm6 = vcmp.eq.s32.totalorder %v9357_v63, %v8243_v34 }
 0x184   : > { %3201 = vmatmul.mubr.f32.vlgmr.msra.gmra.mrb[8].mxu0 %v9270_v17  ;;  %v4544_v48 = vsel %vm614_vm12, 1.0, %v8840_v0  ;;  %vm631_vm12 = vcmp.eq.s32.totalorder %v9356_v56, %v8243_v34  ;;  %v9359_v56 = vld [vmem:[#allocation19_spill] sm:$0xff] }
 0x185   : > { %3206 = vmatprep.mubr.f32.mxu0 %v8840_v0  ;;  %vm640_vm3 = vcmp.eq.s32.totalorder %v9359_v56, %v8234_v14  ;;  %vm641_vm15 = vcmp.eq.s32.totalorder %v9359_v56, %v8237_v47  ;;  %vm642_vm0 = vcmp.eq.s32.totalorder %v9359_v56, %v8240_v60  ;;  %vm643_vm10 = vcmp.eq.s32.totalorder %v9359_v56, %v8243_v34 }
 0x186   : > { %4099 = vmatmul.mubr.f32.vlgmr.msra.gmra.mrb[8].mxu1 %v9270_v17 }
 0x187   : > { %4104 = vmatprep.mubr.f32.mxu1 %v8840_v0 }
 0x188   : > { %3208 = vmatmul.mubr.f32.gmra.mrb[10].mxu0 %v9276_v39 }
 0x189   : > { %3213 = vmatprep.mubr.f32.mxu0 %v8840_v0 }
 0x18a   : > { %4106 = vmatmul.mubr.f32.gmra.mrb[10].mxu1 %v9276_v39 }
 0x18b   : > { %4111 = vmatprep.mubr.f32.mxu1 %v8840_v0 }
 0x18c   : > { %3215 = vmatmul.mubr.f32.gmra.mrb[12].mxu0 %v9278_v15 }
 0x18d   : > { %3220 = vmatprep.mubr.f32.mxu0 %v8840_v0 }
 0x18e   : > { %4113 = vmatmul.mubr.f32.gmra.mrb[12].mxu1 %v9278_v15 }
 0x18f   : > { %4118 = vmatprep.mubr.f32.mxu1 %v8840_v0 }
 0x190   : > { %3222 = vmatmul.mubr.f32.gmra.mrb[14].mxu0 %v9279_v24 }
 0x192   : > { %4120 = vmatmul.mubr.f32.gmra.mrb[14].mxu1 %v9279_v24 }
 0x193   : > { %v4147_v54 = vpop.permute.xlu1 %4146 }
 0x194   : > { %v4182_v51 = vmul.f32 %v4550_v58, %v4147_v54  ;;  %v4183_v55 = vmul.f32 %v4551_v3, %v4147_v54  ;;  %v4184_v50 = vmul.f32 %v4552_v57, %v4147_v54  ;;  %v4185_v21 = vmul.f32 %v4553_v32, %v4147_v54 }
 0x195   : > { %v4561_v54 = vsel %vm631_vm12, 1.0, %v8840_v0  ;;  %v4562_v58 = vsel %vm632_vm13, 1.0, %v8840_v0  ;;  %v4563_v57 = vsel %vm633_vm7, 1.0, %v8840_v0  ;;  %v4565_v32 = vsel %vm635_vm6, 1.0, %v8840_v0 }
 0x199   : > { %v4152_v22 = vpop.permute.xlu1 %4151 }
 0x1a3   : > { %v4137_v36 = vpop.permute.xlu0 %4136 }
 0x1a4   : > { %v4174_v28 = vmul.f32 %v4542_v46, %v4137_v36  ;;  %v4175_v59 = vmul.f32 %v4543_v45, %v4137_v36  ;;  %v4176_v42 = vmul.f32 %v4544_v48, %v4137_v36  ;;  %v4177_v40 = vmul.f32 %v4545_v52, %v4137_v36 }
 0x1a5   : > { %v8200_v5 = vpop.f32.mrb[0].mxu0  ;;  %v4186_v36 = vmul.f32 %v4554_v4, %v4152_v22  ;;  %v4187_v46 = vmul.f32 %v4555_v19, %v4152_v22  ;;  %v4188_v45 = vmul.f32 %v4556_v27, %v4152_v22  ;;  %v4189_v48 = vmul.f32 %v4557_v43, %v4152_v22 }
 0x1a6   : > { %v8202_v26 = vpop.f32.mrb[0].mxu1  ;;  %v8204_v41 = vpop.f32.mrb[1].mxu0 }
 0x1a7   : > { %v8206_v49 = vpop.f32.mrb[1].mxu1  ;;  %v4142_v53 = vpop.permute.xlu0 %4141 }
 0x1a8   : > { %v4178_v44 = vmul.f32 %v4546_v62, %v4142_v53  ;;  %v4179_v61 = vmul.f32 %v4547_v13, %v4142_v53  ;;  %v4180_v6 = vmul.f32 %v4548_v9, %v4142_v53  ;;  %v4181_v12 = vmul.f32 %v4549_v37, %v4142_v53 }
 0x1a9   : > { %v8208_v29 = vpop.f32.mrb[2].mxu0  ;;  %v4559_v13 = vsel %vm629_vm5, 1.0, %v8840_v0  ;;  %v4560_v9 = vsel %vm630_vm9, 1.0, %v8840_v0 }
 0x1aa   : > { %v8210_v7 = vpop.f32.mrb[2].mxu1  ;;  %v8212_v17 = vpop.f32.mrb[3].mxu0  ;;  %v4206_v16 = vadd.f32 %v4178_v44, %v4174_v28  ;;  %v4219_v30 = vadd.f32 %v4179_v61, %v4175_v59  ;;  %v4232_v23 = vadd.f32 %v4180_v6, %v4176_v42  ;;  %v4245_v1 = vadd.f32 %v4181_v12, %v4177_v40  ;;  %v9358_v44 = vld [vmem:[#allocation18_spill] sm:$0xff] }
 0x1ab   : > { %v8214_v39 = vpop.f32.mrb[3].mxu1  ;;  %vm636_vm1 = vcmp.eq.s32.totalorder %v9358_v44, %v8234_v14  ;;  %v4564_v12 = vsel %vm634_vm14, 1.0, %v8840_v0  ;;  %vm637_vm2 = vcmp.eq.s32.totalorder %v9358_v44, %v8237_v47  ;;  %vm638_vm8 = vcmp.eq.s32.totalorder %v9358_v44, %v8240_v60 }
 0x1ac   : > { %v4207_v33 = vadd.f32 %v4206_v16, %v4182_v51  ;;  %v4220_v10 = vadd.f32 %v4219_v30, %v4183_v55  ;;  %v4233_v53 = vadd.f32 %v4232_v23, %v4184_v50  ;;  %v4157_v62 = vpop.permute.xlu0 %4156  ;;  %v4246_v52 = vadd.f32 %v4245_v1, %v4185_v21 }
 0x1ad   : > { %v8216_v15 = vpop.f32.mrb[4].mxu0  ;;  %v4190_v28 = vmul.f32 %v4558_v31, %v4157_v62  ;;  %v4191_v42 = vmul.f32 %v4559_v13, %v4157_v62  ;;  %v4192_v61 = vmul.f32 %v4560_v9, %v4157_v62  ;;  %v4193_v3 = vmul.f32 %v4561_v54, %v4157_v62 }
 0x1ae   : > { %v8218_v24 = vpop.f32.mrb[4].mxu1  ;;  %v8220_v8 = vpop.f32.mrb[5].mxu0  ;;  %v4208_v37 = vadd.f32 %v4207_v33, %v4186_v36  ;;  %v4221_v38 = vadd.f32 %v4220_v10, %v4187_v46  ;;  %v4234_v59 = vadd.f32 %v4233_v53, %v4188_v45  ;;  %v4247_v40 = vadd.f32 %v4246_v52, %v4189_v48 }
 0x1af   : > { %v8222_v11 = vpop.f32.mrb[5].mxu1  ;;  %vm639_vm11 = vcmp.eq.s32.totalorder %v9358_v44, %v8243_v34  ;;  %v4566_v4 = vsel %vm636_vm1, 1.0, %v8840_v0  ;;  %v4567_v19 = vsel %vm637_vm2, 1.0, %v8840_v0  ;;  %v4568_v27 = vsel %vm638_vm8, 1.0, %v8840_v0 }
 0x1b0   : > { %v4162_v6 = vpop.permute.xlu1 %4161  ;;  %v4209_v51 = vadd.f32 %v4208_v37, %v4190_v28  ;;  %v4222_v55 = vadd.f32 %v4221_v38, %v4191_v42  ;;  %v4235_v50 = vadd.f32 %v4234_v59, %v4192_v61  ;;  %v4167_v22 = vpop.permute.xlu0 %4166  ;;  %v4248_v21 = vadd.f32 %v4247_v40, %v4193_v3 }
 0x1b1   : > { %v8224_v20 = vpop.f32.mrb[6].mxu0  ;;  %v4194_v16 = vmul.f32 %v4562_v58, %v4162_v6  ;;  %v4195_v30 = vmul.f32 %v4563_v57, %v4162_v6  ;;  %v4196_v23 = vmul.f32 %v4564_v12, %v4162_v6  ;;  %v4197_v1 = vmul.f32 %v4565_v32, %v4162_v6 }
 0x1b2   : > { %v8226_v18 = vpop.f32.mrb[6].mxu1  ;;  %v8228_v25 = vpop.f32.mrb[7].mxu0  ;;  %v4569_v43 = vsel %vm639_vm11, 1.0, %v8840_v0  ;;  %v4198_v36 = vmul.f32 %v4566_v4, %v4167_v22  ;;  %v4570_v31 = vsel %vm640_vm3, 1.0, %v8840_v0  ;;  %v4199_v63 = vmul.f32 %v4567_v19, %v4167_v22 }
 0x1b3   : > { %v8230_v35 = vpop.f32.mrb[7].mxu1  ;;  %v4210_v33 = vadd.f32 %v4209_v51, %v4194_v16  ;;  %v4200_v46 = vmul.f32 %v4568_v27, %v4167_v22  ;;  %v4223_v45 = vadd.f32 %v4222_v55, %v4195_v30  ;;  %v4236_v10 = vadd.f32 %v4235_v50, %v4196_v23 }
 0x1b4   : > { %v4172_v53 = vpop.permute.xlu1 %4171  ;;  %v4201_v62 = vmul.f32 %v4569_v43, %v4167_v22  ;;  %v4249_v47 = vadd.f32 %v4248_v21, %v4197_v1  ;;  %v4571_v48 = vsel %vm641_vm15, 1.0, %v8840_v0  ;;  %v4572_v60 = vsel %vm642_vm0, 1.0, %v8840_v0 }
 0x1b5   : > { %v4573_v52 = vsel %vm643_vm10, 1.0, %v8840_v0  ;;  %v4211_v13 = vadd.f32 %v4210_v33, %v4198_v36  ;;  %v4202_v34 = vmul.f32 %v4570_v31, %v4172_v53  ;;  %v4224_v9 = vadd.f32 %v4223_v45, %v4199_v63 }
 0x1b6   : > { %v4237_v54 = vadd.f32 %v4236_v10, %v4200_v46  ;;  %v4203_v37 = vmul.f32 %v4571_v48, %v4172_v53  ;;  %v4204_v14 = vmul.f32 %v4572_v60, %v4172_v53  ;;  %v4250_v58 = vadd.f32 %v4249_v47, %v4201_v62 }
 0x1b7   : > { %v4205_v44 = vmul.f32 %v4573_v52, %v4172_v53  ;;  %v4212_v3 = vadd.f32 %v4211_v13, %v4202_v34 }
 0x1b8   : > { %v4225_v57 = vadd.f32 %v4224_v9, %v4203_v37  ;;  %v4238_v12 = vadd.f32 %v4237_v54, %v4204_v14 }
 0x1b9   : > { %v4251_v51 = vadd.f32 %v4250_v58, %v4205_v44 }
 0x1ba   : > { %v4226_v23 = vrot.slane %v4225_v57, 4  ;;  %v4239_v22 = vrot.slane %v4238_v12, 4 }
 0x1bb   : > { %v4252_v19 = vrot.slane %v4251_v51, 4 }
 0x1bc   : > { %v4227_v46 = vadd.f32 %v4226_v23, %v4225_v57  ;;  %v4240_v45 = vadd.f32 %v4239_v22, %v4238_v12 }
 0x1bd   : > { %v4253_v47 = vadd.f32 %v4252_v19, %v4251_v51  ;;  %v5615_v51 = vmov 1966171168  }
 0x1be   : > { %v4228_v54 = vrot.slane %v4227_v46, 2  ;;  %v4241_v37 = vrot.slane %v4240_v45, 2 }
 0x1bf   : > { %v4254_v58 = vrot.slane %v4253_v47, 2 }
 0x257   : > { %v3202_v28 = vpop.f32.mrb[8].mxu0 }
 0x258   : > { %v4258_v38 = vmul.f32 %v3202_v28, %v8200_v5  ;;  %v3204_v42 = vpop.f32.mrb[9].mxu0 }
 0x259   : > { %v4100_v59 = vpop.f32.mrb[8].mxu1  ;;  %v4259_v6 = vmul.f32 %v3204_v42, %v8204_v41 }
 0x25a   : > { %v4260_v61 = vmul.f32 %v4100_v59, %v8202_v26  ;;  %v4102_v40 = vpop.f32.mrb[9].mxu1  ;;  %v4213_v26 = vrot.slane %v4212_v3, 4 }
 0x25b   : > { %v4261_v0 = vmul.f32 %v4102_v40, %v8206_v49  ;;  %v3209_v32 = vpop.f32.mrb[10].mxu0  ;;  %v4242_v40 = vadd.f32 %v4241_v37, %v4240_v45 }
 0x25c   : > { %v4262_v16 = vmul.f32 %v3209_v32, %v8208_v29  ;;  %v3211_v56 = vpop.f32.mrb[11].mxu0  ;;  %v4214_v31 = vadd.f32 %v4213_v26, %v4212_v3 }
 0x25d   : > { %v4107_v4 = vpop.f32.mrb[10].mxu1  ;;  %v4263_v55 = vmul.f32 %v3211_v56, %v8212_v17 }
 0x25e   : > { %v4264_v5 = vmul.f32 %v4107_v4, %v8210_v7  ;;  %v4109_v50 = vpop.f32.mrb[11].mxu1  ;;  %v4274_v30 = vadd.f32 %v4262_v16, %v4258_v38  ;;  %v4215_v34 = vrot.slane %v4214_v31, 2  ;;  %v4321_v16 = vunpack.c.l.s4 %v5615_v51 }
 0x25f   : > { %v4265_v41 = vmul.f32 %v4109_v50, %v8214_v39  ;;  %v4283_v21 = vadd.f32 %v4263_v55, %v4259_v6  ;;  %v3216_v1 = vpop.f32.mrb[12].mxu0  ;;  %v4243_v50 = vrot.slane %v4242_v40, 1 }
 0x260   : > { %v4292_v49 = vadd.f32 %v4264_v5, %v4260_v61  ;;  %v4266_v29 = vmul.f32 %v3216_v1, %v8216_v15  ;;  %v3218_v36 = vpop.f32.mrb[13].mxu0  ;;  %v4216_v42 = vadd.f32 %v4215_v34, %v4214_v31  ;;  %v4322_v1 = vunpack.c.0.s8 %v4321_v16 }
 0x261   : > { %v4301_v27 = vadd.f32 %v4265_v41, %v4261_v0  ;;  %v4114_v43 = vpop.f32.mrb[12].mxu1  ;;  %v4267_v17 = vmul.f32 %v3218_v36, %v8220_v8  ;;  %v4255_v0 = vadd.f32 %v4254_v58, %v4253_v47  ;;  %v4244_v36 = vadd.f32 %v4243_v50, %v4242_v40 }
 0x262   : > { %v4268_v7 = vmul.f32 %v4114_v43, %v8218_v24  ;;  %v4116_v33 = vpop.f32.mrb[13].mxu1  ;;  %v4275_v63 = vadd.f32 %v4274_v30, %v4266_v29  ;;  %v4217_v4 = vrot.slane %v4216_v42, 1  ;;  %v4325_v45 = vsub.s32 %v4322_v1, %v9352_v2 }
 0x263   : > { %v4269_v39 = vmul.f32 %v4116_v33, %v8222_v11  ;;  %v4284_v53 = vadd.f32 %v4283_v21, %v4267_v17  ;;  %v3223_v62 = vpop.f32.mrb[14].mxu0  ;;  %v4256_v41 = vrot.slane %v4255_v0, 1 }
 0x264   : > { %v4293_v10 = vadd.f32 %v4292_v49, %v4268_v7  ;;  %v4270_v15 = vmul.f32 %v3223_v62, %v8224_v20  ;;  %v3225_v52 = vpop.f32.mrb[15].mxu0  ;;  %v4218_v19 = vadd.f32 %v4217_v4, %v4216_v42 }
 0x265   : > { %v4302_v48 = vadd.f32 %v4301_v27, %v4269_v39  ;;  %v4121_v60 = vpop.f32.mrb[14].mxu1  ;;  %v4271_v8 = vmul.f32 %v3225_v52, %v8228_v25  ;;  %v4257_v33 = vadd.f32 %v4256_v41, %v4255_v0 }
 0x266   : > { %v4272_v24 = vmul.f32 %v4121_v60, %v8226_v18  ;;  %v4123_v13 = vpop.f32.mrb[15].mxu1  ;;  %v4276_v9 = vadd.f32 %v4275_v63, %v4270_v15  ;;  %v4229_v18 = vadd.f32 %v4228_v54, %v4227_v46  ;;  %v9360_v60 = vlaneseq }
 0x267   : > { %v4273_v11 = vmul.f32 %v4123_v13, %v8230_v35  ;;  %v4285_v28 = vadd.f32 %v4284_v53, %v4271_v8 }
 0x268   : > { %v4294_v14 = vadd.f32 %v4293_v10, %v4272_v24  ;;  %v4277_v44 = vrot.slane %v4276_v9, 4  ;;  %v4230_v55 = vrot.slane %v4229_v18, 1  ;;  %vm4345_vm4 = vcmp.lt.s32.totalorder %v9360_v60, 512 }
 0x269   : > { %v4303_v38 = vadd.f32 %v4302_v48, %v4273_v11  ;;  %v4286_v20 = vrot.slane %v4285_v28, 4 }
 0x26a   : > { %v4295_v59 = vrot.slane %v4294_v14, 4  ;;  %v4278_v61 = vadd.f32 %v4277_v44, %v4276_v9  ;;  %v4231_v43 = vadd.f32 %v4230_v55, %v4229_v18 }
 0x26b   : > { %v4304_v6 = vrot.slane %v4303_v38, 4  ;;  %v4287_v3 = vadd.f32 %v4286_v20, %v4285_v28 }
 0x26c   : > { %v4296_v25 = vadd.f32 %v4295_v59, %v4294_v14  ;;  %v4279_v57 = vrot.slane %v4278_v61, 2 }
 0x26d   : > { %v4305_v12 = vadd.f32 %v4304_v6, %v4303_v38  ;;  %v4288_v32 = vrot.slane %v4287_v3, 2 }
 0x26e   : > { %v4297_v35 = vrot.slane %v4296_v25, 2  ;;  %v4280_v56 = vadd.f32 %v4279_v57, %v4278_v61 }
 0x26f   : > { %v4306_v5 = vrot.slane %v4305_v12, 2  ;;  %v4289_v30 = vadd.f32 %v4288_v32, %v4287_v3 }
 0x270   : > { %v4298_v26 = vadd.f32 %v4297_v35, %v4296_v25  ;;  %v4281_v23 = vrot.slane %v4280_v56, 1 }
 0x271   : > { %v4307_v22 = vadd.f32 %v4306_v5, %v4305_v12  ;;  %v4290_v21 = vrot.slane %v4289_v30, 1 }
 0x272   : > { %v4299_v49 = vrot.slane %v4298_v26, 1  ;;  %v4282_v27 = vadd.f32 %v4281_v23, %v4280_v56 }
 0x273   : > { %v4308_v29 = vrot.slane %v4307_v22, 1  ;;  %v4291_v17 = vadd.f32 %v4290_v21, %v4289_v30 }
 0x274   : > { %v4300_v7 = vadd.f32 %v4299_v49, %v4298_v26  ;;  %v4310_v31 = vadd.f32 %v4282_v27, %v4218_v19 }
 0x275   : > { %v4309_v63 = vadd.f32 %v4308_v29, %v4307_v22  ;;  %v4311_v46 = vadd.f32 %v4291_v17, %v4231_v43 }
 0x276   : > { %v4312_v39 = vadd.f32 %v4300_v7, %v4244_v36 }
 0x277   : > { %v4313_v10 = vadd.f32 %v4309_v63, %v4257_v33  ;;  %v4318_v53 = vcombine.low %v4310_v31, %v4311_v46 }
 0x279   : > { %v4319_v62 = vcombine.low %v4312_v39, %v4313_v10  ;;  %v4326_v47 = vrot.slane %v4318_v53, %v4325_v45 }
 0x27b   : > { %v4333_v48 = vrot.slane %v4319_v62, %v4325_v45 }
 0x27d   : > { %v4334_v15 = vcombine.low %v4326_v47, %v4333_v48 }
 0x27f   : > { %v4341_v52 = vrot.slane %v4334_v15, %v4325_v45 }
 0x281   : > { %4347 = vst.msk [vmem:[%s295_s16] sm:$0xf] %vm4345_vm4, %v4341_v52 }
 0x282   : > { %5556 = shalt.err (!%p5553_p5)
}
 0x283   : > { %s5557_s26 = scalar_lea.hbm %s8377_s11, 64  ;;  %s5561_s18 = scalar_lea.hbm %s8427_s6, 128 }
 0x284   : > { %p5558_p8 = scmp.ne.s32.totalorder %s8377_s11, %s5557_s26  ;;  %p5562_p1 = scmp.lt.u32.totalorder %s8377_s11, %s8427_s6 }
 0x285   : > { %p5563_p3 = scmp.lt.u32.totalorder %s5561_s18, %s5557_s26  ;;  %p5565_p6 = scmp.lt.u32.totalorder %s5557_s26, %s8377_s11 }
 0x286   : > { %p5559_p9 = pnand %p5558_p8, %p9361_p12 }
 0x287   : > { %p5564_p11 = por %p5563_p3, %p5562_p1 }
 0x288   : > { %p5560_p0 = pneg %p5559_p9 }
 0x289   : > { %p5566_p13 = por %p5565_p6, %p5564_p11 }
 0x28b   : > { %p5567_p7 = pnand %p5566_p13, %p5560_p0 }
 0x28d   : > { %5570 = shalt.err (!%p5567_p7)
}
 0x28e   : > { %5463 = dma.vmem_to_hbm [thread:$0]  (%p9361_p12), %s8379_s7, 64, %s8377_s11, %s4349_s14  }
 0x28f PF: > { %s4375_s16 = sand.u32 1, %s5597_s21   ;;  %p9362_p10 = scmp.ne.s32.totalorder %s8758_s10, 0 }
 0x290   : > { %p9363_p2 = scmp.ge.s32.totalorder %s5609_s24, 2  ;;  %s4376_s12 = scalar_lea.sflag [#allocation4], %s4375_s16 }
 0x292   : > { %p5470_p4 = pnand %p9363_p2, %p9362_p10 }
 0x294   : > { %5592 = dma.done.wait (!%p5470_p4), %s4376_s12, 64  }
 0x295   : > { %5594 = vsyncadd (!%p5470_p4), %s4376_s12, 4294967232  ;;  %p19_p5 = scmp.ge.s32.totalorder %s5677_s27, 4   ;;  %s9364_s21 = smov %s5601_s22 }
 0x296   : > { %s9365_s22 = smov %s5605_s23  ;;  %s9366_s23 = smov %s5689_s30 }
 0x297   : > { %s9367_s24 = smov %s5677_s27  ;;  %21 = sbr.rel (!%p19_p5) target bundleno = 5 (0x5), region = 95 }
 0x29e   :  { %4381 = vsyncpa [#allocation3], 1 }
 0x29f   :  { %4383 = vsyncpa [#allocation3 + $0x1], 1 }
 0x2a0   :  { %4384 = vsyncpa [#allocation4], 1 }
 0x2a1   :  { %4386 = vsyncpa [#allocation4 + $0x1], 1 }

</bundles_post_ra>
